<compile_context>
chip_gen: v7x
topology: tpu7x:2x2x1
jax: 0.10.0
libtpu: 0.0.40
codegen_flags: <defaults>
</compile_context>

<pallas_src>
import functools

import jax
import jax.numpy as jnp
from jax.experimental import pallas as pl
from jax.experimental.pallas import tpu as pltpu


# -----------------------------------------------------------------------------
# Fused kernel: MaxPool2d(2) -> (Conv3x3 + BN + ReLU) -> (Conv3x3 + BN + ReLU)
# grid = (N, num_row_tiles);  each step produces TH output rows of one image.
# -----------------------------------------------------------------------------
def down_fused_kernel(x_ref, w1_ref, s1_ref, b1_ref, w2_ref, s2_ref, b2_ref,
                      o_ref, p_pad, y1_pad, *, th):
    # x_ref : (1, H, W, Cin)          one batch element, NHWC (full image)
    # w1_ref: (9, Cin, Cmid)          conv1 weights, tap-major (kh*3+kw)
    # s1/b1 : (1, Cmid)               folded BN scale / (bias+BN) shift, f32
    # w2_ref: (9, Cmid, Cout)
    # s2/b2 : (1, Cout)
    # o_ref : (1, th, Wo, Cout)       this tile's output rows
    # scratch (VMEM, compute dtype), persistent across grid steps:
    #   p_pad : (Hp, Wo+2, Cin)       per-image pooled map, 2-row/1-col zero halo
    #   y1_pad: (th+2, Wo+2, Cmid)    per-tile conv1 rows (+halo), 1-col zero pad
    _, H, W, Cin = x_ref.shape
    Ho, Wo = H // 2, W // 2
    Cmid = w1_ref.shape[-1]
    Cout = w2_ref.shape[-1]
    Hp, Wp = p_pad.shape[0], p_pad.shape[1]
    cdt = p_pad.dtype

    t = pl.program_id(1)
    r0 = t * th                       # first output row of this tile

    # ---- per-image phase (first row tile only): maxpool + halo-padded store -
    # p_pad row index p <-> pooled row p-2 ; col index c <-> pooled col c-1.
    @pl.when(t == 0)
    def _():
        x5 = x_ref[0].reshape(Ho, 2, Wo, 2, Cin)
        pooled = jnp.max(jnp.max(x5, axis=3), axis=1)          # (Ho, Wo, Cin)
        # border-only zeroing; the interior is fully overwritten below.
        p_pad[0:2, :, :] = jnp.zeros((2, Wp, Cin), cdt)
        p_pad[Ho + 2:Hp, :, :] = jnp.zeros((Hp - Ho - 2, Wp, Cin), cdt)
        p_pad[:, 0:1, :] = jnp.zeros((Hp, 1, Cin), cdt)
        p_pad[:, Wo + 1:Wp, :] = jnp.zeros((Hp, 1, Cin), cdt)
        p_pad[2:Ho + 2, 1:Wo + 1, :] = pooled.astype(cdt)

    # ---- conv1 (+BN1+ReLU) for th+2 rows (1-row halo each side) -------------
    # 9 accumulated MXU matmuls; no im2col scratch.
    m1 = (th + 2) * Wo
    acc1 = jnp.zeros((m1, Cmid), jnp.float32)
    for kh in range(3):
        for kw in range(3):
            tap = p_pad[pl.ds(r0 + kh, th + 2), kw:kw + Wo, :]
            acc1 = acc1 + jnp.dot(tap.reshape(m1, Cin),
                                  w1_ref[kh * 3 + kw],
                                  preferred_element_type=jnp.float32)
    y1 = jnp.maximum(acc1 * s1_ref[...] + b1_ref[...], 0.0)     # BN1 + ReLU, f32
    y1 = y1.reshape(th + 2, Wo, Cmid)
    # rows that fall outside the image are conv2's SAME zero padding
    row = jax.lax.broadcasted_iota(jnp.int32, (th + 2, 1, 1), 0) + (r0 - 1)
    y1 = jnp.where((row >= 0) & (row < Ho), y1, 0.0)

    # 1-col zero pad + interior write (border columns are never dirtied)
    y1_pad[:, 0:1, :] = jnp.zeros((th + 2, 1, Cmid), cdt)
    y1_pad[:, Wo + 1:Wo + 2, :] = jnp.zeros((th + 2, 1, Cmid), cdt)
    y1_pad[:, 1:Wo + 1, :] = y1.astype(cdt)

    # ---- conv2 (+BN2+ReLU) for th output rows -------------------------------
    m2 = th * Wo
    acc2 = jnp.zeros((m2, Cout), jnp.float32)
    for kh in range(3):
        for kw in range(3):
            tap = y1_pad[kh:kh + th, kw:kw + Wo, :]
            acc2 = acc2 + jnp.dot(tap.reshape(m2, Cmid),
                                  w2_ref[kh * 3 + kw],
                                  preferred_element_type=jnp.float32)
    y2 = jnp.maximum(acc2 * s2_ref[...] + b2_ref[...], 0.0)     # BN2 + ReLU, f32
    o_ref[0] = y2.reshape(th, Wo, Cout).astype(o_ref.dtype)


def _pick_row_tile(ho, wo):
    """Smallest divisor of Ho (capped at 32) whose tile has M = th*Wo >= 512."""
    cap = min(ho, 32)
    best = cap
    for th in range(1, cap + 1):
        if ho % th == 0:
            best = th
            if th * wo >= 512:
                break
    return best


# -----------------------------------------------------------------------------
# Wrapper (pallas_call plumbing), NHWC in / NHWC out
# -----------------------------------------------------------------------------
def down_fused(x_nhwc, w1_hwio, s1, b1, w2_hwio, s2, b2,
               compute_dtype=jnp.float32):
    N, H, W, Cin = x_nhwc.shape
    # PyTorch MaxPool2d(2) floors odd spatial dims: crop to even.
    if (H % 2) or (W % 2):
        H, W = (H // 2) * 2, (W // 2) * 2
        x_nhwc = x_nhwc[:, :H, :W, :]
    Ho, Wo = H // 2, W // 2
    Cmid = w1_hwio.shape[-1]
    Cout = w2_hwio.shape[-1]

    # row-tiling of the output rows
    TH = _pick_row_tile(Ho, Wo)
    n_tiles = -(-Ho // TH)
    Hp = n_tiles * TH + 4             # pooled map + 2-row halo each side

    # HWIO -> tap-major weight layout (9, Cin, Cout); bf16 on v6e/v7x keeps the
    # MXU fed while accumulation / BN / ReLU stay f32 inside the kernel.
    w1f = w1_hwio.reshape(9, Cin, Cmid).astype(compute_dtype)
    w2f = w2_hwio.reshape(9, Cmid, Cout).astype(compute_dtype)

    # VMEM budget: double-buffered I/O blocks + weights + persistent scratch
    # + transient accumulators / pooling temporaries, with 2x headroom.
    bx = x_nhwc.dtype.itemsize
    bc = jnp.dtype(compute_dtype).itemsize
    est = (2 * H * W * Cin * bx                       # input block (dbl-buffered)
           + 2 * TH * Wo * Cout * bx                  # output block (dbl-buffered)
           + 2 * 9 * (Cin * Cmid + Cmid * Cout) * bc  # weights (dbl-buffered)
           + 2 * 2 * (Cmid + Cout) * 4                # scale / shift
           + Hp * (Wo + 2) * Cin * bc                 # p_pad scratch
           + (TH + 2) * (Wo + 2) * Cmid * bc          # y1_pad scratch
           + 4 * (2 * H * W * Cin                     # pooling temporaries
                  + (TH + 2) * Wo * Cmid + TH * Wo * Cout))  # f32 accumulators
    vmem_limit = int(min(128 * 1024 * 1024, max(32 * 1024 * 1024, 2 * est)))

    kernel = functools.partial(down_fused_kernel, th=TH)

    return pl.pallas_call(
        kernel,
        out_shape=jax.ShapeDtypeStruct((N, Ho, Wo, Cout), x_nhwc.dtype),
        grid=(N, n_tiles),
        in_specs=[
            # full image per batch element; block index is constant over the
            # row-tile axis so it is fetched once per image.
            pl.BlockSpec((1, H, W, Cin), lambda n, t: (n, 0, 0, 0)),
            pl.BlockSpec((9, Cin, Cmid), lambda n, t: (0, 0, 0)),
            pl.BlockSpec((1, Cmid), lambda n, t: (0, 0)),
            pl.BlockSpec((1, Cmid), lambda n, t: (0, 0)),
            pl.BlockSpec((9, Cmid, Cout), lambda n, t: (0, 0, 0)),
            pl.BlockSpec((1, Cout), lambda n, t: (0, 0)),
            pl.BlockSpec((1, Cout), lambda n, t: (0, 0)),
        ],
        out_specs=pl.BlockSpec((1, TH, Wo, Cout), lambda n, t: (n, t, 0, 0)),
        scratch_shapes=[
            pltpu.VMEM((Hp, Wo + 2, Cin), compute_dtype),       # pooled + halo
            pltpu.VMEM((TH + 2, Wo + 2, Cmid), compute_dtype),  # y1 tile + halo
        ],
        compiler_params=pltpu.CompilerParams(
            # batch axis parallel (megacore); row-tile axis "arbitrary" so the
            # per-image pooled scratch built at t == 0 stays on the same core.
            dimension_semantics=("parallel", "arbitrary"),
            vmem_limit_bytes=vmem_limit),
    )(x_nhwc, w1f, s1, b1, w2f, s2, b2)


@functools.partial(jax.jit, static_argnames=("compute_dtype",))
def down_forward(x_nchw, w1, s1, b1, w2, s2, b2, compute_dtype=jnp.float32):
    # NCHW (PyTorch) -> NHWC for the kernel, back to NCHW on exit. Keep the
    # surrounding model NHWC and call down_fused() directly to drop both
    # transposes (each is a full extra HBM round trip of the activation).
    x = jnp.transpose(x_nchw, (0, 2, 3, 1))
    y = down_fused(x, w1, s1, b1, w2, s2, b2, compute_dtype=compute_dtype)
    return jnp.transpose(y, (0, 3, 1, 2))


# -----------------------------------------------------------------------------
# Parameter construction (deterministic, synthetic)
# -----------------------------------------------------------------------------
def make_conv_bn_params(key, cin, cout, eps=1e-5):
    kw_, kb_, kg_, kbeta_, km_, kv_ = jax.random.split(key, 6)
    w = 0.1 * jax.random.normal(kw_, (cout, cin, 3, 3), jnp.float32)   # OIHW
    b = 0.1 * jax.random.normal(kb_, (cout,), jnp.float32)
    gamma = 1.0 + 0.05 * jax.random.normal(kg_, (cout,), jnp.float32)
    beta = 0.05 * jax.random.normal(kbeta_, (cout,), jnp.float32)
    rmean = 0.05 * jax.random.normal(km_, (cout,), jnp.float32)
    rvar = 1.0 + 0.1 * jax.random.uniform(kv_, (cout,), jnp.float32)
    # fold conv-bias + BN (inference) into scale/shift:
    scale = gamma / jnp.sqrt(rvar + eps)
    shift = scale * (b - rmean) + beta
    w_hwio = jnp.transpose(w, (2, 3, 1, 0))       # (3, 3, Cin, Cout)
    return {"w_oihw": w, "b": b, "gamma": gamma, "beta": beta,
            "rmean": rmean, "rvar": rvar, "eps": eps,
            "w_hwio": w_hwio, "scale": scale[None, :], "shift": shift[None, :]}


# -----------------------------------------------------------------------------
# Pure-JAX reference (for correctness check)
# -----------------------------------------------------------------------------
def reference_down(x_nchw, p1, p2):
    def conv_bn_relu_ref(x, p):
        y = jax.lax.conv_general_dilated(
            x, p["w_oihw"], window_strides=(1, 1), padding="SAME",
            dimension_numbers=("NCHW", "OIHW", "NCHW"))
        y = y + p["b"][None, :, None, None]
        y = (y - p["rmean"][None, :, None, None]) / jnp.sqrt(
            p["rvar"][None, :, None, None] + p["eps"])
        y = y * p["gamma"][None, :, None, None] + p["beta"][None, :, None, None]
        return jnp.maximum(y, 0.0)

    x = jax.lax.reduce_window(x_nchw, -jnp.inf, jax.lax.max,
                              (1, 1, 2, 2), (1, 1, 2, 2), "VALID")
    x = conv_bn_relu_ref(x, p1)
    x = conv_bn_relu_ref(x, p2)
    return x


# -----------------------------------------------------------------------------
if __name__ == "__main__":
    key = jax.random.PRNGKey(0)
    kx, k1, k2 = jax.random.split(key, 3)

    N, Cin, H, W = 2, 4, 16, 16
    Cout = 8

    x = jax.random.normal(kx, (N, Cin, H, W), jnp.float32)
    p1 = make_conv_bn_params(k1, Cin, Cout)    # first DoubleConv conv (mid=out)
    p2 = make_conv_bn_params(k2, Cout, Cout)   # second DoubleConv conv

    args = (p1["w_hwio"], p1["scale"], p1["shift"],
            p2["w_hwio"], p2["scale"], p2["shift"])

    ref = jax.block_until_ready(reference_down(x, p1, p2))

    # f32 path (exactness check)
    out = jax.block_until_ready(down_forward(x, *args))
    assert out.shape == (N, Cout, H // 2, W // 2), out.shape
    assert jnp.allclose(out, ref, atol=1e-4, rtol=1e-4), \
        float(jnp.max(jnp.abs(out - ref)))

    # bf16 MXU path (v6e/v7x): weights + activations in bf16, f32 accum/epilogue
    out_bf16 = jax.block_until_ready(
        down_forward(x, *args, compute_dtype=jnp.bfloat16))
    assert out_bf16.shape == (N, Cout, H // 2, W // 2), out_bf16.shape
    assert jnp.allclose(out_bf16, ref, atol=5e-2, rtol=5e-2), \
        float(jnp.max(jnp.abs(out_bf16 - ref)))

    print("KERNEL_OK")
</pallas_src>

<mosaic_0001>
module attributes {stable_mosaic.version = 11 : i64} {
  func.func @down_fused_kernel(%arg0: i32, %arg1: i32, %arg2: memref<1x16x16x4xf32, #tpu.memory_space<vmem>>, %arg3: memref<9x4x8xf32, #tpu.memory_space<vmem>>, %arg4: memref<1x8xf32, #tpu.memory_space<vmem>>, %arg5: memref<1x8xf32, #tpu.memory_space<vmem>>, %arg6: memref<9x8x8xf32, #tpu.memory_space<vmem>>, %arg7: memref<1x8xf32, #tpu.memory_space<vmem>>, %arg8: memref<1x8xf32, #tpu.memory_space<vmem>>, %arg9: memref<1x8x8x8xf32, #tpu.memory_space<vmem>>, %arg10: memref<12x10x4xf32, #tpu.memory_space<vmem>>, %arg11: memref<10x10x8xf32, #tpu.memory_space<vmem>>) attributes {dimension_semantics = [#tpu.dimension_semantics<parallel>, #tpu.dimension_semantics<arbitrary>], iteration_bounds = array<i64: 2, 1>, scalar_prefetch = 0 : i64, scratch_operands = 2 : i64, tpu.core_type = #tpu.core_type<tc>, window_params = [{transform_indices = @transform_0, window_bounds = array<i64: 1, 16, 16, 4>}, {pipeline_mode = #tpu.pipeline_mode<synchronous>, transform_indices = @transform_1, window_bounds = array<i64: 9, 4, 8>}, {pipeline_mode = #tpu.pipeline_mode<synchronous>, transform_indices = @transform_2, window_bounds = array<i64: 1, 8>}, {pipeline_mode = #tpu.pipeline_mode<synchronous>, transform_indices = @transform_3, window_bounds = array<i64: 1, 8>}, {pipeline_mode = #tpu.pipeline_mode<synchronous>, transform_indices = @transform_4, window_bounds = array<i64: 9, 8, 8>}, {pipeline_mode = #tpu.pipeline_mode<synchronous>, transform_indices = @transform_5, window_bounds = array<i64: 1, 8>}, {pipeline_mode = #tpu.pipeline_mode<synchronous>, transform_indices = @transform_6, window_bounds = array<i64: 1, 8>}, {transform_indices = @transform_7, window_bounds = array<i64: 1, 8, 8, 8>}]} {
    %c8_i32 = arith.constant 8 : i32
    %0 = arith.muli %arg1, %c8_i32 : i32
    %c0_i32 = arith.constant 0 : i32
    %1 = arith.cmpi eq, %arg1, %c0_i32 : i32
    %2 = arith.extui %1 : i1 to i32
    %c0_i32_0 = arith.constant 0 : i32
    %3 = arith.cmpi ne, %2, %c0_i32_0 : i32
    scf.if %3 {
      %c0_145 = arith.constant 0 : index
      %c0_146 = arith.constant 0 : index
      %c0_147 = arith.constant 0 : index
      %c0_148 = arith.constant 0 : index
      %171 = vector.load %arg2[%c0_145, %c0_146, %c0_147, %c0_148] : memref<1x16x16x4xf32, #tpu.memory_space<vmem>>, vector<1x16x16x4xf32>
      %172 = vector.shape_cast %171 : vector<1x16x16x4xf32> to vector<16x16x4xf32>
      %173 = vector.shape_cast %172 : vector<16x16x4xf32> to vector<8x2x8x2x4xf32>
      %cst_149 = arith.constant dense<0xFF800000> : vector<8x2x8x4xf32>
      %174 = vector.multi_reduction <maximumf>, %173, %cst_149 [3] : vector<8x2x8x2x4xf32> to vector<8x2x8x4xf32>
      %cst_150 = arith.constant dense<0xFF800000> : vector<8x8x4xf32>
      %175 = vector.multi_reduction <maximumf>, %174, %cst_150 [1] : vector<8x2x8x4xf32> to vector<8x8x4xf32>
      %cst_151 = arith.constant 0.000000e+00 : f32
      %176 = vector.broadcast %cst_151 : f32 to vector<2x10x4xf32>
      %c0_152 = arith.constant 0 : index
      %c0_153 = arith.constant 0 : index
      %c0_154 = arith.constant 0 : index
      %177 = vector.load %arg10[%c0_152, %c0_153, %c0_154] : memref<12x10x4xf32, #tpu.memory_space<vmem>>, vector<2x10x4xf32>
      tpu.vector_store %arg10[%c0_152, %c0_153, %c0_154], %176 {strides = array<i32>} : memref<12x10x4xf32, #tpu.memory_space<vmem>>, vector<2x10x4xf32>,
      %cst_155 = arith.constant 0.000000e+00 : f32
      %178 = vector.broadcast %cst_155 : f32 to vector<2x10x4xf32>
      %c10 = arith.constant 10 : index
      %c0_156 = arith.constant 0 : index
      %c0_157 = arith.constant 0 : index
      %179 = vector.load %arg10[%c10, %c0_156, %c0_157] : memref<12x10x4xf32, #tpu.memory_space<vmem>>, vector<2x10x4xf32>
      tpu.vector_store %arg10[%c10, %c0_156, %c0_157], %178 {strides = array<i32>} : memref<12x10x4xf32, #tpu.memory_space<vmem>>, vector<2x10x4xf32>,
      %cst_158 = arith.constant 0.000000e+00 : f32
      %180 = vector.broadcast %cst_158 : f32 to vector<12x1x4xf32>
      %c0_159 = arith.constant 0 : index
      %c0_160 = arith.constant 0 : index
      %c0_161 = arith.constant 0 : index
      %181 = vector.load %arg10[%c0_159, %c0_160, %c0_161] : memref<12x10x4xf32, #tpu.memory_space<vmem>>, vector<12x1x4xf32>
      tpu.vector_store %arg10[%c0_159, %c0_160, %c0_161], %180 {strides = array<i32>} : memref<12x10x4xf32, #tpu.memory_space<vmem>>, vector<12x1x4xf32>,
      %cst_162 = arith.constant 0.000000e+00 : f32
      %182 = vector.broadcast %cst_162 : f32 to vector<12x1x4xf32>
      %c0_163 = arith.constant 0 : index
      %c9_164 = arith.constant 9 : index
      %c0_165 = arith.constant 0 : index
      %183 = vector.load %arg10[%c0_163, %c9_164, %c0_165] : memref<12x10x4xf32, #tpu.memory_space<vmem>>, vector<12x1x4xf32>
      tpu.vector_store %arg10[%c0_163, %c9_164, %c0_165], %182 {strides = array<i32>} : memref<12x10x4xf32, #tpu.memory_space<vmem>>, vector<12x1x4xf32>,
      %c2_166 = arith.constant 2 : index
      %c1_167 = arith.constant 1 : index
      %c0_168 = arith.constant 0 : index
      %184 = vector.load %arg10[%c2_166, %c1_167, %c0_168] : memref<12x10x4xf32, #tpu.memory_space<vmem>>, vector<8x8x4xf32>
      tpu.vector_store %arg10[%c2_166, %c1_167, %c0_168], %175 {strides = array<i32>} : memref<12x10x4xf32, #tpu.memory_space<vmem>>, vector<8x8x4xf32>,
    } else {
    }
    %cst = arith.constant 0.000000e+00 : f32
    %4 = vector.broadcast %cst : f32 to vector<80x8xf32>
    %c0_i32_1 = arith.constant 0 : i32
    %5 = arith.addi %0, %c0_i32_1 : i32
    %6 = arith.index_cast %5 : i32 to index
    %c0 = arith.constant 0 : index
    %c0_2 = arith.constant 0 : index
    %7 = vector.load %arg10[%6, %c0, %c0_2] : memref<12x10x4xf32, #tpu.memory_space<vmem>>, vector<10x8x4xf32>
    %8 = vector.shape_cast %7 : vector<10x8x4xf32> to vector<80x4xf32>
    %c0_3 = arith.constant 0 : index
    %c0_4 = arith.constant 0 : index
    %c0_5 = arith.constant 0 : index
    %9 = vector.load %arg3[%c0_3, %c0_4, %c0_5] : memref<9x4x8xf32, #tpu.memory_space<vmem>>, vector<1x4x8xf32>
    %10 = vector.shape_cast %9 : vector<1x4x8xf32> to vector<4x8xf32>
    %cst_6 = arith.constant dense<0.000000e+00> : vector<80x8xf32>
    %11 = tpu.matmul %8, %10, %cst_6 {dimension_numbers = #tpu.dot_dimension_numbers<[1], [0], [0], [1], [0, 0, 1, 1], [], []>} : vector<80x4xf32>, vector<4x8xf32>, vector<80x8xf32> -> vector<80x8xf32>
    %12 = arith.addf %4, %11 : vector<80x8xf32>
    %c0_i32_7 = arith.constant 0 : i32
    %13 = arith.addi %0, %c0_i32_7 : i32
    %14 = arith.index_cast %13 : i32 to index
    %c1 = arith.constant 1 : index
    %c0_8 = arith.constant 0 : index
    %15 = vector.load %arg10[%14, %c1, %c0_8] : memref<12x10x4xf32, #tpu.memory_space<vmem>>, vector<10x8x4xf32>
    %16 = vector.shape_cast %15 : vector<10x8x4xf32> to vector<80x4xf32>
    %c1_9 = arith.constant 1 : index
    %c0_10 = arith.constant 0 : index
    %c0_11 = arith.constant 0 : index
    %17 = vector.load %arg3[%c1_9, %c0_10, %c0_11] : memref<9x4x8xf32, #tpu.memory_space<vmem>>, vector<1x4x8xf32>
    %18 = vector.shape_cast %17 : vector<1x4x8xf32> to vector<4x8xf32>
    %cst_12 = arith.constant dense<0.000000e+00> : vector<80x8xf32>
    %19 = tpu.matmul %16, %18, %cst_12 {dimension_numbers = #tpu.dot_dimension_numbers<[1], [0], [0], [1], [0, 0, 1, 1], [], []>} : vector<80x4xf32>, vector<4x8xf32>, vector<80x8xf32> -> vector<80x8xf32>
    %20 = arith.addf %12, %19 : vector<80x8xf32>
    %c0_i32_13 = arith.constant 0 : i32
    %21 = arith.addi %0, %c0_i32_13 : i32
    %22 = arith.index_cast %21 : i32 to index
    %c2 = arith.constant 2 : index
    %c0_14 = arith.constant 0 : index
    %23 = vector.load %arg10[%22, %c2, %c0_14] : memref<12x10x4xf32, #tpu.memory_space<vmem>>, vector<10x8x4xf32>
    %24 = vector.shape_cast %23 : vector<10x8x4xf32> to vector<80x4xf32>
    %c2_15 = arith.constant 2 : index
    %c0_16 = arith.constant 0 : index
    %c0_17 = arith.constant 0 : index
    %25 = vector.load %arg3[%c2_15, %c0_16, %c0_17] : memref<9x4x8xf32, #tpu.memory_space<vmem>>, vector<1x4x8xf32>
    %26 = vector.shape_cast %25 : vector<1x4x8xf32> to vector<4x8xf32>
    %cst_18 = arith.constant dense<0.000000e+00> : vector<80x8xf32>
    %27 = tpu.matmul %24, %26, %cst_18 {dimension_numbers = #tpu.dot_dimension_numbers<[1], [0], [0], [1], [0, 0, 1, 1], [], []>} : vector<80x4xf32>, vector<4x8xf32>, vector<80x8xf32> -> vector<80x8xf32>
    %28 = arith.addf %20, %27 : vector<80x8xf32>
    %c1_i32 = arith.constant 1 : i32
    %29 = arith.addi %0, %c1_i32 : i32
    %30 = arith.index_cast %29 : i32 to index
    %c0_19 = arith.constant 0 : index
    %c0_20 = arith.constant 0 : index
    %31 = vector.load %arg10[%30, %c0_19, %c0_20] : memref<12x10x4xf32, #tpu.memory_space<vmem>>, vector<10x8x4xf32>
    %32 = vector.shape_cast %31 : vector<10x8x4xf32> to vector<80x4xf32>
    %c3 = arith.constant 3 : index
    %c0_21 = arith.constant 0 : index
    %c0_22 = arith.constant 0 : index
    %33 = vector.load %arg3[%c3, %c0_21, %c0_22] : memref<9x4x8xf32, #tpu.memory_space<vmem>>, vector<1x4x8xf32>
    %34 = vector.shape_cast %33 : vector<1x4x8xf32> to vector<4x8xf32>
    %cst_23 = arith.constant dense<0.000000e+00> : vector<80x8xf32>
    %35 = tpu.matmul %32, %34, %cst_23 {dimension_numbers = #tpu.dot_dimension_numbers<[1], [0], [0], [1], [0, 0, 1, 1], [], []>} : vector<80x4xf32>, vector<4x8xf32>, vector<80x8xf32> -> vector<80x8xf32>
    %36 = arith.addf %28, %35 : vector<80x8xf32>
    %c1_i32_24 = arith.constant 1 : i32
    %37 = arith.addi %0, %c1_i32_24 : i32
    %38 = arith.index_cast %37 : i32 to index
    %c1_25 = arith.constant 1 : index
    %c0_26 = arith.constant 0 : index
    %39 = vector.load %arg10[%38, %c1_25, %c0_26] : memref<12x10x4xf32, #tpu.memory_space<vmem>>, vector<10x8x4xf32>
    %40 = vector.shape_cast %39 : vector<10x8x4xf32> to vector<80x4xf32>
    %c4 = arith.constant 4 : index
    %c0_27 = arith.constant 0 : index
    %c0_28 = arith.constant 0 : index
    %41 = vector.load %arg3[%c4, %c0_27, %c0_28] : memref<9x4x8xf32, #tpu.memory_space<vmem>>, vector<1x4x8xf32>
    %42 = vector.shape_cast %41 : vector<1x4x8xf32> to vector<4x8xf32>
    %cst_29 = arith.constant dense<0.000000e+00> : vector<80x8xf32>
    %43 = tpu.matmul %40, %42, %cst_29 {dimension_numbers = #tpu.dot_dimension_numbers<[1], [0], [0], [1], [0, 0, 1, 1], [], []>} : vector<80x4xf32>, vector<4x8xf32>, vector<80x8xf32> -> vector<80x8xf32>
    %44 = arith.addf %36, %43 : vector<80x8xf32>
    %c1_i32_30 = arith.constant 1 : i32
    %45 = arith.addi %0, %c1_i32_30 : i32
    %46 = arith.index_cast %45 : i32 to index
    %c2_31 = arith.constant 2 : index
    %c0_32 = arith.constant 0 : index
    %47 = vector.load %arg10[%46, %c2_31, %c0_32] : memref<12x10x4xf32, #tpu.memory_space<vmem>>, vector<10x8x4xf32>
    %48 = vector.shape_cast %47 : vector<10x8x4xf32> to vector<80x4xf32>
    %c5 = arith.constant 5 : index
    %c0_33 = arith.constant 0 : index
    %c0_34 = arith.constant 0 : index
    %49 = vector.load %arg3[%c5, %c0_33, %c0_34] : memref<9x4x8xf32, #tpu.memory_space<vmem>>, vector<1x4x8xf32>
    %50 = vector.shape_cast %49 : vector<1x4x8xf32> to vector<4x8xf32>
    %cst_35 = arith.constant dense<0.000000e+00> : vector<80x8xf32>
    %51 = tpu.matmul %48, %50, %cst_35 {dimension_numbers = #tpu.dot_dimension_numbers<[1], [0], [0], [1], [0, 0, 1, 1], [], []>} : vector<80x4xf32>, vector<4x8xf32>, vector<80x8xf32> -> vector<80x8xf32>
    %52 = arith.addf %44, %51 : vector<80x8xf32>
    %c2_i32 = arith.constant 2 : i32
    %53 = arith.addi %0, %c2_i32 : i32
    %54 = arith.index_cast %53 : i32 to index
    %c0_36 = arith.constant 0 : index
    %c0_37 = arith.constant 0 : index
    %55 = vector.load %arg10[%54, %c0_36, %c0_37] : memref<12x10x4xf32, #tpu.memory_space<vmem>>, vector<10x8x4xf32>
    %56 = vector.shape_cast %55 : vector<10x8x4xf32> to vector<80x4xf32>
    %c6 = arith.constant 6 : index
    %c0_38 = arith.constant 0 : index
    %c0_39 = arith.constant 0 : index
    %57 = vector.load %arg3[%c6, %c0_38, %c0_39] : memref<9x4x8xf32, #tpu.memory_space<vmem>>, vector<1x4x8xf32>
    %58 = vector.shape_cast %57 : vector<1x4x8xf32> to vector<4x8xf32>
    %cst_40 = arith.constant dense<0.000000e+00> : vector<80x8xf32>
    %59 = tpu.matmul %56, %58, %cst_40 {dimension_numbers = #tpu.dot_dimension_numbers<[1], [0], [0], [1], [0, 0, 1, 1], [], []>} : vector<80x4xf32>, vector<4x8xf32>, vector<80x8xf32> -> vector<80x8xf32>
    %60 = arith.addf %52, %59 : vector<80x8xf32>
    %c2_i32_41 = arith.constant 2 : i32
    %61 = arith.addi %0, %c2_i32_41 : i32
    %62 = arith.index_cast %61 : i32 to index
    %c1_42 = arith.constant 1 : index
    %c0_43 = arith.constant 0 : index
    %63 = vector.load %arg10[%62, %c1_42, %c0_43] : memref<12x10x4xf32, #tpu.memory_space<vmem>>, vector<10x8x4xf32>
    %64 = vector.shape_cast %63 : vector<10x8x4xf32> to vector<80x4xf32>
    %c7 = arith.constant 7 : index
    %c0_44 = arith.constant 0 : index
    %c0_45 = arith.constant 0 : index
    %65 = vector.load %arg3[%c7, %c0_44, %c0_45] : memref<9x4x8xf32, #tpu.memory_space<vmem>>, vector<1x4x8xf32>
    %66 = vector.shape_cast %65 : vector<1x4x8xf32> to vector<4x8xf32>
    %cst_46 = arith.constant dense<0.000000e+00> : vector<80x8xf32>
    %67 = tpu.matmul %64, %66, %cst_46 {dimension_numbers = #tpu.dot_dimension_numbers<[1], [0], [0], [1], [0, 0, 1, 1], [], []>} : vector<80x4xf32>, vector<4x8xf32>, vector<80x8xf32> -> vector<80x8xf32>
    %68 = arith.addf %60, %67 : vector<80x8xf32>
    %c2_i32_47 = arith.constant 2 : i32
    %69 = arith.addi %0, %c2_i32_47 : i32
    %70 = arith.index_cast %69 : i32 to index
    %c2_48 = arith.constant 2 : index
    %c0_49 = arith.constant 0 : index
    %71 = vector.load %arg10[%70, %c2_48, %c0_49] : memref<12x10x4xf32, #tpu.memory_space<vmem>>, vector<10x8x4xf32>
    %72 = vector.shape_cast %71 : vector<10x8x4xf32> to vector<80x4xf32>
    %c8 = arith.constant 8 : index
    %c0_50 = arith.constant 0 : index
    %c0_51 = arith.constant 0 : index
    %73 = vector.load %arg3[%c8, %c0_50, %c0_51] : memref<9x4x8xf32, #tpu.memory_space<vmem>>, vector<1x4x8xf32>
    %74 = vector.shape_cast %73 : vector<1x4x8xf32> to vector<4x8xf32>
    %cst_52 = arith.constant dense<0.000000e+00> : vector<80x8xf32>
    %75 = tpu.matmul %72, %74, %cst_52 {dimension_numbers = #tpu.dot_dimension_numbers<[1], [0], [0], [1], [0, 0, 1, 1], [], []>} : vector<80x4xf32>, vector<4x8xf32>, vector<80x8xf32> -> vector<80x8xf32>
    %76 = arith.addf %68, %75 : vector<80x8xf32>
    %c0_53 = arith.constant 0 : index
    %c0_54 = arith.constant 0 : index
    %77 = vector.load %arg4[%c0_53, %c0_54] : memref<1x8xf32, #tpu.memory_space<vmem>>, vector<1x8xf32>
    %78 = vector.broadcast %77 : vector<1x8xf32> to vector<80x8xf32>
    %79 = arith.mulf %76, %78 : vector<80x8xf32>
    %c0_55 = arith.constant 0 : index
    %c0_56 = arith.constant 0 : index
    %80 = vector.load %arg5[%c0_55, %c0_56] : memref<1x8xf32, #tpu.memory_space<vmem>>, vector<1x8xf32>
    %81 = vector.broadcast %80 : vector<1x8xf32> to vector<80x8xf32>
    %82 = arith.addf %79, %81 : vector<80x8xf32>
    %cst_57 = arith.constant 0.000000e+00 : f32
    %83 = vector.broadcast %cst_57 : f32 to vector<80x8xf32>
    %84 = arith.maximumf %82, %83 : vector<80x8xf32>
    %85 = vector.shape_cast %84 : vector<80x8xf32> to vector<10x8x8xf32>
    %86 = tpu.iota {dimensions = array<i32: 0>} : vector<10x1x1xi32>
    %c1_i32_58 = arith.constant 1 : i32
    %87 = arith.subi %0, %c1_i32_58 : i32
    %88 = vector.broadcast %87 : i32 to vector<10x1x1xi32>
    %89 = arith.addi %86, %88 : vector<10x1x1xi32>
    %c0_i32_59 = arith.constant 0 : i32
    %90 = vector.broadcast %c0_i32_59 : i32 to vector<10x1x1xi32>
    %91 = arith.cmpi sge, %89, %90 : vector<10x1x1xi32>
    %c8_i32_60 = arith.constant 8 : i32
    %92 = vector.broadcast %c8_i32_60 : i32 to vector<10x1x1xi32>
    %93 = arith.cmpi slt, %89, %92 : vector<10x1x1xi32>
    %94 = arith.andi %91, %93 : vector<10x1x1xi1>
    %cst_61 = arith.constant 0.000000e+00 : f32
    %95 = vector.shape_cast %94 : vector<10x1x1xi1> to vector<10x1x1xi1>
    %96 = vector.broadcast %95 : vector<10x1x1xi1> to vector<10x8x8xi1>
    %97 = vector.broadcast %cst_61 : f32 to vector<10x8x8xf32>
    %98 = arith.select %96, %85, %97 : vector<10x8x8xi1>, vector<10x8x8xf32>
    %cst_62 = arith.constant 0.000000e+00 : f32
    %99 = vector.broadcast %cst_62 : f32 to vector<10x1x8xf32>
    %c0_63 = arith.constant 0 : index
    %c0_64 = arith.constant 0 : index
    %c0_65 = arith.constant 0 : index
    %100 = vector.load %arg11[%c0_63, %c0_64, %c0_65] : memref<10x10x8xf32, #tpu.memory_space<vmem>>, vector<10x1x8xf32>
    tpu.vector_store %arg11[%c0_63, %c0_64, %c0_65], %99 {strides = array<i32>} : memref<10x10x8xf32, #tpu.memory_space<vmem>>, vector<10x1x8xf32>,
    %cst_66 = arith.constant 0.000000e+00 : f32
    %101 = vector.broadcast %cst_66 : f32 to vector<10x1x8xf32>
    %c0_67 = arith.constant 0 : index
    %c9 = arith.constant 9 : index
    %c0_68 = arith.constant 0 : index
    %102 = vector.load %arg11[%c0_67, %c9, %c0_68] : memref<10x10x8xf32, #tpu.memory_space<vmem>>, vector<10x1x8xf32>
    tpu.vector_store %arg11[%c0_67, %c9, %c0_68], %101 {strides = array<i32>} : memref<10x10x8xf32, #tpu.memory_space<vmem>>, vector<10x1x8xf32>,
    %c0_69 = arith.constant 0 : index
    %c1_70 = arith.constant 1 : index
    %c0_71 = arith.constant 0 : index
    %103 = vector.load %arg11[%c0_69, %c1_70, %c0_71] : memref<10x10x8xf32, #tpu.memory_space<vmem>>, vector<10x8x8xf32>
    tpu.vector_store %arg11[%c0_69, %c1_70, %c0_71], %98 {strides = array<i32>} : memref<10x10x8xf32, #tpu.memory_space<vmem>>, vector<10x8x8xf32>,
    %cst_72 = arith.constant 0.000000e+00 : f32
    %104 = vector.broadcast %cst_72 : f32 to vector<64x8xf32>
    %c0_73 = arith.constant 0 : index
    %c0_74 = arith.constant 0 : index
    %c0_75 = arith.constant 0 : index
    %105 = vector.load %arg11[%c0_73, %c0_74, %c0_75] : memref<10x10x8xf32, #tpu.memory_space<vmem>>, vector<8x8x8xf32>
    %106 = vector.shape_cast %105 : vector<8x8x8xf32> to vector<64x8xf32>
    %c0_76 = arith.constant 0 : index
    %c0_77 = arith.constant 0 : index
    %c0_78 = arith.constant 0 : index
    %107 = vector.load %arg6[%c0_76, %c0_77, %c0_78] : memref<9x8x8xf32, #tpu.memory_space<vmem>>, vector<1x8x8xf32>
    %108 = vector.shape_cast %107 : vector<1x8x8xf32> to vector<8x8xf32>
    %cst_79 = arith.constant dense<0.000000e+00> : vector<64x8xf32>
    %109 = tpu.matmul %106, %108, %cst_79 {dimension_numbers = #tpu.dot_dimension_numbers<[1], [0], [0], [1], [0, 0, 1, 1], [], []>} : vector<64x8xf32>, vector<8x8xf32>, vector<64x8xf32> -> vector<64x8xf32>
    %110 = arith.addf %104, %109 : vector<64x8xf32>
    %c0_80 = arith.constant 0 : index
    %c1_81 = arith.constant 1 : index
    %c0_82 = arith.constant 0 : index
    %111 = vector.load %arg11[%c0_80, %c1_81, %c0_82] : memref<10x10x8xf32, #tpu.memory_space<vmem>>, vector<8x8x8xf32>
    %112 = vector.shape_cast %111 : vector<8x8x8xf32> to vector<64x8xf32>
    %c1_83 = arith.constant 1 : index
    %c0_84 = arith.constant 0 : index
    %c0_85 = arith.constant 0 : index
    %113 = vector.load %arg6[%c1_83, %c0_84, %c0_85] : memref<9x8x8xf32, #tpu.memory_space<vmem>>, vector<1x8x8xf32>
    %114 = vector.shape_cast %113 : vector<1x8x8xf32> to vector<8x8xf32>
    %cst_86 = arith.constant dense<0.000000e+00> : vector<64x8xf32>
    %115 = tpu.matmul %112, %114, %cst_86 {dimension_numbers = #tpu.dot_dimension_numbers<[1], [0], [0], [1], [0, 0, 1, 1], [], []>} : vector<64x8xf32>, vector<8x8xf32>, vector<64x8xf32> -> vector<64x8xf32>
    %116 = arith.addf %110, %115 : vector<64x8xf32>
    %c0_87 = arith.constant 0 : index
    %c2_88 = arith.constant 2 : index
    %c0_89 = arith.constant 0 : index
    %117 = vector.load %arg11[%c0_87, %c2_88, %c0_89] : memref<10x10x8xf32, #tpu.memory_space<vmem>>, vector<8x8x8xf32>
    %118 = vector.shape_cast %117 : vector<8x8x8xf32> to vector<64x8xf32>
    %c2_90 = arith.constant 2 : index
    %c0_91 = arith.constant 0 : index
    %c0_92 = arith.constant 0 : index
    %119 = vector.load %arg6[%c2_90, %c0_91, %c0_92] : memref<9x8x8xf32, #tpu.memory_space<vmem>>, vector<1x8x8xf32>
    %120 = vector.shape_cast %119 : vector<1x8x8xf32> to vector<8x8xf32>
    %cst_93 = arith.constant dense<0.000000e+00> : vector<64x8xf32>
    %121 = tpu.matmul %118, %120, %cst_93 {dimension_numbers = #tpu.dot_dimension_numbers<[1], [0], [0], [1], [0, 0, 1, 1], [], []>} : vector<64x8xf32>, vector<8x8xf32>, vector<64x8xf32> -> vector<64x8xf32>
    %122 = arith.addf %116, %121 : vector<64x8xf32>
    %c1_94 = arith.constant 1 : index
    %c0_95 = arith.constant 0 : index
    %c0_96 = arith.constant 0 : index
    %123 = vector.load %arg11[%c1_94, %c0_95, %c0_96] : memref<10x10x8xf32, #tpu.memory_space<vmem>>, vector<8x8x8xf32>
    %124 = vector.shape_cast %123 : vector<8x8x8xf32> to vector<64x8xf32>
    %c3_97 = arith.constant 3 : index
    %c0_98 = arith.constant 0 : index
    %c0_99 = arith.constant 0 : index
    %125 = vector.load %arg6[%c3_97, %c0_98, %c0_99] : memref<9x8x8xf32, #tpu.memory_space<vmem>>, vector<1x8x8xf32>
    %126 = vector.shape_cast %125 : vector<1x8x8xf32> to vector<8x8xf32>
    %cst_100 = arith.constant dense<0.000000e+00> : vector<64x8xf32>
    %127 = tpu.matmul %124, %126, %cst_100 {dimension_numbers = #tpu.dot_dimension_numbers<[1], [0], [0], [1], [0, 0, 1, 1], [], []>} : vector<64x8xf32>, vector<8x8xf32>, vector<64x8xf32> -> vector<64x8xf32>
    %128 = arith.addf %122, %127 : vector<64x8xf32>
    %c1_101 = arith.constant 1 : index
    %c1_102 = arith.constant 1 : index
    %c0_103 = arith.constant 0 : index
    %129 = vector.load %arg11[%c1_101, %c1_102, %c0_103] : memref<10x10x8xf32, #tpu.memory_space<vmem>>, vector<8x8x8xf32>
    %130 = vector.shape_cast %129 : vector<8x8x8xf32> to vector<64x8xf32>
    %c4_104 = arith.constant 4 : index
    %c0_105 = arith.constant 0 : index
    %c0_106 = arith.constant 0 : index
    %131 = vector.load %arg6[%c4_104, %c0_105, %c0_106] : memref<9x8x8xf32, #tpu.memory_space<vmem>>, vector<1x8x8xf32>
    %132 = vector.shape_cast %131 : vector<1x8x8xf32> to vector<8x8xf32>
    %cst_107 = arith.constant dense<0.000000e+00> : vector<64x8xf32>
    %133 = tpu.matmul %130, %132, %cst_107 {dimension_numbers = #tpu.dot_dimension_numbers<[1], [0], [0], [1], [0, 0, 1, 1], [], []>} : vector<64x8xf32>, vector<8x8xf32>, vector<64x8xf32> -> vector<64x8xf32>
    %134 = arith.addf %128, %133 : vector<64x8xf32>
    %c1_108 = arith.constant 1 : index
    %c2_109 = arith.constant 2 : index
    %c0_110 = arith.constant 0 : index
    %135 = vector.load %arg11[%c1_108, %c2_109, %c0_110] : memref<10x10x8xf32, #tpu.memory_space<vmem>>, vector<8x8x8xf32>
    %136 = vector.shape_cast %135 : vector<8x8x8xf32> to vector<64x8xf32>
    %c5_111 = arith.constant 5 : index
    %c0_112 = arith.constant 0 : index
    %c0_113 = arith.constant 0 : index
    %137 = vector.load %arg6[%c5_111, %c0_112, %c0_113] : memref<9x8x8xf32, #tpu.memory_space<vmem>>, vector<1x8x8xf32>
    %138 = vector.shape_cast %137 : vector<1x8x8xf32> to vector<8x8xf32>
    %cst_114 = arith.constant dense<0.000000e+00> : vector<64x8xf32>
    %139 = tpu.matmul %136, %138, %cst_114 {dimension_numbers = #tpu.dot_dimension_numbers<[1], [0], [0], [1], [0, 0, 1, 1], [], []>} : vector<64x8xf32>, vector<8x8xf32>, vector<64x8xf32> -> vector<64x8xf32>
    %140 = arith.addf %134, %139 : vector<64x8xf32>
    %c2_115 = arith.constant 2 : index
    %c0_116 = arith.constant 0 : index
    %c0_117 = arith.constant 0 : index
    %141 = vector.load %arg11[%c2_115, %c0_116, %c0_117] : memref<10x10x8xf32, #tpu.memory_space<vmem>>, vector<8x8x8xf32>
    %142 = vector.shape_cast %141 : vector<8x8x8xf32> to vector<64x8xf32>
    %c6_118 = arith.constant 6 : index
    %c0_119 = arith.constant 0 : index
    %c0_120 = arith.constant 0 : index
    %143 = vector.load %arg6[%c6_118, %c0_119, %c0_120] : memref<9x8x8xf32, #tpu.memory_space<vmem>>, vector<1x8x8xf32>
    %144 = vector.shape_cast %143 : vector<1x8x8xf32> to vector<8x8xf32>
    %cst_121 = arith.constant dense<0.000000e+00> : vector<64x8xf32>
    %145 = tpu.matmul %142, %144, %cst_121 {dimension_numbers = #tpu.dot_dimension_numbers<[1], [0], [0], [1], [0, 0, 1, 1], [], []>} : vector<64x8xf32>, vector<8x8xf32>, vector<64x8xf32> -> vector<64x8xf32>
    %146 = arith.addf %140, %145 : vector<64x8xf32>
    %c2_122 = arith.constant 2 : index
    %c1_123 = arith.constant 1 : index
    %c0_124 = arith.constant 0 : index
    %147 = vector.load %arg11[%c2_122, %c1_123, %c0_124] : memref<10x10x8xf32, #tpu.memory_space<vmem>>, vector<8x8x8xf32>
    %148 = vector.shape_cast %147 : vector<8x8x8xf32> to vector<64x8xf32>
    %c7_125 = arith.constant 7 : index
    %c0_126 = arith.constant 0 : index
    %c0_127 = arith.constant 0 : index
    %149 = vector.load %arg6[%c7_125, %c0_126, %c0_127] : memref<9x8x8xf32, #tpu.memory_space<vmem>>, vector<1x8x8xf32>
    %150 = vector.shape_cast %149 : vector<1x8x8xf32> to vector<8x8xf32>
    %cst_128 = arith.constant dense<0.000000e+00> : vector<64x8xf32>
    %151 = tpu.matmul %148, %150, %cst_128 {dimension_numbers = #tpu.dot_dimension_numbers<[1], [0], [0], [1], [0, 0, 1, 1], [], []>} : vector<64x8xf32>, vector<8x8xf32>, vector<64x8xf32> -> vector<64x8xf32>
    %152 = arith.addf %146, %151 : vector<64x8xf32>
    %c2_129 = arith.constant 2 : index
    %c2_130 = arith.constant 2 : index
    %c0_131 = arith.constant 0 : index
    %153 = vector.load %arg11[%c2_129, %c2_130, %c0_131] : memref<10x10x8xf32, #tpu.memory_space<vmem>>, vector<8x8x8xf32>
    %154 = vector.shape_cast %153 : vector<8x8x8xf32> to vector<64x8xf32>
    %c8_132 = arith.constant 8 : index
    %c0_133 = arith.constant 0 : index
    %c0_134 = arith.constant 0 : index
    %155 = vector.load %arg6[%c8_132, %c0_133, %c0_134] : memref<9x8x8xf32, #tpu.memory_space<vmem>>, vector<1x8x8xf32>
    %156 = vector.shape_cast %155 : vector<1x8x8xf32> to vector<8x8xf32>
    %cst_135 = arith.constant dense<0.000000e+00> : vector<64x8xf32>
    %157 = tpu.matmul %154, %156, %cst_135 {dimension_numbers = #tpu.dot_dimension_numbers<[1], [0], [0], [1], [0, 0, 1, 1], [], []>} : vector<64x8xf32>, vector<8x8xf32>, vector<64x8xf32> -> vector<64x8xf32>
    %158 = arith.addf %152, %157 : vector<64x8xf32>
    %c0_136 = arith.constant 0 : index
    %c0_137 = arith.constant 0 : index
    %159 = vector.load %arg7[%c0_136, %c0_137] : memref<1x8xf32, #tpu.memory_space<vmem>>, vector<1x8xf32>
    %160 = vector.broadcast %159 : vector<1x8xf32> to vector<64x8xf32>
    %161 = arith.mulf %158, %160 : vector<64x8xf32>
    %c0_138 = arith.constant 0 : index
    %c0_139 = arith.constant 0 : index
    %162 = vector.load %arg8[%c0_138, %c0_139] : memref<1x8xf32, #tpu.memory_space<vmem>>, vector<1x8xf32>
    %163 = vector.broadcast %162 : vector<1x8xf32> to vector<64x8xf32>
    %164 = arith.addf %161, %163 : vector<64x8xf32>
    %cst_140 = arith.constant 0.000000e+00 : f32
    %165 = vector.broadcast %cst_140 : f32 to vector<64x8xf32>
    %166 = arith.maximumf %164, %165 : vector<64x8xf32>
    %167 = vector.shape_cast %166 : vector<64x8xf32> to vector<8x8x8xf32>
    %c0_141 = arith.constant 0 : index
    %c0_142 = arith.constant 0 : index
    %c0_143 = arith.constant 0 : index
    %c0_144 = arith.constant 0 : index
    %168 = vector.load %arg9[%c0_141, %c0_142, %c0_143, %c0_144] : memref<1x8x8x8xf32, #tpu.memory_space<vmem>>, vector<1x8x8x8xf32>
    %169 = vector.shape_cast %168 : vector<1x8x8x8xf32> to vector<8x8x8xf32>
    %170 = vector.shape_cast %167 : vector<8x8x8xf32> to vector<1x8x8x8xf32>
    tpu.vector_store %arg9[%c0_141, %c0_142, %c0_143, %c0_144], %170 {strides = array<i32>} : memref<1x8x8x8xf32, #tpu.memory_space<vmem>>, vector<1x8x8x8xf32>,
    return
  }
  func.func @transform_0(%arg0: i32, %arg1: i32) -> (i32, i32, i32, i32) {
    %c0_i32 = arith.constant 0 : i32
    %c0_i32_0 = arith.constant 0 : i32
    %c0_i32_1 = arith.constant 0 : i32
    %c0_i32_2 = arith.constant 0 : i32
    return %arg0, %c0_i32, %c0_i32_0, %c0_i32_1 : i32, i32, i32, i32
  }
  func.func @transform_1(%arg0: i32, %arg1: i32) -> (i32, i32, i32) {
    %c0_i32 = arith.constant 0 : i32
    %c0_i32_0 = arith.constant 0 : i32
    %c0_i32_1 = arith.constant 0 : i32
    %c0_i32_2 = arith.constant 0 : i32
    return %c0_i32, %c0_i32_0, %c0_i32_1 : i32, i32, i32
  }
  func.func @transform_2(%arg0: i32, %arg1: i32) -> (i32, i32) {
    %c0_i32 = arith.constant 0 : i32
    %c0_i32_0 = arith.constant 0 : i32
    %c0_i32_1 = arith.constant 0 : i32
    return %c0_i32, %c0_i32_0 : i32, i32
  }
  func.func @transform_3(%arg0: i32, %arg1: i32) -> (i32, i32) {
    %c0_i32 = arith.constant 0 : i32
    %c0_i32_0 = arith.constant 0 : i32
    %c0_i32_1 = arith.constant 0 : i32
    return %c0_i32, %c0_i32_0 : i32, i32
  }
  func.func @transform_4(%arg0: i32, %arg1: i32) -> (i32, i32, i32) {
    %c0_i32 = arith.constant 0 : i32
    %c0_i32_0 = arith.constant 0 : i32
    %c0_i32_1 = arith.constant 0 : i32
    %c0_i32_2 = arith.constant 0 : i32
    return %c0_i32, %c0_i32_0, %c0_i32_1 : i32, i32, i32
  }
  func.func @transform_5(%arg0: i32, %arg1: i32) -> (i32, i32) {
    %c0_i32 = arith.constant 0 : i32
    %c0_i32_0 = arith.constant 0 : i32
    %c0_i32_1 = arith.constant 0 : i32
    return %c0_i32, %c0_i32_0 : i32, i32
  }
  func.func @transform_6(%arg0: i32, %arg1: i32) -> (i32, i32) {
    %c0_i32 = arith.constant 0 : i32
    %c0_i32_0 = arith.constant 0 : i32
    %c0_i32_1 = arith.constant 0 : i32
    return %c0_i32, %c0_i32_0 : i32, i32
  }
  func.func @transform_7(%arg0: i32, %arg1: i32) -> (i32, i32, i32, i32) {
    %c0_i32 = arith.constant 0 : i32
    %c0_i32_0 = arith.constant 0 : i32
    %c0_i32_1 = arith.constant 0 : i32
    return %arg0, %arg1, %c0_i32, %c0_i32_0 : i32, i32, i32, i32
  }
}

</mosaic_0001>

<bundles_post_ra>
// kernel: down_forward.1
= control target key start
LH: loop header
LB: loop body
LE: loop exit
PB: predicated region body
PF: predicated region fallthrough
CT: control target
= control target key end

     0   :  { %s6411_s24 = smov 0   ;;  %s6413_s25 = smov 0   ;;  %s7894_s0 = inlined_call_operand.vmem [shape: f32[2,16,16,4], index: 0, kind: input, shape index: {}]   ;;  %s7895_s1 = inlined_call_operand.vmem [shape: f32[9,4,8], index: 1, kind: input, shape index: {}]   ;;  %s7896_s2 = inlined_call_operand.vmem [shape: f32[1,8], index: 2, kind: input, shape index: {}]   ;;  %s7897_s3 = inlined_call_operand.vmem [shape: f32[1,8], index: 3, kind: input, shape index: {}]   ;;  %s7898_s4 = inlined_call_operand.vmem [shape: f32[9,8,8], index: 4, kind: input, shape index: {}]   ;;  %s7899_s5 = inlined_call_operand.vmem [shape: f32[1,8], index: 5, kind: input, shape index: {}]   ;;  %s7900_s6 = inlined_call_operand.vmem [shape: f32[1,8], index: 6, kind: input, shape index: {}]   ;;  %s7901_s7 = inlined_call_operand.vmem [shape: f32[2,8,8,8], index: 7, kind: output, shape index: {}]  }
   0x1   :  { %s6415_s26 = smov 0  }
   0x2 LB: > { %s29_s27 = sadd.s32 1, %s6363_s25  ;;  %p5426_p0 = scmp.ge.s32.totalorder %s6367_s26, 1  ;;  %s6367_s26 = sphi %s6415_s26, %s17_s26   ;;  %s6363_s25 = sphi %s6413_s25, %s7903_s25   ;;  %s6359_s24 = sphi %s6411_s24, %s7902_s24  }
   0x3   : > { %p31_p1 = scmp.ge.s32.totalorder %s29_s27, 2  ;;  %p251_p2 = scmp.lt.s32.totalorder %s6367_s26, 3 }
   0x5   : > { %s7905_s27 = smov (%p31_p1, %s29_s27), 0  ;;  %p252_p3 = pnand %p5426_p0, %p251_p2 }
   0x6   : > { %v2323_v0 = vld [vmem:[%s7895_s1] sm:$0xf] (!%p252_p3)  ;;  %vm2367_vm0 = vcmask (!%p252_p3), 1043456   ;;  %vm1940_vm1 = vcmask (!%p252_p3), 31744   ;;  %vm2142_vm2 = vcmask (!%p252_p3), 24576   ;;  %v6369_v1 = vmov (!%p252_p3), 0.0  }
   0x7   : > { %255 = sbr.rel (%p252_p3) target bundleno = 1071 (0x42f), region = 48  ;;  %5883 = vmatprep.subr.msk.mxu0 (!%p252_p3), %vm2367_vm0, %v2323_v0  ;;  %2133 = vst.msk [vmem:[#allocation2] sm:$0xff] (!%p252_p3), %vm1940_vm1, %v6369_v1  ;;  %2135 = vst.msk [vmem:[#allocation2 + $0x10] sm:$0xff] (!%p252_p3), %vm1940_vm1, %v6369_v1  ;;  %v5454_v2 = vld [vmem:[%s7895_s1 + $0x8] sm:$0xf] (!%p252_p3)  ;;  %p287_p4 = scmp.lt.s32.totalorder (!%p252_p3), %s6359_s24, 1  ;;  %v375_v3 = vlaneseq (!%p252_p3) }
   0x8   : > { %2138 = vst.msk [vmem:[#allocation2 + $0xa0] sm:$0xff] (!%p252_p3), %vm1940_vm1, %v6369_v1  ;;  %2140 = vst.msk [vmem:[#allocation2 + $0xb0] sm:$0xff] (!%p252_p3), %vm1940_vm1, %v6369_v1  ;;  %vm1043_vm3 = vcmask (!%p252_p3), 25600   ;;  %5884 = vmatpush3.msk.msra.mxu0 (!%p252_p3), %vm2367_vm0, %v2323_v0  ;;  %v6370_v4 = vmov (!%p252_p3), 1983009808   ;;  %vm2231_vm4 = vcmask (!%p252_p3), 1041409  }
   0x9   : > { %2145 = vst.msk [vmem:[#allocation2 + $0x20] sm:$0x1] (!%p252_p3), %vm2142_vm2, %v6369_v1  ;;  %2146 = vst.msk [vmem:[#allocation2 + $0x30] sm:$0x1] (!%p252_p3), %vm2142_vm2, %v6369_v1  ;;  %v373_v5 = vunpack.c.l.s4 (!%p252_p3), %v6370_v4  ;;  %5900 = vmatprep.subr.msk.mxu0 (!%p252_p3), %vm2367_vm0, %v5454_v2  ;;  %v376_v6 = vshrl.u32 (!%p252_p3), %v375_v3, 7  ;;  %vm2233_vm5 = vcmask (!%p252_p3), 1042434  }
   0xa   : > { %2147 = vst.msk [vmem:[#allocation2 + $0x40] sm:$0x1] (!%p252_p3), %vm2142_vm2, %v6369_v1  ;;  %2148 = vst.msk [vmem:[#allocation2 + $0x50] sm:$0x1] (!%p252_p3), %vm2142_vm2, %v6369_v1  ;;  %vm2235_vm6 = vcmask (!%p252_p3), 1043459   ;;  %vm2237_vm7 = vcmask (!%p252_p3), 1044484  }
   0xb   : > { %2149 = vst.msk [vmem:[#allocation2 + $0x60] sm:$0x1] (!%p252_p3), %vm2142_vm2, %v6369_v1  ;;  %2150 = vst.msk [vmem:[#allocation2 + $0x70] sm:$0x1] (!%p252_p3), %vm2142_vm2, %v6369_v1  ;;  %v374_v7 = vunpack.c.0.s8 (!%p252_p3), %v373_v5  ;;  %vm2239_vm8 = vcmask (!%p252_p3), 1045509   ;;  %vm2241_vm9 = vcmask (!%p252_p3), 1046534  }
   0xc   : > { %2151 = vst.msk [vmem:[#allocation2 + $0x80] sm:$0x1] (!%p252_p3), %vm2142_vm2, %v6369_v1  ;;  %2152 = vst.msk [vmem:[#allocation2 + $0x90] sm:$0x1] (!%p252_p3), %vm2142_vm2, %v6369_v1  ;;  %vm2243_vm10 = vcmask (!%p252_p3), 1047559   ;;  %vm3966_vm11 = vcmask (!%p252_p3), 64512  }
   0xd   : > { %2157 = vst.msk [vmem:[#allocation2 + $0x29] sm:$0x1] (!%p252_p3), %vm2142_vm2, %v6369_v1  ;;  %2158 = vst.msk [vmem:[#allocation2 + $0x39] sm:$0x1] (!%p252_p3), %vm2142_vm2, %v6369_v1  ;;  %v6516_v8 = vsub.s32 (!%p252_p3), %v374_v7, %v376_v6  ;;  %vm3945_vm12 = vcmask (!%p252_p3), 57344  }
   0xe   : > { %2159 = vst.msk [vmem:[#allocation2 + $0x49] sm:$0x1] %vm2142_vm2, %v6369_v1  ;;  %2160 = vst.msk [vmem:[#allocation2 + $0x59] sm:$0x1] %vm2142_vm2, %v6369_v1  ;;  %s7907_s24 = smov (!%p287_p4, %s6359_s24), 1 }
   0xf   : > { %2161 = vst.msk [vmem:[#allocation2 + $0x69] sm:$0x1] %vm2142_vm2, %v6369_v1  ;;  %2162 = vst.msk [vmem:[#allocation2 + $0x79] sm:$0x1] %vm2142_vm2, %v6369_v1  ;;  %s5684_s9 = sshll.u32 %s7907_s24, 8  ;;  %s5685_s15 = sshll.u32 %s7907_s24, 6 }
  0x10   : > { %2163 = vst.msk [vmem:[#allocation2 + $0x89] sm:$0x1] %vm2142_vm2, %v6369_v1  ;;  %2164 = vst.msk [vmem:[#allocation2 + $0x99] sm:$0x1] %vm2142_vm2, %v6369_v1  ;;  %s6514_s12 = scalar_lea.vmem %s7894_s0, %s5684_s9  ;;  %s7867_s18 = scalar_lea.vmem %s7901_s7, %s5685_s15 }
  0x11   : > { %2143 = vst.msk [vmem:[#allocation2] sm:$0x1] %vm2142_vm2, %v6369_v1  ;;  %2144 = vst.msk [vmem:[#allocation2 + $0x10] sm:$0x1] %vm2142_vm2, %v6369_v1  ;;  %v307_v9 = vld [vmem:[%s6514_s12] sm:$0xff]  ;;  %v308_v10 = vld [vmem:[%s6514_s12 + $0x8] sm:$0xff] }
  0x12   : > { %2153 = vst.msk [vmem:[#allocation2 + $0xa0] sm:$0x1] %vm2142_vm2, %v6369_v1  ;;  %2154 = vst.msk [vmem:[#allocation2 + $0xb0] sm:$0x1] %vm2142_vm2, %v6369_v1  ;;  %v309_v11 = vld [vmem:[%s6514_s12 + $0x10] sm:$0xff]  ;;  %v310_v12 = vld [vmem:[%s6514_s12 + $0x18] sm:$0xff]  ;;  %v371_v13 = vcombine.high %v307_v9, %v307_v9  ;;  %v378_v14 = vrot.slane %v307_v9, %v6516_v8  ;;  %v388_v15 = vcombine.high %v308_v10, %v308_v10 }
  0x13   : > { %2134 = vst.msk [vmem:[#allocation2 + $0x8] sm:$0x3] %vm1043_vm3, %v6369_v1  ;;  %2136 = vst.msk [vmem:[#allocation2 + $0x18] sm:$0x3] %vm1043_vm3, %v6369_v1  ;;  %v395_v16 = vrot.slane %v308_v10, %v6516_v8  ;;  %v405_v19 = vcombine.high %v309_v11, %v309_v11  ;;  %v6525_v20 = vrot.slane %v309_v11, %v6516_v8 }
  0x14   : > { %2139 = vst.msk [vmem:[#allocation2 + $0xa8] sm:$0x3] %vm1043_vm3, %v6369_v1  ;;  %2141 = vst.msk [vmem:[#allocation2 + $0xb8] sm:$0x3] %vm1043_vm3, %v6369_v1  ;;  %v422_v21 = vcombine.high %v310_v12, %v310_v12  ;;  %v6528_v22 = vrot.slane %v310_v12, %v6516_v8  ;;  %v385_v23 = vrot.slane %v371_v13, %v6516_v8  ;;  %v1044_v33 = vsel %vm1043_vm3, %v378_v14, -inf }
  0x15   : > { %2155 = vst.msk [vmem:[#allocation2 + $0x9] sm:$0x1] %vm2142_vm2, %v6369_v1  ;;  %2156 = vst.msk [vmem:[#allocation2 + $0x19] sm:$0x1] %vm2142_vm2, %v6369_v1  ;;  %v386_v24 = vcombine.high %v378_v14, %v378_v14  ;;  %v402_v25 = vrot.slane %v388_v15, %v6516_v8  ;;  %v403_v26 = vcombine.high %v395_v16, %v395_v16  ;;  %v1045_v37 = vrot.slane %v1044_v33, 4 }
  0x16   : > { %2165 = vst.msk [vmem:[#allocation2 + $0xa9] sm:$0x1] %vm2142_vm2, %v6369_v1  ;;  %2166 = vst.msk [vmem:[#allocation2 + $0xb9] sm:$0x1] %vm2142_vm2, %v6369_v1  ;;  %v6535_v27 = vrot.slane %v405_v19, %v6516_v8  ;;  %v420_v28 = vcombine.high %v6525_v20, %v6525_v20  ;;  %v6540_v29 = vrot.slane %v422_v21, %v6516_v8  ;;  %v1058_v39 = vsel %vm1043_vm3, %v385_v23, -inf }
  0x17   : > { %v437_v30 = vcombine.high %v6528_v22, %v6528_v22  ;;  %v387_v31 = vcombine.high %v385_v23, %v385_v23  ;;  %v404_v32 = vcombine.high %v402_v25, %v402_v25  ;;  %v1051_v34 = vsel %vm1043_vm3, %v386_v24, -inf  ;;  %3967 = vst.msk [vmem:[#allocation3 + $0x1] sm:$0xff] %vm3966_vm11, %v6369_v1  ;;  %3976 = vst.msk [vmem:[#allocation3 + $0x91] sm:$0xff] %vm3966_vm11, %v6369_v1 }
  0x18   : > { %v2313_v17 = vld [vmem:[#allocation2] sm:$0xff]  ;;  %v2314_v18 = vld [vmem:[#allocation2 + $0x10] sm:$0xff]  ;;  %v421_v35 = vcombine.high %v6535_v27, %v6535_v27  ;;  %v438_v36 = vcombine.high %v6540_v29, %v6540_v29  ;;  %v1052_v38 = vrot.slane %v1051_v34, 4  ;;  %v1072_v41 = vsel %vm1043_vm3, %v395_v16, -inf  ;;  %3946 = vst.msk [vmem:[#allocation3] sm:$0x1] %vm3945_vm12, %v6369_v1 }
  0x19   : > { %5885 = vmatprep.mubr.msk.f32.mxu0 %vm1940_vm1, %v2313_v17  ;;  %v1065_v40 = vsel %vm1043_vm3, %v387_v31, -inf  ;;  %v1079_v42 = vsel %vm1043_vm3, %v403_v26, -inf  ;;  %v1046_v43 = vmax.f32 %v1044_v33, %v1045_v37  ;;  %v1059_v45 = vrot.slane %v1058_v39, 4  ;;  %3947 = vst.msk [vmem:[#allocation3 + $0x10] sm:$0x1] %vm3945_vm12, %v6369_v1 }
  0x1a   : > { %5886 = vmatmul.mubr.msk.f32.vlgmr.msra.gmra.mrb[0].mxu0 %vm1940_vm1, %v2314_v18  ;;  %v1053_v44 = vmax.f32 %v1051_v34, %v1052_v38  ;;  %v1066_v46 = vrot.slane %v1065_v40, 4  ;;  %v1073_v47 = vrot.slane %v1072_v41, 4  ;;  %v1080_v48 = vrot.slane %v1079_v42, 4  ;;  %3948 = vst.msk [vmem:[#allocation3 + $0x20] sm:$0x1] %vm3945_vm12, %v6369_v1 }
  0x1b   : > { %5901 = vmatpush3.msk.msra.mxu0 %vm2367_vm0, %v5454_v2  ;;  %v1086_v49 = vsel %vm1043_vm3, %v402_v25, -inf  ;;  %v1093_v50 = vsel %vm1043_vm3, %v404_v32, -inf  ;;  %v1047_v51 = vrot.slane %v1046_v43, 2  ;;  %v1060_v53 = vmax.f32 %v1058_v39, %v1059_v45  ;;  %3949 = vst.msk [vmem:[#allocation3 + $0x30] sm:$0x1] %vm3945_vm12, %v6369_v1 }
  0x1c   : > { %v1054_v52 = vrot.slane %v1053_v44, 2  ;;  %v1067_v54 = vmax.f32 %v1065_v40, %v1066_v46  ;;  %v1074_v55 = vmax.f32 %v1072_v41, %v1073_v47  ;;  %v1081_v56 = vmax.f32 %v1079_v42, %v1080_v48  ;;  %3950 = vst.msk [vmem:[#allocation3 + $0x40] sm:$0x1] %vm3945_vm12, %v6369_v1  ;;  %3951 = vst.msk [vmem:[#allocation3 + $0x50] sm:$0x1] %vm3945_vm12, %v6369_v1 }
  0x1d   : > { %v1087_v57 = vrot.slane %v1086_v49, 4  ;;  %v1094_v58 = vrot.slane %v1093_v50, 4  ;;  %v1048_v59 = vmax.f32 %v1046_v43, %v1047_v51  ;;  %v1061_v61 = vrot.slane %v1060_v53, 2  ;;  %3952 = vst.msk [vmem:[#allocation3 + $0x60] sm:$0x1] %vm3945_vm12, %v6369_v1 }
  0x1e   : > { %v1055_v60 = vmax.f32 %v1053_v44, %v1054_v52  ;;  %v1068_v62 = vrot.slane %v1067_v54, 2  ;;  %v1075_v63 = vrot.slane %v1074_v55, 2  ;;  %v1082_v0 = vrot.slane %v1081_v56, 2  ;;  %3953 = vst.msk [vmem:[#allocation3 + $0x70] sm:$0x1] %vm3945_vm12, %v6369_v1 }
  0x1f   : > { %v1088_v2 = vmax.f32 %v1086_v49, %v1087_v57  ;;  %v1095_v3 = vmax.f32 %v1093_v50, %v1094_v58  ;;  %v1049_v4 = vrot.slane %v1048_v59, 1  ;;  %v1062_v6 = vmax.f32 %v1060_v53, %v1061_v61  ;;  %3954 = vst.msk [vmem:[#allocation3 + $0x80] sm:$0x1] %vm3945_vm12, %v6369_v1  ;;  %3955 = vst.msk [vmem:[#allocation3 + $0x90] sm:$0x1] %vm3945_vm12, %v6369_v1 }
  0x20   : > { %v1056_v5 = vrot.slane %v1055_v60, 1  ;;  %v1069_v7 = vmax.f32 %v1067_v54, %v1068_v62  ;;  %v1076_v9 = vmax.f32 %v1074_v55, %v1075_v63  ;;  %v1083_v10 = vmax.f32 %v1081_v56, %v1082_v0  ;;  %3956 = vst.msk [vmem:[#allocation3 + $0x9] sm:$0x1] %vm3945_vm12, %v6369_v1  ;;  %3957 = vst.msk [vmem:[#allocation3 + $0x19] sm:$0x1] %vm3945_vm12, %v6369_v1 }
  0x21   : > { %v1089_v11 = vrot.slane %v1088_v2, 2  ;;  %v1096_v12 = vrot.slane %v1095_v3, 2  ;;  %v6557_v13 = vmax.f32 %v1048_v59, %v1049_v4  ;;  %v1063_v15 = vrot.slane %v1062_v6, 1  ;;  %3958 = vst.msk [vmem:[#allocation3 + $0x29] sm:$0x1] %vm3945_vm12, %v6369_v1 }
  0x22   : > { %v6559_v14 = vmax.f32 %v1055_v60, %v1056_v5  ;;  %v1070_v16 = vrot.slane %v1069_v7, 1  ;;  %v1077_v17 = vrot.slane %v1076_v9, 1  ;;  %v1084_v18 = vrot.slane %v1083_v10, 1  ;;  %3959 = vst.msk [vmem:[#allocation3 + $0x39] sm:$0x1] %vm3945_vm12, %v6369_v1 }
  0x23   : > { %v1090_v19 = vmax.f32 %v1088_v2, %v1089_v11  ;;  %v1097_v21 = vmax.f32 %v1095_v3, %v1096_v12  ;;  %v6561_v23 = vmax.f32 %v1062_v6, %v1063_v15  ;;  %v1100_v25 = vsel %vm1043_vm3, %v6525_v20, -inf  ;;  %3960 = vst.msk [vmem:[#allocation3 + $0x49] sm:$0x1] %vm3945_vm12, %v6369_v1  ;;  %3961 = vst.msk [vmem:[#allocation3 + $0x59] sm:$0x1] %vm3945_vm12, %v6369_v1 }
  0x24   : > { %v6563_v24 = vmax.f32 %v1069_v7, %v1070_v16  ;;  %v1107_v26 = vsel %vm1043_vm3, %v420_v28, -inf  ;;  %v6568_v31 = vmax.f32 %v1076_v9, %v1077_v17  ;;  %v6570_v32 = vmax.f32 %v1083_v10, %v1084_v18  ;;  %3962 = vst.msk [vmem:[#allocation3 + $0x69] sm:$0x1] %vm3945_vm12, %v6369_v1  ;;  %3963 = vst.msk [vmem:[#allocation3 + $0x79] sm:$0x1] %vm3945_vm12, %v6369_v1 }
  0x25   : > { %v1091_v33 = vrot.slane %v1090_v19, 1  ;;  %v1098_v34 = vrot.slane %v1097_v21, 1  ;;  %v1101_v37 = vrot.slane %v1100_v25, 4  ;;  %v1108_v38 = vrot.slane %v1107_v26, 4  ;;  %3964 = vst.msk [vmem:[#allocation3 + $0x89] sm:$0x1] %vm3945_vm12, %v6369_v1 }
  0x26   : > { %v1114_v39 = vsel %vm1043_vm3, %v6535_v27, -inf  ;;  %v1121_v40 = vsel %vm1043_vm3, %v421_v35, -inf  ;;  %v1128_v45 = vsel %vm1043_vm3, %v6528_v22, -inf  ;;  %v1135_v46 = vsel %vm1043_vm3, %v437_v30, -inf  ;;  %3965 = vst.msk [vmem:[#allocation3 + $0x99] sm:$0x1] %vm3945_vm12, %v6369_v1 }
  0x27   : > { %v6575_v41 = vmax.f32 %v1090_v19, %v1091_v33  ;;  %v6577_v42 = vmax.f32 %v1097_v21, %v1098_v34  ;;  %v1115_v20 = vrot.slane %v1114_v39, 4  ;;  %v1122_v43 = vrot.slane %v1121_v40, 4  ;;  %v5599_v1 = vld [vmem:[%s7897_s3] ss:$0 sm:$0xff] }
  0x28   : > { %v1102_v28 = vmax.f32 %v1100_v25, %v1101_v37  ;;  %v1109_v44 = vmax.f32 %v1107_v26, %v1108_v38  ;;  %v1129_v48 = vrot.slane %v1128_v45, 4  ;;  %v1136_v35 = vrot.slane %v1135_v46, 4 }
  0x29   : > { %v1116_v47 = vmax.f32 %v1114_v39, %v1115_v20  ;;  %v1123_v27 = vmax.f32 %v1121_v40, %v1122_v43  ;;  %v1142_v51 = vsel %vm1043_vm3, %v6540_v29, -inf  ;;  %v1149_v52 = vsel %vm1043_vm3, %v438_v36, -inf }
  0x2a   : > { %v1103_v49 = vrot.slane %v1102_v28, 2  ;;  %v1110_v50 = vrot.slane %v1109_v44, 2  ;;  %v1130_v55 = vmax.f32 %v1128_v45, %v1129_v48  ;;  %v1137_v22 = vmax.f32 %v1135_v46, %v1136_v35  ;;  %v311_v35 = vld [vmem:[%s6514_s12 + $0x20] sm:$0xff] }
  0x2b   : > { %v1117_v53 = vrot.slane %v1116_v47, 2  ;;  %v1124_v54 = vrot.slane %v1123_v27, 2  ;;  %v1143_v57 = vrot.slane %v1142_v51, 4  ;;  %v1150_v58 = vrot.slane %v1149_v52, 4 }
  0x2c   : > { %v1104_v56 = vmax.f32 %v1102_v28, %v1103_v49  ;;  %v1111_v30 = vmax.f32 %v1109_v44, %v1110_v50  ;;  %v1131_v61 = vrot.slane %v1130_v55, 2  ;;  %v1138_v62 = vrot.slane %v1137_v22, 2 }
  0x2d   : > { %v1118_v59 = vmax.f32 %v1116_v47, %v1117_v53  ;;  %v1125_v60 = vmax.f32 %v1123_v27, %v1124_v54  ;;  %v1144_v2 = vmax.f32 %v1142_v51, %v1143_v57  ;;  %v1151_v3 = vmax.f32 %v1149_v52, %v1150_v58  ;;  %v312_v52 = vld [vmem:[%s6514_s12 + $0x28] sm:$0xff]  ;;  %v313_v53 = vld [vmem:[%s6514_s12 + $0x30] sm:$0xff]  ;;  %v314_v58 = vld [vmem:[%s6514_s12 + $0x38] sm:$0xff] }
  0x2e   : > { %v1105_v63 = vrot.slane %v1104_v56, 1  ;;  %v1112_v0 = vrot.slane %v1111_v30, 1  ;;  %v1132_v36 = vmax.f32 %v1130_v55, %v1131_v61  ;;  %v1139_v5 = vmax.f32 %v1137_v22, %v1138_v62 }
  0x2f   : > { %v1119_v29 = vrot.slane %v1118_v59, 1  ;;  %v1126_v4 = vrot.slane %v1125_v60, 1  ;;  %v1145_v9 = vrot.slane %v1144_v2, 2  ;;  %v1152_v10 = vrot.slane %v1151_v3, 2 }
  0x30   : > { %v1106_v6 = vmax.f32 %v1104_v56, %v1105_v63  ;;  %v1113_v7 = vmax.f32 %v1111_v30, %v1112_v0  ;;  %v1133_v15 = vrot.slane %v1132_v36, 1  ;;  %v1140_v16 = vrot.slane %v1139_v5, 1 }
  0x31   : > { %v1120_v11 = vmax.f32 %v1118_v59, %v1119_v29  ;;  %v1127_v12 = vmax.f32 %v1125_v60, %v1126_v4  ;;  %v1146_v17 = vmax.f32 %v1144_v2, %v1145_v9  ;;  %v1153_v18 = vmax.f32 %v1151_v3, %v1152_v10 }
  0x32   : > { %v1941_v19 = vsel %vm1940_vm1, %v6557_v13, -inf  ;;  %v1942_v21 = vsel %vm1940_vm1, %v1106_v6, -inf  ;;  %v1134_v25 = vmax.f32 %v1132_v36, %v1133_v15  ;;  %v1141_v26 = vmax.f32 %v1139_v5, %v1140_v16 }
  0x33   : > { %v1943_v33 = vmax.f32 %v1941_v19, %v1942_v21  ;;  %v1944_v34 = vsel %vm1940_vm1, %v6559_v14, -inf  ;;  %v1147_v37 = vrot.slane %v1146_v17, 1  ;;  %v1154_v38 = vrot.slane %v1153_v18, 1 }
  0x34   : > { %v1945_v39 = vsel %vm1940_vm1, %v1113_v7, -inf  ;;  %v1947_v40 = vsel %vm1940_vm1, %v6561_v23, -inf  ;;  %v1948_v20 = vsel %vm1940_vm1, %v1120_v11, -inf  ;;  %v1950_v43 = vsel %vm1940_vm1, %v6563_v24, -inf }
  0x35   : > { %v1946_v13 = vmax.f32 %v1944_v34, %v1945_v39  ;;  %v1951_v14 = vsel %vm1940_vm1, %v1127_v12, -inf  ;;  %v1148_v28 = vmax.f32 %v1146_v17, %v1147_v37  ;;  %v1155_v44 = vmax.f32 %v1153_v18, %v1154_v38 }
  0x36   : > { %v1949_v45 = vmax.f32 %v1947_v40, %v1948_v20  ;;  %v1952_v46 = vmax.f32 %v1950_v43, %v1951_v14  ;;  %v1953_v47 = vsel %vm1940_vm1, %v6568_v31, -inf  ;;  %v1954_v23 = vsel %vm1940_vm1, %v1134_v25, -inf }
  0x37   : > { %v1956_v27 = vsel %vm1940_vm1, %v6570_v32, -inf  ;;  %v1957_v48 = vsel %vm1940_vm1, %v1141_v26, -inf  ;;  %v1955_v24 = vmax.f32 %v1953_v47, %v1954_v23  ;;  %v1959_v50 = vsel %vm1940_vm1, %v6575_v41, -inf }
  0x38   : > { %v1958_v49 = vmax.f32 %v1956_v27, %v1957_v48  ;;  %v1960_v51 = vsel %vm1940_vm1, %v1148_v28, -inf  ;;  %v1962_v31 = vsel %vm1940_vm1, %v6577_v42, -inf  ;;  %v1963_v55 = vsel %vm1940_vm1, %v1155_v44, -inf }
  0x39   : > { %v1961_v54 = vmax.f32 %v1959_v50, %v1960_v51  ;;  %v2232_v32 = vsel %vm2231_vm4, %v1946_v13, %v1943_v33  ;;  %v1964_v22 = vmax.f32 %v1962_v31, %v1963_v55  ;;  %v439_v30 = vcombine.high %v311_v35, %v311_v35 }
  0x3a   : > { %v2234_v56 = vsel %vm2233_vm5, %v1949_v45, %v2232_v32  ;;  %v446_v57 = vrot.slane %v311_v35, %v6516_v8  ;;  %v456_v59 = vcombine.high %v312_v52, %v312_v52  ;;  %v463_v60 = vrot.slane %v312_v52, %v6516_v8 }
  0x3b   : > { %v2236_v41 = vsel %vm2235_vm6, %v1952_v46, %v2234_v56  ;;  %v473_v61 = vcombine.high %v313_v53, %v313_v53  ;;  %v453_v42 = vrot.slane %v439_v30, %v6516_v8  ;;  %v6627_v0 = vrot.slane %v313_v53, %v6516_v8 }
  0x3c   : > { %v2238_v62 = vsel %vm2237_vm7, %v1955_v24, %v2236_v41  ;;  %v454_v63 = vcombine.high %v446_v57, %v446_v57  ;;  %v470_v3 = vrot.slane %v456_v59, %v6516_v8  ;;  %v471_v29 = vcombine.high %v463_v60, %v463_v60 }
  0x3d   : > { %v2240_v2 = vsel %vm2239_vm8, %v1958_v49, %v2238_v62  ;;  %v6632_v4 = vrot.slane %v473_v61, %v6516_v8  ;;  %v455_v5 = vcombine.high %v453_v42, %v453_v42  ;;  %v488_v6 = vcombine.high %v6627_v0, %v6627_v0 }
  0x3e   : > { %v2242_v36 = vsel %vm2241_vm9, %v1961_v54, %v2240_v2  ;;  %v490_v7 = vcombine.high %v314_v58, %v314_v58  ;;  %v472_v10 = vcombine.high %v470_v3, %v470_v3  ;;  %v6641_v12 = vrot.slane %v314_v58, %v6516_v8 }
  0x3f   : > { %v2244_v9 = vsel %vm2243_vm10, %v1964_v22, %v2242_v36  ;;  %v489_v11 = vcombine.high %v6632_v4, %v6632_v4  ;;  %v1156_v16 = vsel %vm1043_vm3, %v446_v57, -inf  ;;  %v1163_v17 = vsel %vm1043_vm3, %v454_v63, -inf }
  0x40   : > { %2303 = vst.msk [vmem:[#allocation2 + $0x21] sm:$0xff] %vm1940_vm1, %v2244_v9  ;;  %v6645_v15 = vrot.slane %v490_v7, %v6516_v8  ;;  %v1170_v18 = vsel %vm1043_vm3, %v453_v42, -inf  ;;  %v505_v19 = vcombine.high %v6641_v12, %v6641_v12  ;;  %v1157_v21 = vrot.slane %v1156_v16, 4 }
  0x41   : > { %v1164_v25 = vrot.slane %v1163_v17, 4  ;;  %v1171_v26 = vrot.slane %v1170_v18, 4  ;;  %v1177_v34 = vsel %vm1043_vm3, %v455_v5, -inf  ;;  %v1184_v37 = vsel %vm1043_vm3, %v463_v60, -inf }
  0x42   : > { %v506_v33 = vcombine.high %v6645_v15, %v6645_v15  ;;  %v1191_v38 = vsel %vm1043_vm3, %v471_v29, -inf  ;;  %v1158_v39 = vmax.f32 %v1156_v16, %v1157_v21  ;;  %v1178_v20 = vrot.slane %v1177_v34, 4 }
  0x43   : > { %v1165_v40 = vmax.f32 %v1163_v17, %v1164_v25  ;;  %v1172_v13 = vmax.f32 %v1170_v18, %v1171_v26  ;;  %v1185_v43 = vrot.slane %v1184_v37, 4  ;;  %v1192_v14 = vrot.slane %v1191_v38, 4 }
  0x44   : > { %v1198_v28 = vsel %vm1043_vm3, %v470_v3, -inf  ;;  %v1205_v44 = vsel %vm1043_vm3, %v472_v10, -inf  ;;  %v1159_v45 = vrot.slane %v1158_v39, 2  ;;  %v1179_v23 = vmax.f32 %v1177_v34, %v1178_v20 }
  0x45   : > { %v1166_v46 = vrot.slane %v1165_v40, 2  ;;  %v1173_v47 = vrot.slane %v1172_v13, 2  ;;  %v1186_v27 = vmax.f32 %v1184_v37, %v1185_v43  ;;  %v1193_v48 = vmax.f32 %v1191_v38, %v1192_v14 }
  0x46   : > { %v1199_v35 = vrot.slane %v1198_v28, 4  ;;  %v1206_v24 = vrot.slane %v1205_v44, 4  ;;  %v1160_v50 = vmax.f32 %v1158_v39, %v1159_v45  ;;  %v1180_v53 = vrot.slane %v1179_v23, 2 }
  0x47   : > { %v2315_v49 = vld [vmem:[#allocation2 + $0x20] sm:$0xff]  ;;  %v1167_v51 = vmax.f32 %v1165_v40, %v1166_v46  ;;  %v1174_v52 = vmax.f32 %v1172_v13, %v1173_v47  ;;  %v1187_v54 = vrot.slane %v1186_v27, 2  ;;  %v1194_v31 = vrot.slane %v1193_v48, 2 }
  0x48   : > { %5888 = vmatprep.mubr.msk.f32.mxu0 %vm1940_vm1, %v2315_v49  ;;  %v1200_v55 = vmax.f32 %v1198_v28, %v1199_v35  ;;  %v1207_v32 = vmax.f32 %v1205_v44, %v1206_v24  ;;  %v1161_v22 = vrot.slane %v1160_v50, 1  ;;  %v1181_v57 = vmax.f32 %v1179_v23, %v1180_v53 }
  0x49   : > { %v1168_v56 = vrot.slane %v1167_v51, 1  ;;  %v1175_v30 = vrot.slane %v1174_v52, 1  ;;  %v1188_v41 = vmax.f32 %v1186_v27, %v1187_v54  ;;  %v1195_v58 = vmax.f32 %v1193_v48, %v1194_v31 }
  0x4a   : > { %v1201_v59 = vrot.slane %v1200_v55, 2  ;;  %v1208_v60 = vrot.slane %v1207_v32, 2  ;;  %v6660_v61 = vmax.f32 %v1160_v50, %v1161_v22  ;;  %v1182_v63 = vrot.slane %v1181_v57, 1 }
  0x4b   : > { %v6662_v62 = vmax.f32 %v1167_v51, %v1168_v56  ;;  %v6664_v42 = vmax.f32 %v1174_v52, %v1175_v30  ;;  %v1189_v2 = vrot.slane %v1188_v41, 1  ;;  %v1196_v3 = vrot.slane %v1195_v58, 1 }
  0x4c   : > { %v1202_v29 = vmax.f32 %v1200_v55, %v1201_v59  ;;  %v1209_v36 = vmax.f32 %v1207_v32, %v1208_v60  ;;  %v6666_v5 = vmax.f32 %v1181_v57, %v1182_v63  ;;  %v1212_v7 = vsel %vm1043_vm3, %v6627_v0, -inf }
  0x4d   : > { %v1219_v9 = vsel %vm1043_vm3, %v488_v6, -inf  ;;  %v1226_v10 = vsel %vm1043_vm3, %v6632_v4, -inf  ;;  %v6676_v16 = vmax.f32 %v1188_v41, %v1189_v2  ;;  %v6678_v17 = vmax.f32 %v1195_v58, %v1196_v3 }
  0x4e   : > { %v1203_v18 = vrot.slane %v1202_v29, 1  ;;  %v1210_v21 = vrot.slane %v1209_v36, 1  ;;  %v1213_v25 = vrot.slane %v1212_v7, 4  ;;  %v1220_v26 = vrot.slane %v1219_v9, 4 }
  0x4f   : > { %v1227_v34 = vrot.slane %v1226_v10, 4  ;;  %v1233_v37 = vsel %vm1043_vm3, %v489_v11, -inf  ;;  %v1240_v39 = vsel %vm1043_vm3, %v6641_v12, -inf  ;;  %v1247_v4 = vsel %vm1043_vm3, %v505_v19, -inf }
  0x50   : > { %v6684_v0 = vmax.f32 %v1202_v29, %v1203_v18  ;;  %v6686_v6 = vmax.f32 %v1209_v36, %v1210_v21  ;;  %v1234_v38 = vrot.slane %v1233_v37, 4  ;;  %v1214_v40 = vmax.f32 %v1212_v7, %v1213_v25 }
  0x51   : > { %v1221_v13 = vmax.f32 %v1219_v9, %v1220_v26  ;;  %v1228_v20 = vmax.f32 %v1226_v10, %v1227_v34  ;;  %v1241_v43 = vrot.slane %v1240_v39, 4  ;;  %v1254_v11 = vsel %vm1043_vm3, %v6645_v15, -inf }
  0x52   : > { %v1235_v14 = vmax.f32 %v1233_v37, %v1234_v38  ;;  %v1261_v28 = vsel %vm1043_vm3, %v506_v33, -inf  ;;  %v1215_v44 = vrot.slane %v1214_v40, 2  ;;  %v1248_v27 = vrot.slane %v1247_v4, 4 }
  0x53   : > { %v1222_v45 = vrot.slane %v1221_v13, 2  ;;  %v1229_v46 = vrot.slane %v1228_v20, 2  ;;  %v1242_v47 = vmax.f32 %v1240_v39, %v1241_v43  ;;  %v1255_v48 = vrot.slane %v1254_v11, 4 }
  0x54   : > { %v1236_v23 = vrot.slane %v1235_v14, 2  ;;  %v1262_v35 = vrot.slane %v1261_v28, 4  ;;  %v1216_v24 = vmax.f32 %v1214_v40, %v1215_v44  ;;  %v1249_v51 = vmax.f32 %v1247_v4, %v1248_v27 }
  0x55   : > { %v1223_v12 = vmax.f32 %v1221_v13, %v1222_v45  ;;  %v1230_v49 = vmax.f32 %v1228_v20, %v1229_v46  ;;  %v1243_v19 = vrot.slane %v1242_v47, 2  ;;  %v1256_v52 = vmax.f32 %v1254_v11, %v1255_v48 }
  0x56   : > { %v1237_v50 = vmax.f32 %v1235_v14, %v1236_v23  ;;  %v1263_v53 = vmax.f32 %v1261_v28, %v1262_v35  ;;  %v1217_v54 = vrot.slane %v1216_v24, 1  ;;  %v1250_v32 = vrot.slane %v1249_v51, 2  ;;  %v316_v28 = vld [vmem:[%s6514_s12 + $0x48] sm:$0xff] }
  0x57   : > { %v1224_v15 = vrot.slane %v1223_v12, 1  ;;  %v1231_v31 = vrot.slane %v1230_v49, 1  ;;  %v1244_v33 = vmax.f32 %v1242_v47, %v1243_v19  ;;  %v1257_v22 = vrot.slane %v1256_v52, 2  ;;  %v317_v47 = vld [vmem:[%s6514_s12 + $0x50] sm:$0xff]  ;;  %v318_v19 = vld [vmem:[%s6514_s12 + $0x58] sm:$0xff] }
  0x58   : > { %v1238_v55 = vrot.slane %v1237_v50, 1  ;;  %v1264_v56 = vrot.slane %v1263_v53, 2  ;;  %v1218_v30 = vmax.f32 %v1216_v24, %v1217_v54  ;;  %v1251_v60 = vmax.f32 %v1249_v51, %v1250_v32 }
  0x59   : > { %v1225_v57 = vmax.f32 %v1223_v12, %v1224_v15  ;;  %v1232_v41 = vmax.f32 %v1230_v49, %v1231_v31  ;;  %v1245_v58 = vrot.slane %v1244_v33, 1  ;;  %v1258_v63 = vmax.f32 %v1256_v52, %v1257_v22 }
  0x5a   : > { %v1239_v59 = vmax.f32 %v1237_v50, %v1238_v55  ;;  %v1265_v2 = vmax.f32 %v1263_v53, %v1264_v56  ;;  %v1965_v29 = vsel %vm1940_vm1, %v6660_v61, -inf  ;;  %v1966_v36 = vsel %vm1940_vm1, %v1218_v30, -inf }
  0x5b   : > { %v1246_v3 = vmax.f32 %v1244_v33, %v1245_v58  ;;  %v1968_v7 = vsel %vm1940_vm1, %v6662_v62, -inf  ;;  %v1252_v9 = vrot.slane %v1251_v60, 1  ;;  %v1259_v10 = vrot.slane %v1258_v63, 1 }
  0x5c   : > { %v1266_v18 = vrot.slane %v1265_v2, 1  ;;  %v1967_v21 = vmax.f32 %v1965_v29, %v1966_v36  ;;  %v1969_v25 = vsel %vm1940_vm1, %v1225_v57, -inf  ;;  %v1971_v26 = vsel %vm1940_vm1, %v6664_v42, -inf  ;;  %v315_v42 = vld [vmem:[%s6514_s12 + $0x40] sm:$0xff] }
  0x5d   : > { %v1972_v34 = vsel %vm1940_vm1, %v1232_v41, -inf  ;;  %v1974_v61 = vsel %vm1940_vm1, %v6666_v5, -inf  ;;  %v1253_v37 = vmax.f32 %v1251_v60, %v1252_v9  ;;  %v1260_v38 = vmax.f32 %v1258_v63, %v1259_v10 }
  0x5e   : > { %v1267_v39 = vmax.f32 %v1265_v2, %v1266_v18  ;;  %v1970_v62 = vmax.f32 %v1968_v7, %v1969_v25  ;;  %v1973_v40 = vmax.f32 %v1971_v26, %v1972_v34  ;;  %v1975_v13 = vsel %vm1940_vm1, %v1239_v59, -inf }
  0x5f   : > { %v1977_v20 = vsel %vm1940_vm1, %v6676_v16, -inf  ;;  %v1978_v43 = vsel %vm1940_vm1, %v1246_v3, -inf  ;;  %v1976_v14 = vmax.f32 %v1974_v61, %v1975_v13  ;;  %v1980_v11 = vsel %vm1940_vm1, %v6678_v17, -inf }
  0x60   : > { %v1979_v4 = vmax.f32 %v1977_v20, %v1978_v43  ;;  %v1981_v5 = vsel %vm1940_vm1, %v1253_v37, -inf  ;;  %v1983_v45 = vsel %vm1940_vm1, %v6684_v0, -inf  ;;  %v1984_v46 = vsel %vm1940_vm1, %v1260_v38, -inf }
  0x61   : > { %v1982_v44 = vmax.f32 %v1980_v11, %v1981_v5  ;;  %v1986_v16 = vsel %vm1940_vm1, %v6686_v6, -inf  ;;  %v1985_v23 = vmax.f32 %v1983_v45, %v1984_v46  ;;  %v1987_v27 = vsel %vm1940_vm1, %v1267_v39, -inf }
  0x62   : > { %v2245_v48 = vsel %vm2231_vm4, %v1970_v62, %v1967_v21  ;;  %v507_v17 = vcombine.high %v315_v42, %v315_v42  ;;  %v1988_v35 = vmax.f32 %v1986_v16, %v1987_v27  ;;  %v514_v12 = vrot.slane %v315_v42, %v6516_v8 }
  0x63   : > { %v2246_v24 = vsel %vm2233_vm5, %v1973_v40, %v2245_v48  ;;  %v524_v49 = vcombine.high %v316_v28, %v316_v28  ;;  %v531_v6 = vrot.slane %v316_v28, %v6516_v8  ;;  %v541_v51 = vcombine.high %v317_v47, %v317_v47 }
  0x64   : > { %v2247_v0 = vsel %vm2235_vm6, %v1976_v14, %v2246_v24  ;;  %v521_v50 = vrot.slane %v507_v17, %v6516_v8  ;;  %v522_v53 = vcombine.high %v514_v12, %v514_v12  ;;  %v6737_v15 = vrot.slane %v317_v47, %v6516_v8 }
  0x65   : > { %v2248_v52 = vsel %vm2237_vm7, %v1979_v4, %v2247_v0  ;;  %v538_v54 = vrot.slane %v524_v49, %v6516_v8  ;;  %v539_v55 = vcombine.high %v531_v6, %v531_v6  ;;  %v6741_v32 = vrot.slane %v541_v51, %v6516_v8 }
  0x66   : > { %v2249_v31 = vsel %vm2239_vm8, %v1982_v44, %v2248_v52  ;;  %v523_v33 = vcombine.high %v521_v50, %v521_v50  ;;  %v556_v30 = vcombine.high %v6737_v15, %v6737_v15  ;;  %v558_v57 = vcombine.high %v318_v19, %v318_v19 }
  0x67   : > { %v2250_v22 = vsel %vm2241_vm9, %v1985_v23, %v2249_v31  ;;  %v540_v56 = vcombine.high %v538_v54, %v538_v54  ;;  %v557_v58 = vcombine.high %v6741_v32, %v6741_v32  ;;  %v6750_v59 = vrot.slane %v318_v19, %v6516_v8 }
  0x68   : > { %v2251_v41 = vsel %vm2243_vm10, %v1988_v35, %v2250_v22  ;;  %v1268_v60 = vsel %vm1043_vm3, %v514_v12, -inf  ;;  %v6755_v63 = vrot.slane %v558_v57, %v6516_v8  ;;  %v1275_v3 = vsel %vm1043_vm3, %v522_v53, -inf }
  0x69   : > { %2304 = vst.msk [vmem:[#allocation2 + $0x31] sm:$0xff] %vm1940_vm1, %v2251_v41  ;;  %v1269_v2 = vrot.slane %v1268_v60, 4  ;;  %v1282_v29 = vsel %vm1043_vm3, %v521_v50, -inf  ;;  %v573_v36 = vcombine.high %v6750_v59, %v6750_v59  ;;  %v1276_v7 = vrot.slane %v1275_v3, 4 }
  0x6a   : > { %v1283_v9 = vrot.slane %v1282_v29, 4  ;;  %v1289_v10 = vsel %vm1043_vm3, %v523_v33, -inf  ;;  %v574_v18 = vcombine.high %v6755_v63, %v6755_v63  ;;  %v1296_v26 = vsel %vm1043_vm3, %v531_v6, -inf }
  0x6b   : > { %v1270_v21 = vmax.f32 %v1268_v60, %v1269_v2  ;;  %v1290_v25 = vrot.slane %v1289_v10, 4  ;;  %v1277_v34 = vmax.f32 %v1275_v3, %v1276_v7  ;;  %v1297_v37 = vrot.slane %v1296_v26, 4 }
  0x6c   : > { %v1284_v61 = vmax.f32 %v1282_v29, %v1283_v9  ;;  %v1303_v38 = vsel %vm1043_vm3, %v539_v55, -inf  ;;  %v1310_v13 = vsel %vm1043_vm3, %v538_v54, -inf  ;;  %v1317_v28 = vsel %vm1043_vm3, %v540_v56, -inf }
  0x6d   : > { %v1271_v39 = vrot.slane %v1270_v21, 2  ;;  %v1291_v62 = vmax.f32 %v1289_v10, %v1290_v25  ;;  %v1304_v40 = vrot.slane %v1303_v38, 4  ;;  %v1278_v20 = vrot.slane %v1277_v34, 2 }
  0x6e   : > { %v1285_v43 = vrot.slane %v1284_v61, 2  ;;  %v1298_v42 = vmax.f32 %v1296_v26, %v1297_v37  ;;  %v1311_v14 = vrot.slane %v1310_v13, 4  ;;  %v1318_v17 = vrot.slane %v1317_v28, 4 }
  0x6f   : > { %v1272_v4 = vmax.f32 %v1270_v21, %v1271_v39  ;;  %v1292_v11 = vrot.slane %v1291_v62, 2  ;;  %v1305_v5 = vmax.f32 %v1303_v38, %v1304_v40  ;;  %v1279_v45 = vmax.f32 %v1277_v34, %v1278_v20 }
  0x70   : > { %v2316_v44 = vld [vmem:[#allocation2 + $0x30] sm:$0xff]  ;;  %v1286_v46 = vmax.f32 %v1284_v61, %v1285_v43  ;;  %v1299_v16 = vrot.slane %v1298_v42, 2  ;;  %v1312_v47 = vmax.f32 %v1310_v13, %v1311_v14  ;;  %v1319_v6 = vmax.f32 %v1317_v28, %v1318_v17 }
  0x71   : > { %5889 = vmatmul.mubr.msk.f32.gmra.mrb[2].mxu0 %vm1940_vm1, %v2316_v44  ;;  %v1273_v23 = vrot.slane %v1272_v4, 1  ;;  %v1293_v27 = vmax.f32 %v1291_v62, %v1292_v11  ;;  %v1306_v48 = vrot.slane %v1305_v5, 2  ;;  %v1280_v35 = vrot.slane %v1279_v45, 1 }
  0x72   : > { %v1287_v24 = vrot.slane %v1286_v46, 1  ;;  %v1300_v12 = vmax.f32 %v1298_v42, %v1299_v16  ;;  %v1313_v49 = vrot.slane %v1312_v47, 2  ;;  %v1320_v55 = vrot.slane %v1319_v6, 2 }
  0x73   : > { %v6769_v0 = vmax.f32 %v1272_v4, %v1273_v23  ;;  %v1294_v19 = vrot.slane %v1293_v27, 1  ;;  %v1307_v50 = vmax.f32 %v1305_v5, %v1306_v48  ;;  %v6771_v51 = vmax.f32 %v1279_v45, %v1280_v35 }
  0x74   : > { %v6773_v52 = vmax.f32 %v1286_v46, %v1287_v24  ;;  %v1301_v53 = vrot.slane %v1300_v12, 1  ;;  %v1314_v54 = vmax.f32 %v1312_v47, %v1313_v49  ;;  %v1324_v22 = vsel %vm1043_vm3, %v6737_v15, -inf }
  0x75   : > { %v6775_v31 = vmax.f32 %v1293_v27, %v1294_v19  ;;  %v1308_v33 = vrot.slane %v1307_v50, 1  ;;  %v1325_v41 = vrot.slane %v1324_v22, 4  ;;  %v1331_v60 = vsel %vm1043_vm3, %v556_v30, -inf }
  0x76   : > { %v6779_v56 = vmax.f32 %v1300_v12, %v1301_v53  ;;  %v1315_v57 = vrot.slane %v1314_v54, 1  ;;  %v1321_v3 = vmax.f32 %v1319_v6, %v1320_v55  ;;  %v1332_v29 = vrot.slane %v1331_v60, 4 }
  0x77   : > { %v6785_v2 = vmax.f32 %v1307_v50, %v1308_v33  ;;  %v1338_v7 = vsel %vm1043_vm3, %v6741_v32, -inf  ;;  %v1326_v10 = vmax.f32 %v1324_v22, %v1325_v41  ;;  %v1345_v25 = vsel %vm1043_vm3, %v557_v58, -inf }
  0x78   : > { %v6789_v9 = vmax.f32 %v1314_v54, %v1315_v57  ;;  %v1339_v21 = vrot.slane %v1338_v7, 4  ;;  %v1322_v26 = vrot.slane %v1321_v3, 1  ;;  %v1333_v15 = vmax.f32 %v1331_v60, %v1332_v29 }
  0x79   : > { %v1346_v34 = vrot.slane %v1345_v25, 4  ;;  %v1352_v30 = vsel %vm1043_vm3, %v6750_v59, -inf  ;;  %v1327_v61 = vrot.slane %v1326_v10, 2  ;;  %v1359_v39 = vsel %vm1043_vm3, %v573_v36, -inf }
  0x7a   : > { %v1340_v37 = vmax.f32 %v1338_v7, %v1339_v21  ;;  %v1353_v38 = vrot.slane %v1352_v30, 4  ;;  %v6801_v62 = vmax.f32 %v1321_v3, %v1322_v26  ;;  %v1334_v40 = vrot.slane %v1333_v15, 2 }
  0x7b   : > { %v1347_v32 = vmax.f32 %v1345_v25, %v1346_v34  ;;  %v1360_v13 = vrot.slane %v1359_v39, 4  ;;  %v1328_v58 = vmax.f32 %v1326_v10, %v1327_v61  ;;  %v1366_v42 = vsel %vm1043_vm3, %v6755_v63, -inf }
  0x7c   : > { %v1341_v20 = vrot.slane %v1340_v37, 2  ;;  %v1354_v43 = vmax.f32 %v1352_v30, %v1353_v38  ;;  %v1335_v14 = vmax.f32 %v1333_v15, %v1334_v40  ;;  %v1367_v5 = vrot.slane %v1366_v42, 4  ;;  %v319_v38 = vld [vmem:[%s6514_s12 + $0x60] sm:$0xff] }
  0x7d   : > { %v1348_v4 = vrot.slane %v1347_v32, 2  ;;  %v1361_v11 = vmax.f32 %v1359_v39, %v1360_v13  ;;  %v1329_v28 = vrot.slane %v1328_v58, 1  ;;  %v1373_v36 = vsel %vm1043_vm3, %v574_v18, -inf  ;;  %v320_v39 = vld [vmem:[%s6514_s12 + $0x68] sm:$0xff] }
  0x7e   : > { %v1342_v44 = vmax.f32 %v1340_v37, %v1341_v20  ;;  %v1355_v59 = vrot.slane %v1354_v43, 2  ;;  %v1336_v45 = vrot.slane %v1335_v14, 1  ;;  %v1368_v47 = vmax.f32 %v1366_v42, %v1367_v5 }
  0x7f   : > { %v1349_v46 = vmax.f32 %v1347_v32, %v1348_v4  ;;  %v1362_v16 = vrot.slane %v1361_v11, 2  ;;  %v1330_v23 = vmax.f32 %v1328_v58, %v1329_v28  ;;  %v1374_v17 = vrot.slane %v1373_v36, 4  ;;  %v321_v58 = vld [vmem:[%s6514_s12 + $0x70] sm:$0xff] }
  0x80   : > { %v1343_v27 = vrot.slane %v1342_v44, 1  ;;  %v1356_v48 = vmax.f32 %v1354_v43, %v1355_v59  ;;  %v1337_v35 = vmax.f32 %v1335_v14, %v1336_v45  ;;  %v1369_v49 = vrot.slane %v1368_v47, 2 }
  0x81   : > { %v1350_v24 = vrot.slane %v1349_v46, 1  ;;  %v1363_v12 = vmax.f32 %v1361_v11, %v1362_v16  ;;  %v1375_v6 = vmax.f32 %v1373_v36, %v1374_v17  ;;  %v1989_v63 = vsel %vm1940_vm1, %v6769_v0, -inf }
  0x82   : > { %v1344_v19 = vmax.f32 %v1342_v44, %v1343_v27  ;;  %v1357_v50 = vrot.slane %v1356_v48, 1  ;;  %v1370_v54 = vmax.f32 %v1368_v47, %v1369_v49  ;;  %v1990_v33 = vsel %vm1940_vm1, %v1330_v23, -inf }
  0x83   : > { %v1351_v53 = vmax.f32 %v1349_v46, %v1350_v24  ;;  %v1364_v18 = vrot.slane %v1363_v12, 1  ;;  %v1376_v22 = vrot.slane %v1375_v6, 2  ;;  %v1991_v57 = vmax.f32 %v1989_v63, %v1990_v33 }
  0x84   : > { %v1358_v55 = vmax.f32 %v1356_v48, %v1357_v50  ;;  %v1992_v41 = vsel %vm1940_vm1, %v6771_v51, -inf  ;;  %v1371_v3 = vrot.slane %v1370_v54, 1  ;;  %v1993_v29 = vsel %vm1940_vm1, %v1337_v35, -inf }
  0x85   : > { %v1365_v60 = vmax.f32 %v1363_v12, %v1364_v18  ;;  %v1995_v0 = vsel %vm1940_vm1, %v6773_v52, -inf  ;;  %v1377_v7 = vmax.f32 %v1375_v6, %v1376_v22  ;;  %v1994_v10 = vmax.f32 %v1992_v41, %v1993_v29 }
  0x86   : > { %v1996_v21 = vsel %vm1940_vm1, %v1344_v19, -inf  ;;  %v1998_v25 = vsel %vm1940_vm1, %v6775_v31, -inf  ;;  %v1372_v26 = vmax.f32 %v1370_v54, %v1371_v3  ;;  %v1999_v51 = vsel %vm1940_vm1, %v1351_v53, -inf }
  0x87   : > { %v1997_v15 = vmax.f32 %v1995_v0, %v1996_v21  ;;  %v2001_v34 = vsel %vm1940_vm1, %v6779_v56, -inf  ;;  %v1378_v30 = vrot.slane %v1377_v7, 1  ;;  %v2000_v61 = vmax.f32 %v1998_v25, %v1999_v51 }
  0x88   : > { %v2002_v37 = vsel %vm1940_vm1, %v1358_v55, -inf  ;;  %v2004_v52 = vsel %vm1940_vm1, %v6785_v2, -inf  ;;  %v2005_v31 = vsel %vm1940_vm1, %v1365_v60, -inf  ;;  %v2007_v32 = vsel %vm1940_vm1, %v6789_v9, -inf  ;;  %v322_v9 = vld [vmem:[%s6514_s12 + $0x78] sm:$0xff] }
  0x89   : > { %v2003_v40 = vmax.f32 %v2001_v34, %v2002_v37  ;;  %v2008_v13 = vsel %vm1940_vm1, %v1372_v26, -inf  ;;  %v1379_v56 = vmax.f32 %v1377_v7, %v1378_v30  ;;  %v2006_v20 = vmax.f32 %v2004_v52, %v2005_v31 }
  0x8a   : > { %v2009_v43 = vmax.f32 %v2007_v32, %v2008_v13  ;;  %v2010_v42 = vsel %vm1940_vm1, %v6801_v62, -inf  ;;  %v2252_v2 = vsel %vm2231_vm4, %v1994_v10, %v1991_v57  ;;  %v575_v14 = vcombine.high %v319_v38, %v319_v38 }
  0x8b   : > { %v582_v4 = vrot.slane %v319_v38, %v6516_v8  ;;  %v592_v11 = vcombine.high %v320_v39, %v320_v39  ;;  %v2011_v5 = vsel %vm1940_vm1, %v1379_v56, -inf  ;;  %v2253_v28 = vsel %vm2233_vm5, %v1997_v15, %v2252_v2 }
  0x8c   : > { %v599_v44 = vrot.slane %v320_v39, %v6516_v8  ;;  %v609_v59 = vcombine.high %v321_v58, %v321_v58  ;;  %v2012_v36 = vmax.f32 %v2010_v42, %v2011_v5  ;;  %v2254_v45 = vsel %vm2235_vm6, %v2000_v61, %v2253_v28 }
  0x8d   : > { %v589_v46 = vrot.slane %v575_v14, %v6516_v8  ;;  %v590_v62 = vcombine.high %v582_v4, %v582_v4  ;;  %v2255_v16 = vsel %vm2237_vm7, %v2003_v40, %v2254_v45  ;;  %v606_v47 = vrot.slane %v592_v11, %v6516_v8 }
  0x8e   : > { %v607_v23 = vcombine.high %v599_v44, %v599_v44  ;;  %v6846_v27 = vrot.slane %v321_v58, %v6516_v8  ;;  %v2256_v48 = vsel %vm2239_vm8, %v2006_v20, %v2255_v16  ;;  %v6850_v35 = vrot.slane %v609_v59, %v6516_v8 }
  0x8f   : > { %v591_v17 = vcombine.high %v589_v46, %v589_v46  ;;  %v626_v24 = vcombine.high %v322_v9, %v322_v9  ;;  %v2257_v12 = vsel %vm2241_vm9, %v2009_v43, %v2256_v48  ;;  %v608_v49 = vcombine.high %v606_v47, %v606_v47 }
  0x90   : > { %v624_v19 = vcombine.high %v6846_v27, %v6846_v27  ;;  %v6856_v50 = vrot.slane %v322_v9, %v6516_v8  ;;  %v2258_v6 = vsel %vm2243_vm10, %v2012_v36, %v2257_v12  ;;  %v625_v63 = vcombine.high %v6850_v35, %v6850_v35 }
  0x91   : > { %v6862_v53 = vrot.slane %v626_v24, %v6516_v8  ;;  %v1380_v18 = vsel %vm1043_vm3, %v582_v4, -inf  ;;  %2305 = vst.msk [vmem:[#allocation2 + $0x41] sm:$0xff] %vm1940_vm1, %v2258_v6  ;;  %v1387_v55 = vsel %vm1043_vm3, %v590_v62, -inf  ;;  %v1394_v22 = vsel %vm1043_vm3, %v589_v46, -inf }
  0x92   : > { %v641_v54 = vcombine.high %v6856_v50, %v6856_v50  ;;  %v1381_v33 = vrot.slane %v1380_v18, 4  ;;  %v1388_v41 = vrot.slane %v1387_v55, 4  ;;  %v1395_v60 = vrot.slane %v1394_v22, 4 }
  0x93   : > { %v642_v57 = vcombine.high %v6862_v53, %v6862_v53  ;;  %v1401_v3 = vsel %vm1043_vm3, %v591_v17, -inf  ;;  %v1408_v7 = vsel %vm1043_vm3, %v599_v44, -inf  ;;  %v1415_v10 = vsel %vm1043_vm3, %v607_v23, -inf }
  0x94   : > { %v1382_v29 = vmax.f32 %v1380_v18, %v1381_v33  ;;  %v1402_v0 = vrot.slane %v1401_v3, 4  ;;  %v1389_v21 = vmax.f32 %v1387_v55, %v1388_v41  ;;  %v1396_v25 = vmax.f32 %v1394_v22, %v1395_v60 }
  0x95   : > { %v1409_v26 = vrot.slane %v1408_v7, 4  ;;  %v1416_v15 = vrot.slane %v1415_v10, 4  ;;  %v1422_v30 = vsel %vm1043_vm3, %v606_v47, -inf  ;;  %v1429_v61 = vsel %vm1043_vm3, %v608_v49, -inf }
  0x96   : > { %v1383_v51 = vrot.slane %v1382_v29, 2  ;;  %v1403_v34 = vmax.f32 %v1401_v3, %v1402_v0  ;;  %v1390_v37 = vrot.slane %v1389_v21, 2  ;;  %v1397_v52 = vrot.slane %v1396_v25, 2 }
  0x97   : > { %v1410_v38 = vmax.f32 %v1408_v7, %v1409_v26  ;;  %v1417_v39 = vmax.f32 %v1415_v10, %v1416_v15  ;;  %v1423_v32 = vrot.slane %v1422_v30, 4  ;;  %v1430_v13 = vrot.slane %v1429_v61, 4 }
  0x98   : > { %v1384_v40 = vmax.f32 %v1382_v29, %v1383_v51  ;;  %v1404_v31 = vrot.slane %v1403_v34, 2  ;;  %v2317_v58 = vld [vmem:[#allocation2 + $0x40] sm:$0xff]  ;;  %v1391_v56 = vmax.f32 %v1389_v21, %v1390_v37  ;;  %v1398_v20 = vmax.f32 %v1396_v25, %v1397_v52 }
  0x99   : > { %v1411_v43 = vrot.slane %v1410_v38, 2  ;;  %v1418_v42 = vrot.slane %v1417_v39, 2  ;;  %5891 = vmatprep.mubr.msk.f32.mxu0 %vm1940_vm1, %v2317_v58  ;;  %v1424_v4 = vmax.f32 %v1422_v30, %v1423_v32  ;;  %v1431_v11 = vmax.f32 %v1429_v61, %v1430_v13 }
  0x9a   : > { %v1385_v2 = vrot.slane %v1384_v40, 1  ;;  %v1405_v14 = vmax.f32 %v1403_v34, %v1404_v31  ;;  %v1392_v5 = vrot.slane %v1391_v56, 1  ;;  %v1399_v28 = vrot.slane %v1398_v20, 1 }
  0x9b   : > { %v1412_v9 = vmax.f32 %v1410_v38, %v1411_v43  ;;  %v1419_v44 = vmax.f32 %v1417_v39, %v1418_v42  ;;  %v1425_v45 = vrot.slane %v1424_v4, 2  ;;  %v1432_v46 = vrot.slane %v1431_v11, 2 }
  0x9c   : > { %v6878_v59 = vmax.f32 %v1384_v40, %v1385_v2  ;;  %v1406_v36 = vrot.slane %v1405_v14, 1  ;;  %v6880_v62 = vmax.f32 %v1391_v56, %v1392_v5  ;;  %v6882_v16 = vmax.f32 %v1398_v20, %v1399_v28 }
  0x9d   : > { %v1413_v47 = vrot.slane %v1412_v9, 1  ;;  %v1420_v23 = vrot.slane %v1419_v44, 1  ;;  %v1426_v17 = vmax.f32 %v1424_v4, %v1425_v45  ;;  %v1433_v24 = vmax.f32 %v1431_v11, %v1432_v46 }
  0x9e   : > { %v6884_v48 = vmax.f32 %v1405_v14, %v1406_v36  ;;  %v1436_v12 = vsel %vm1043_vm3, %v6846_v27, -inf  ;;  %v1443_v33 = vsel %vm1043_vm3, %v624_v19, -inf  ;;  %v1450_v60 = vsel %vm1043_vm3, %v6850_v35, -inf }
  0x9f   : > { %v6888_v49 = vmax.f32 %v1412_v9, %v1413_v47  ;;  %v6890_v6 = vmax.f32 %v1419_v44, %v1420_v23  ;;  %v1437_v18 = vrot.slane %v1436_v12, 4  ;;  %v1427_v55 = vrot.slane %v1426_v17, 1 }
  0xa0   : > { %v1434_v22 = vrot.slane %v1433_v24, 1  ;;  %v1444_v41 = vrot.slane %v1443_v33, 4  ;;  %v1451_v29 = vrot.slane %v1450_v60, 4  ;;  %v1457_v0 = vsel %vm1043_vm3, %v625_v63, -inf }
  0xa1   : > { %v1438_v3 = vmax.f32 %v1436_v12, %v1437_v18  ;;  %v1464_v7 = vsel %vm1043_vm3, %v6856_v50, -inf  ;;  %v6904_v10 = vmax.f32 %v1426_v17, %v1427_v55  ;;  %v1458_v21 = vrot.slane %v1457_v0, 4 }
  0xa2   : > { %v6906_v27 = vmax.f32 %v1433_v24, %v1434_v22  ;;  %v1445_v19 = vmax.f32 %v1443_v33, %v1444_v41  ;;  %v1452_v26 = vmax.f32 %v1450_v60, %v1451_v29  ;;  %v1465_v15 = vrot.slane %v1464_v7, 4 }
  0xa3   : > { %v1439_v25 = vrot.slane %v1438_v3, 2  ;;  %v1471_v51 = vsel %vm1043_vm3, %v641_v54, -inf  ;;  %v1459_v34 = vmax.f32 %v1457_v0, %v1458_v21  ;;  %v1478_v30 = vsel %vm1043_vm3, %v6862_v53, -inf }
  0xa4   : > { %v1446_v35 = vrot.slane %v1445_v19, 2  ;;  %v1472_v63 = vrot.slane %v1471_v51, 4  ;;  %v1453_v37 = vrot.slane %v1452_v26, 2  ;;  %v1466_v52 = vmax.f32 %v1464_v7, %v1465_v15 }
  0xa5   : > { %v1440_v61 = vmax.f32 %v1438_v3, %v1439_v25  ;;  %v1479_v38 = vrot.slane %v1478_v30, 4  ;;  %v1460_v40 = vrot.slane %v1459_v34, 2  ;;  %v1485_v50 = vsel %vm1043_vm3, %v642_v57, -inf  ;;  %v323_v25 = vld [vmem:[%s6514_s12 + $0x80] sm:$0xff] }
  0xa6   : > { %v1447_v39 = vmax.f32 %v1445_v19, %v1446_v35  ;;  %v1473_v31 = vmax.f32 %v1471_v51, %v1472_v63  ;;  %v1454_v54 = vmax.f32 %v1452_v26, %v1453_v37  ;;  %v1467_v13 = vrot.slane %v1466_v52, 2 }
  0xa7   : > { %v1441_v32 = vrot.slane %v1440_v61, 1  ;;  %v1480_v58 = vmax.f32 %v1478_v30, %v1479_v38  ;;  %v1461_v20 = vmax.f32 %v1459_v34, %v1460_v40  ;;  %v1486_v42 = vrot.slane %v1485_v50, 4  ;;  %v324_v30 = vld [vmem:[%s6514_s12 + $0x88] sm:$0xff] }
  0xa8   : > { %v1448_v56 = vrot.slane %v1447_v39, 1  ;;  %v1474_v43 = vrot.slane %v1473_v31, 2  ;;  %v1455_v14 = vrot.slane %v1454_v54, 1  ;;  %v1468_v4 = vmax.f32 %v1466_v52, %v1467_v13  ;;  %v325_v52 = vld [vmem:[%s6514_s12 + $0x90] sm:$0xff] }
  0xa9   : > { %v1442_v2 = vmax.f32 %v1440_v61, %v1441_v32  ;;  %v1481_v11 = vrot.slane %v1480_v58, 2  ;;  %v1462_v28 = vrot.slane %v1461_v20, 1  ;;  %v1487_v44 = vmax.f32 %v1485_v50, %v1486_v42  ;;  %v326_v32 = vld [vmem:[%s6514_s12 + $0x98] sm:$0xff] }
  0xaa   : > { %v1449_v5 = vmax.f32 %v1447_v39, %v1448_v56  ;;  %v1475_v9 = vmax.f32 %v1473_v31, %v1474_v43  ;;  %v1456_v36 = vmax.f32 %v1454_v54, %v1455_v14  ;;  %v1469_v53 = vrot.slane %v1468_v4, 1 }
  0xab   : > { %v1482_v45 = vmax.f32 %v1480_v58, %v1481_v11  ;;  %v2013_v57 = vsel %vm1940_vm1, %v6878_v59, -inf  ;;  %v1463_v46 = vmax.f32 %v1461_v20, %v1462_v28  ;;  %v1488_v23 = vrot.slane %v1487_v44, 2 }
  0xac   : > { %v1476_v47 = vrot.slane %v1475_v9, 1  ;;  %v2014_v17 = vsel %vm1940_vm1, %v1442_v2, -inf  ;;  %v1470_v24 = vmax.f32 %v1468_v4, %v1469_v53  ;;  %v2016_v33 = vsel %vm1940_vm1, %v6880_v62, -inf }
  0xad   : > { %v1483_v12 = vrot.slane %v1482_v45, 1  ;;  %v2015_v18 = vmax.f32 %v2013_v57, %v2014_v17  ;;  %v1489_v22 = vmax.f32 %v1487_v44, %v1488_v23  ;;  %v2017_v41 = vsel %vm1940_vm1, %v1449_v5, -inf }
  0xae   : > { %v1477_v55 = vmax.f32 %v1475_v9, %v1476_v47  ;;  %v2019_v60 = vsel %vm1940_vm1, %v6882_v16, -inf  ;;  %v2018_v3 = vmax.f32 %v2016_v33, %v2017_v41  ;;  %v2020_v29 = vsel %vm1940_vm1, %v1456_v36, -inf }
  0xaf   : > { %v1484_v59 = vmax.f32 %v1482_v45, %v1483_v12  ;;  %v2022_v0 = vsel %vm1940_vm1, %v6884_v48, -inf  ;;  %v1490_v7 = vrot.slane %v1489_v22, 1  ;;  %v2021_v19 = vmax.f32 %v2019_v60, %v2020_v29 }
  0xb0   : > { %v2023_v62 = vsel %vm1940_vm1, %v1463_v46, -inf  ;;  %v2025_v21 = vsel %vm1940_vm1, %v6888_v49, -inf  ;;  %v2026_v16 = vsel %vm1940_vm1, %v1470_v24, -inf  ;;  %v2028_v15 = vsel %vm1940_vm1, %v6890_v6, -inf }
  0xb1   : > { %v2024_v26 = vmax.f32 %v2022_v0, %v2023_v62  ;;  %v2029_v51 = vsel %vm1940_vm1, %v1477_v55, -inf  ;;  %v1491_v35 = vmax.f32 %v1489_v22, %v1490_v7  ;;  %v2027_v48 = vmax.f32 %v2025_v21, %v2026_v16 }
  0xb2   : > { %v2030_v34 = vmax.f32 %v2028_v15, %v2029_v51  ;;  %v2031_v63 = vsel %vm1940_vm1, %v6904_v10, -inf  ;;  %v2032_v61 = vsel %vm1940_vm1, %v1484_v59, -inf  ;;  %v2034_v49 = vsel %vm1940_vm1, %v6906_v27, -inf }
  0xb3   : > { %v2259_v37 = vsel %vm2231_vm4, %v2018_v3, %v2015_v18  ;;  %v643_v38 = vcombine.high %v323_v25, %v323_v25  ;;  %v2033_v6 = vmax.f32 %v2031_v63, %v2032_v61  ;;  %v2035_v39 = vsel %vm1940_vm1, %v1491_v35, -inf }
  0xb4   : > { %v2260_v40 = vsel %vm2233_vm5, %v2021_v19, %v2259_v37  ;;  %v650_v31 = vrot.slane %v323_v25, %v6516_v8  ;;  %v2036_v50 = vmax.f32 %v2034_v49, %v2035_v39  ;;  %v660_v13 = vcombine.high %v324_v30, %v324_v30 }
  0xb5   : > { %v2261_v10 = vsel %vm2235_vm6, %v2024_v26, %v2260_v40  ;;  %v657_v54 = vrot.slane %v643_v38, %v6516_v8  ;;  %v667_v56 = vrot.slane %v324_v30, %v6516_v8  ;;  %v677_v20 = vcombine.high %v325_v52, %v325_v52 }
  0xb6   : > { %v2262_v27 = vsel %vm2237_vm7, %v2027_v48, %v2261_v10  ;;  %v658_v58 = vcombine.high %v650_v31, %v650_v31  ;;  %v674_v2 = vrot.slane %v660_v13, %v6516_v8  ;;  %v6956_v14 = vrot.slane %v325_v52, %v6516_v8 }
  0xb7   : > { %v2263_v43 = vsel %vm2239_vm8, %v2030_v34, %v2262_v27  ;;  %v659_v42 = vcombine.high %v657_v54, %v657_v54  ;;  %v675_v11 = vcombine.high %v667_v56, %v667_v56  ;;  %v6960_v5 = vrot.slane %v677_v20, %v6516_v8 }
  0xb8   : > { %v2264_v4 = vsel %vm2241_vm9, %v2033_v6, %v2263_v43  ;;  %v694_v28 = vcombine.high %v326_v32, %v326_v32  ;;  %v676_v44 = vcombine.high %v674_v2, %v674_v2  ;;  %v692_v36 = vcombine.high %v6956_v14, %v6956_v14 }
  0xb9   : > { %v2265_v9 = vsel %vm2243_vm10, %v2036_v50, %v2264_v4  ;;  %v6966_v53 = vrot.slane %v326_v32, %v6516_v8  ;;  %v693_v45 = vcombine.high %v6960_v5, %v6960_v5  ;;  %v1492_v46 = vsel %vm1043_vm3, %v650_v31, -inf }
  0xba   : > { %2306 = vst.msk [vmem:[#allocation2 + $0x51] sm:$0xff] %vm1940_vm1, %v2265_v9  ;;  %v6972_v57 = vrot.slane %v694_v28, %v6516_v8  ;;  %v1499_v47 = vsel %vm1043_vm3, %v658_v58, -inf  ;;  %v1493_v17 = vrot.slane %v1492_v46, 4  ;;  %v1506_v12 = vsel %vm1043_vm3, %v657_v54, -inf }
  0xbb   : > { %v709_v23 = vcombine.high %v6966_v53, %v6966_v53  ;;  %v1500_v24 = vrot.slane %v1499_v47, 4  ;;  %v1507_v33 = vrot.slane %v1506_v12, 4  ;;  %v1513_v55 = vsel %vm1043_vm3, %v659_v42, -inf }
  0xbc   : > { %v710_v18 = vcombine.high %v6972_v57, %v6972_v57  ;;  %v1520_v22 = vsel %vm1043_vm3, %v667_v56, -inf  ;;  %v1494_v41 = vmax.f32 %v1492_v46, %v1493_v17  ;;  %v1514_v59 = vrot.slane %v1513_v55, 4 }
  0xbd   : > { %v1501_v60 = vmax.f32 %v1499_v47, %v1500_v24  ;;  %v1521_v3 = vrot.slane %v1520_v22, 4  ;;  %v1508_v29 = vmax.f32 %v1506_v12, %v1507_v33  ;;  %v1527_v0 = vsel %vm1043_vm3, %v675_v11, -inf }
  0xbe   : > { %v1534_v7 = vsel %vm1043_vm3, %v674_v2, -inf  ;;  %v1541_v19 = vsel %vm1043_vm3, %v676_v44, -inf  ;;  %v1495_v62 = vrot.slane %v1494_v41, 2  ;;  %v1515_v25 = vmax.f32 %v1513_v55, %v1514_v59 }
  0xbf   : > { %v1502_v21 = vrot.slane %v1501_v60, 2  ;;  %v1522_v26 = vmax.f32 %v1520_v22, %v1521_v3  ;;  %v1509_v16 = vrot.slane %v1508_v29, 2  ;;  %v1528_v15 = vrot.slane %v1527_v0, 4 }
  0xc0   : > { %v1535_v51 = vrot.slane %v1534_v7, 4  ;;  %v1542_v35 = vrot.slane %v1541_v19, 4  ;;  %v1496_v34 = vmax.f32 %v1494_v41, %v1495_v62  ;;  %v1516_v30 = vrot.slane %v1515_v25, 2 }
  0xc1   : > { %v2318_v48 = vld [vmem:[#allocation2 + $0x50] sm:$0xff]  ;;  %v1503_v63 = vmax.f32 %v1501_v60, %v1502_v21  ;;  %v1523_v61 = vrot.slane %v1522_v26, 2  ;;  %v1510_v49 = vmax.f32 %v1508_v29, %v1509_v16  ;;  %v1529_v37 = vmax.f32 %v1527_v0, %v1528_v15 }
  0xc2   : > { %5892 = vmatmul.mubr.msk.f32.gmra.mrb[4].mxu0 %vm1940_vm1, %v2318_v48  ;;  %v1536_v52 = vmax.f32 %v1534_v7, %v1535_v51  ;;  %v1543_v38 = vmax.f32 %v1541_v19, %v1542_v35  ;;  %v1497_v6 = vrot.slane %v1496_v34, 1  ;;  %v1517_v40 = vmax.f32 %v1515_v25, %v1516_v30 }
  0xc3   : > { %v1504_v39 = vrot.slane %v1503_v63, 1  ;;  %v1524_v31 = vmax.f32 %v1522_v26, %v1523_v61  ;;  %v1511_v50 = vrot.slane %v1510_v49, 1  ;;  %v1530_v10 = vrot.slane %v1529_v37, 2 }
  0xc4   : > { %v1537_v32 = vrot.slane %v1536_v52, 2  ;;  %v1544_v54 = vrot.slane %v1543_v38, 2  ;;  %v6987_v13 = vmax.f32 %v1496_v34, %v1497_v6  ;;  %v1518_v58 = vrot.slane %v1517_v40, 1 }
  0xc5   : > { %v6989_v27 = vmax.f32 %v1503_v63, %v1504_v39  ;;  %v1525_v56 = vrot.slane %v1524_v31, 1  ;;  %v6991_v20 = vmax.f32 %v1510_v49, %v1511_v50  ;;  %v1531_v43 = vmax.f32 %v1529_v37, %v1530_v10 }
  0xc6   : > { %v1538_v42 = vmax.f32 %v1536_v52, %v1537_v32  ;;  %v1545_v2 = vmax.f32 %v1543_v38, %v1544_v54  ;;  %v6993_v4 = vmax.f32 %v1517_v40, %v1518_v58  ;;  %v1548_v28 = vsel %vm1043_vm3, %v6956_v14, -inf }
  0xc7   : > { %v6995_v11 = vmax.f32 %v1524_v31, %v1525_v56  ;;  %v1555_v9 = vsel %vm1043_vm3, %v692_v36, -inf  ;;  %v1532_v44 = vrot.slane %v1531_v43, 1  ;;  %v1549_v17 = vrot.slane %v1548_v28, 4 }
  0xc8   : > { %v1539_v46 = vrot.slane %v1538_v42, 1  ;;  %v1546_v47 = vrot.slane %v1545_v2, 1  ;;  %v1556_v24 = vrot.slane %v1555_v9, 4  ;;  %v1562_v12 = vsel %vm1043_vm3, %v6960_v5, -inf }
  0xc9   : > { %v1569_v33 = vsel %vm1043_vm3, %v693_v45, -inf  ;;  %v1576_v55 = vsel %vm1043_vm3, %v6966_v53, -inf  ;;  %v7008_v22 = vmax.f32 %v1531_v43, %v1532_v44  ;;  %v1550_v41 = vmax.f32 %v1548_v28, %v1549_v17 }
  0xca   : > { %v7010_v14 = vmax.f32 %v1538_v42, %v1539_v46  ;;  %v7012_v36 = vmax.f32 %v1545_v2, %v1546_v47  ;;  %v1557_v60 = vmax.f32 %v1555_v9, %v1556_v24  ;;  %v1563_v59 = vrot.slane %v1562_v12, 4 }
  0xcb   : > { %v1570_v3 = vrot.slane %v1569_v33, 4  ;;  %v1577_v29 = vrot.slane %v1576_v55, 4  ;;  %v1551_v0 = vrot.slane %v1550_v41, 2  ;;  %v1583_v5 = vsel %vm1043_vm3, %v709_v23, -inf }
  0xcc   : > { %v1590_v45 = vsel %vm1043_vm3, %v6972_v57, -inf  ;;  %v1597_v7 = vsel %vm1043_vm3, %v710_v18, -inf  ;;  %v1558_v19 = vrot.slane %v1557_v60, 2  ;;  %v1564_v62 = vmax.f32 %v1562_v12, %v1563_v59 }
  0xcd   : > { %v1571_v21 = vmax.f32 %v1569_v33, %v1570_v3  ;;  %v1578_v25 = vmax.f32 %v1576_v55, %v1577_v29  ;;  %v1552_v26 = vmax.f32 %v1550_v41, %v1551_v0  ;;  %v1584_v16 = vrot.slane %v1583_v5, 4 }
  0xce   : > { %v1591_v15 = vrot.slane %v1590_v45, 4  ;;  %v1598_v51 = vrot.slane %v1597_v7, 4  ;;  %v1559_v35 = vmax.f32 %v1557_v60, %v1558_v19  ;;  %v1565_v53 = vrot.slane %v1564_v62, 2 }
  0xcf   : > { %v1572_v48 = vrot.slane %v1571_v21, 2  ;;  %v1579_v23 = vrot.slane %v1578_v25, 2  ;;  %v1553_v34 = vrot.slane %v1552_v26, 1  ;;  %v1585_v63 = vmax.f32 %v1583_v5, %v1584_v16 }
  0xd0   : > { %v1592_v30 = vmax.f32 %v1590_v45, %v1591_v15  ;;  %v1599_v61 = vmax.f32 %v1597_v7, %v1598_v51  ;;  %v1560_v49 = vrot.slane %v1559_v35, 1  ;;  %v1566_v57 = vmax.f32 %v1564_v62, %v1565_v53  ;;  %v327_v7 = vld [vmem:[%s6514_s12 + $0xa0] sm:$0xff] }
  0xd1   : > { %v1573_v37 = vmax.f32 %v1571_v21, %v1572_v48  ;;  %v1580_v18 = vmax.f32 %v1578_v25, %v1579_v23  ;;  %v1554_v52 = vmax.f32 %v1552_v26, %v1553_v34  ;;  %v1586_v38 = vrot.slane %v1585_v63, 2  ;;  %v328_v25 = vld [vmem:[%s6514_s12 + $0xa8] sm:$0xff]  ;;  %v329_v26 = vld [vmem:[%s6514_s12 + $0xb0] sm:$0xff]  ;;  %v330_v23 = vld [vmem:[%s6514_s12 + $0xb8] sm:$0xff] }
  0xd2   : > { %v1593_v6 = vrot.slane %v1592_v30, 2  ;;  %v1600_v39 = vrot.slane %v1599_v61, 2  ;;  %v1561_v40 = vmax.f32 %v1559_v35, %v1560_v49  ;;  %v1567_v31 = vrot.slane %v1566_v57, 1 }
  0xd3   : > { %v1574_v50 = vrot.slane %v1573_v37, 1  ;;  %v1581_v10 = vrot.slane %v1580_v18, 1  ;;  %v1587_v32 = vmax.f32 %v1585_v63, %v1586_v38  ;;  %v2037_v56 = vsel %vm1940_vm1, %v6987_v13, -inf }
  0xd4   : > { %v1594_v54 = vmax.f32 %v1592_v30, %v1593_v6  ;;  %v1601_v58 = vmax.f32 %v1599_v61, %v1600_v39  ;;  %v1568_v43 = vmax.f32 %v1566_v57, %v1567_v31  ;;  %v2038_v28 = vsel %vm1940_vm1, %v1554_v52, -inf }
  0xd5   : > { %v1575_v42 = vmax.f32 %v1573_v37, %v1574_v50  ;;  %v1582_v2 = vmax.f32 %v1580_v18, %v1581_v10  ;;  %v1588_v9 = vrot.slane %v1587_v32, 1  ;;  %v2039_v47 = vmax.f32 %v2037_v56, %v2038_v28 }
  0xd6   : > { %v1595_v44 = vrot.slane %v1594_v54, 1  ;;  %v1602_v46 = vrot.slane %v1601_v58, 1  ;;  %v2040_v17 = vsel %vm1940_vm1, %v6989_v27, -inf  ;;  %v2041_v24 = vsel %vm1940_vm1, %v1561_v40, -inf }
  0xd7   : > { %v2043_v12 = vsel %vm1940_vm1, %v6991_v20, -inf  ;;  %v2044_v13 = vsel %vm1940_vm1, %v1568_v43, -inf  ;;  %v1589_v33 = vmax.f32 %v1587_v32, %v1588_v9  ;;  %v2042_v60 = vmax.f32 %v2040_v17, %v2041_v24 }
  0xd8   : > { %v1596_v55 = vmax.f32 %v1594_v54, %v1595_v44  ;;  %v1603_v41 = vmax.f32 %v1601_v58, %v1602_v46  ;;  %v2045_v59 = vmax.f32 %v2043_v12, %v2044_v13  ;;  %v2046_v3 = vsel %vm1940_vm1, %v6993_v4, -inf }
  0xd9   : > { %v2047_v27 = vsel %vm1940_vm1, %v1575_v42, -inf  ;;  %v2049_v29 = vsel %vm1940_vm1, %v6995_v11, -inf  ;;  %v2050_v20 = vsel %vm1940_vm1, %v1582_v2, -inf  ;;  %v2052_v5 = vsel %vm1940_vm1, %v7008_v22, -inf }
  0xda   : > { %v2048_v0 = vmax.f32 %v2046_v3, %v2047_v27  ;;  %v2053_v45 = vsel %vm1940_vm1, %v1589_v33, -inf  ;;  %v2051_v19 = vmax.f32 %v2049_v29, %v2050_v20  ;;  %v2055_v4 = vsel %vm1940_vm1, %v7010_v14, -inf }
  0xdb   : > { %v2054_v62 = vmax.f32 %v2052_v5, %v2053_v45  ;;  %v2056_v21 = vsel %vm1940_vm1, %v1596_v55, -inf  ;;  %v2058_v16 = vsel %vm1940_vm1, %v7012_v36, -inf  ;;  %v2059_v15 = vsel %vm1940_vm1, %v1603_v41, -inf  ;;  %v7093_v41 = vld [vmem:[%s7895_s1 + $0xc] sm:$0xf] }
  0xdc   : > { %v2057_v11 = vmax.f32 %v2055_v4, %v2056_v21  ;;  %v2266_v22 = vsel %vm2231_vm4, %v2042_v60, %v2039_v47  ;;  %v2060_v51 = vmax.f32 %v2058_v16, %v2059_v15  ;;  %v711_v53 = vcombine.high %v327_v7, %v327_v7  ;;  %5917 = vmatprep.subr.msk.mxu0 %vm2367_vm0, %v7093_v41 }
  0xdd   : > { %v2267_v35 = vsel %vm2233_vm5, %v2045_v59, %v2266_v22  ;;  %v718_v48 = vrot.slane %v327_v7, %v6516_v8  ;;  %v728_v34 = vcombine.high %v328_v25, %v328_v25  ;;  %v735_v63 = vrot.slane %v328_v25, %v6516_v8 }
  0xde   : > { %v2268_v14 = vsel %vm2235_vm6, %v2048_v0, %v2267_v35  ;;  %v745_v30 = vcombine.high %v329_v26, %v329_v26  ;;  %v725_v36 = vrot.slane %v711_v53, %v6516_v8  ;;  %v7060_v57 = vrot.slane %v329_v26, %v6516_v8 }
  0xdf   : > { %v2269_v61 = vsel %vm2237_vm7, %v2051_v19, %v2268_v14  ;;  %v726_v49 = vcombine.high %v718_v48, %v718_v48  ;;  %v742_v18 = vrot.slane %v728_v34, %v6516_v8  ;;  %v743_v52 = vcombine.high %v735_v63, %v735_v63 }
  0xe0   : > { %v2270_v37 = vsel %vm2239_vm8, %v2054_v62, %v2269_v61  ;;  %v7065_v38 = vrot.slane %v745_v30, %v6516_v8  ;;  %v727_v39 = vcombine.high %v725_v36, %v725_v36  ;;  %v760_v40 = vcombine.high %v7060_v57, %v7060_v57 }
  0xe1   : > { %v2271_v6 = vsel %vm2241_vm9, %v2057_v11, %v2270_v37  ;;  %v762_v31 = vcombine.high %v330_v23, %v330_v23  ;;  %v744_v10 = vcombine.high %v742_v18, %v742_v18  ;;  %v7074_v54 = vrot.slane %v330_v23, %v6516_v8 }
  0xe2   : > { %v2272_v50 = vsel %vm2243_vm10, %v2060_v51, %v2271_v6  ;;  %v761_v32 = vcombine.high %v7065_v38, %v7065_v38  ;;  %v1604_v56 = vsel %vm1043_vm3, %v718_v48, -inf  ;;  %v1611_v43 = vsel %vm1043_vm3, %v726_v49, -inf }
  0xe3   : > { %2307 = vst.msk [vmem:[#allocation2 + $0x61] sm:$0xff] %vm1940_vm1, %v2272_v50  ;;  %v7078_v58 = vrot.slane %v762_v31, %v6516_v8  ;;  %v1618_v42 = vsel %vm1043_vm3, %v725_v36, -inf  ;;  %v777_v2 = vcombine.high %v7074_v54, %v7074_v54  ;;  %v1605_v28 = vrot.slane %v1604_v56, 4 }
  0xe4   : > { %v1612_v9 = vrot.slane %v1611_v43, 4  ;;  %v1619_v44 = vrot.slane %v1618_v42, 4  ;;  %v1625_v47 = vsel %vm1043_vm3, %v727_v39, -inf  ;;  %v1632_v17 = vsel %vm1043_vm3, %v735_v63, -inf }
  0xe5   : > { %v778_v46 = vcombine.high %v7078_v58, %v7078_v58  ;;  %v1639_v24 = vsel %vm1043_vm3, %v743_v52, -inf  ;;  %v1606_v12 = vmax.f32 %v1604_v56, %v1605_v28  ;;  %v1626_v55 = vrot.slane %v1625_v47, 4 }
  0xe6   : > { %v1613_v13 = vmax.f32 %v1611_v43, %v1612_v9  ;;  %v1620_v33 = vmax.f32 %v1618_v42, %v1619_v44  ;;  %v1633_v60 = vrot.slane %v1632_v17, 4  ;;  %v1640_v59 = vrot.slane %v1639_v24, 4 }
  0xe7   : > { %v1646_v3 = vsel %vm1043_vm3, %v742_v18, -inf  ;;  %v1653_v27 = vsel %vm1043_vm3, %v744_v10, -inf  ;;  %v1607_v29 = vrot.slane %v1606_v12, 2  ;;  %v1627_v5 = vmax.f32 %v1625_v47, %v1626_v55 }
  0xe8   : > { %v1614_v0 = vrot.slane %v1613_v13, 2  ;;  %v1621_v20 = vrot.slane %v1620_v33, 2  ;;  %v1634_v45 = vmax.f32 %v1632_v17, %v1633_v60  ;;  %v1641_v7 = vmax.f32 %v1639_v24, %v1640_v59 }
  0xe9   : > { %v1647_v19 = vrot.slane %v1646_v3, 4  ;;  %v1654_v62 = vrot.slane %v1653_v27, 4  ;;  %v1608_v21 = vmax.f32 %v1606_v12, %v1607_v29  ;;  %v1628_v11 = vrot.slane %v1627_v5, 2 }
  0xea   : > { %v2319_v4 = vld [vmem:[#allocation2 + $0x60] sm:$0xff]  ;;  %v1615_v25 = vmax.f32 %v1613_v13, %v1614_v0  ;;  %v1622_v26 = vmax.f32 %v1620_v33, %v1621_v20  ;;  %v1635_v16 = vrot.slane %v1634_v45, 2  ;;  %v1642_v15 = vrot.slane %v1641_v7, 2 }
  0xeb   : > { %5894 = vmatprep.mubr.msk.f32.mxu0 %vm1940_vm1, %v2319_v4  ;;  %v1648_v22 = vmax.f32 %v1646_v3, %v1647_v19  ;;  %v1655_v51 = vmax.f32 %v1653_v27, %v1654_v62  ;;  %v1609_v35 = vrot.slane %v1608_v21, 1  ;;  %v1629_v14 = vmax.f32 %v1627_v5, %v1628_v11 }
  0xec   : > { %v1616_v53 = vrot.slane %v1615_v25, 1  ;;  %v1623_v48 = vrot.slane %v1622_v26, 1  ;;  %v1636_v23 = vmax.f32 %v1634_v45, %v1635_v16  ;;  %v1643_v34 = vmax.f32 %v1641_v7, %v1642_v15 }
  0xed   : > { %v1649_v63 = vrot.slane %v1648_v22, 2  ;;  %v1656_v30 = vrot.slane %v1655_v51, 2  ;;  %v7100_v61 = vmax.f32 %v1608_v21, %v1609_v35  ;;  %v1630_v37 = vrot.slane %v1629_v14, 1 }
  0xee   : > { %v7102_v36 = vmax.f32 %v1615_v25, %v1616_v53  ;;  %v7104_v49 = vmax.f32 %v1622_v26, %v1623_v48  ;;  %v1637_v18 = vrot.slane %v1636_v23, 1  ;;  %v1644_v52 = vrot.slane %v1643_v34, 1 }
  0xef   : > { %v1650_v6 = vmax.f32 %v1648_v22, %v1649_v63  ;;  %v1657_v39 = vmax.f32 %v1655_v51, %v1656_v30  ;;  %v7106_v31 = vmax.f32 %v1629_v14, %v1630_v37  ;;  %v1660_v50 = vsel %vm1043_vm3, %v7060_v57, -inf }
  0xf0   : > { %v1667_v10 = vsel %vm1043_vm3, %v760_v40, -inf  ;;  %v1674_v56 = vsel %vm1043_vm3, %v7065_v38, -inf  ;;  %v7116_v43 = vmax.f32 %v1636_v23, %v1637_v18  ;;  %v7118_v42 = vmax.f32 %v1643_v34, %v1644_v52 }
  0xf1   : > { %v1651_v28 = vrot.slane %v1650_v6, 1  ;;  %v1658_v9 = vrot.slane %v1657_v39, 1  ;;  %v1661_v44 = vrot.slane %v1660_v50, 4  ;;  %v1668_v47 = vrot.slane %v1667_v10, 4 }
  0xf2   : > { %v1675_v17 = vrot.slane %v1674_v56, 4  ;;  %v1681_v24 = vsel %vm1043_vm3, %v761_v32, -inf  ;;  %v1688_v13 = vsel %vm1043_vm3, %v7074_v54, -inf  ;;  %v1695_v38 = vsel %vm1043_vm3, %v777_v2, -inf }
  0xf3   : > { %v7124_v57 = vmax.f32 %v1650_v6, %v1651_v28  ;;  %v7126_v40 = vmax.f32 %v1657_v39, %v1658_v9  ;;  %v1682_v12 = vrot.slane %v1681_v24, 4  ;;  %v1662_v33 = vmax.f32 %v1660_v50, %v1661_v44 }
  0xf4   : > { %v1669_v55 = vmax.f32 %v1667_v10, %v1668_v47  ;;  %v1676_v60 = vmax.f32 %v1674_v56, %v1675_v17  ;;  %v1689_v59 = vrot.slane %v1688_v13, 4  ;;  %v1702_v32 = vsel %vm1043_vm3, %v7078_v58, -inf }
  0xf5   : > { %v1683_v3 = vmax.f32 %v1681_v24, %v1682_v12  ;;  %v1709_v27 = vsel %vm1043_vm3, %v778_v46, -inf  ;;  %v1663_v29 = vrot.slane %v1662_v33, 2  ;;  %v1696_v7 = vrot.slane %v1695_v38, 4 }
  0xf6   : > { %v1670_v0 = vrot.slane %v1669_v55, 2  ;;  %v1677_v20 = vrot.slane %v1676_v60, 2  ;;  %v1690_v5 = vmax.f32 %v1688_v13, %v1689_v59  ;;  %v1703_v19 = vrot.slane %v1702_v32, 4 }
  0xf7   : > { %v1684_v45 = vrot.slane %v1683_v3, 2  ;;  %v1710_v62 = vrot.slane %v1709_v27, 4  ;;  %v1664_v4 = vmax.f32 %v1662_v33, %v1663_v29  ;;  %v1697_v26 = vmax.f32 %v1695_v38, %v1696_v7  ;;  %v332_v29 = vld [vmem:[%s6514_s12 + $0xc8] sm:$0xff] }
  0xf8   : > { %v1671_v54 = vmax.f32 %v1669_v55, %v1670_v0  ;;  %v1678_v21 = vmax.f32 %v1676_v60, %v1677_v20  ;;  %v1691_v2 = vrot.slane %v1690_v5, 2  ;;  %v1704_v11 = vmax.f32 %v1702_v32, %v1703_v19 }
  0xf9   : > { %v1685_v25 = vmax.f32 %v1683_v3, %v1684_v45  ;;  %v1711_v16 = vmax.f32 %v1709_v27, %v1710_v62  ;;  %v1665_v15 = vrot.slane %v1664_v4, 1  ;;  %v1698_v35 = vrot.slane %v1697_v26, 2  ;;  %v333_v45 = vld [vmem:[%s6514_s12 + $0xd0] sm:$0xff] }
  0xfa   : > { %v1672_v58 = vrot.slane %v1671_v54, 1  ;;  %v1679_v22 = vrot.slane %v1678_v21, 1  ;;  %v1692_v46 = vmax.f32 %v1690_v5, %v1691_v2  ;;  %v1705_v53 = vrot.slane %v1704_v11, 2 }
  0xfb   : > { %v1686_v51 = vrot.slane %v1685_v25, 1  ;;  %v1712_v48 = vrot.slane %v1711_v16, 2  ;;  %v1666_v14 = vmax.f32 %v1664_v4, %v1665_v15  ;;  %v1699_v37 = vmax.f32 %v1697_v26, %v1698_v35 }
  0xfc   : > { %v1673_v23 = vmax.f32 %v1671_v54, %v1672_v58  ;;  %v1680_v34 = vmax.f32 %v1678_v21, %v1679_v22  ;;  %v1693_v63 = vrot.slane %v1692_v46, 1  ;;  %v1706_v18 = vmax.f32 %v1704_v11, %v1705_v53 }
  0xfd   : > { %v1687_v30 = vmax.f32 %v1685_v25, %v1686_v51  ;;  %v1713_v52 = vmax.f32 %v1711_v16, %v1712_v48  ;;  %v2061_v39 = vsel %vm1940_vm1, %v7100_v61, -inf  ;;  %v2062_v50 = vsel %vm1940_vm1, %v1666_v14, -inf  ;;  %v334_v25 = vld [vmem:[%s6514_s12 + $0xd8] sm:$0xff] }
  0xfe   : > { %v1694_v6 = vmax.f32 %v1692_v46, %v1693_v63  ;;  %v2064_v10 = vsel %vm1940_vm1, %v7102_v36, -inf  ;;  %v1700_v56 = vrot.slane %v1699_v37, 1  ;;  %v1707_v28 = vrot.slane %v1706_v18, 1 }
  0xff   : > { %v1714_v9 = vrot.slane %v1713_v52, 1  ;;  %v2063_v44 = vmax.f32 %v2061_v39, %v2062_v50  ;;  %v2065_v47 = vsel %vm1940_vm1, %v1673_v23, -inf  ;;  %v2067_v17 = vsel %vm1940_vm1, %v7104_v49, -inf  ;;  %v331_v49 = vld [vmem:[%s6514_s12 + $0xc0] sm:$0xff] }
 0x100   : > { %v2068_v24 = vsel %vm1940_vm1, %v1680_v34, -inf  ;;  %v2070_v61 = vsel %vm1940_vm1, %v7106_v31, -inf  ;;  %v1701_v12 = vmax.f32 %v1699_v37, %v1700_v56  ;;  %v1708_v13 = vmax.f32 %v1706_v18, %v1707_v28 }
 0x101   : > { %v1715_v33 = vmax.f32 %v1713_v52, %v1714_v9  ;;  %v2066_v36 = vmax.f32 %v2064_v10, %v2065_v47  ;;  %v2069_v55 = vmax.f32 %v2067_v17, %v2068_v24  ;;  %v2071_v60 = vsel %vm1940_vm1, %v1687_v30, -inf }
 0x102   : > { %v2073_v59 = vsel %vm1940_vm1, %v7116_v43, -inf  ;;  %v2074_v3 = vsel %vm1940_vm1, %v1694_v6, -inf  ;;  %v2072_v38 = vmax.f32 %v2070_v61, %v2071_v60  ;;  %v2076_v27 = vsel %vm1940_vm1, %v7118_v42, -inf }
 0x103   : > { %v2075_v32 = vmax.f32 %v2073_v59, %v2074_v3  ;;  %v2077_v31 = vsel %vm1940_vm1, %v1701_v12, -inf  ;;  %v2079_v20 = vsel %vm1940_vm1, %v7124_v57, -inf  ;;  %v2080_v5 = vsel %vm1940_vm1, %v1708_v13, -inf }
 0x104   : > { %v2078_v0 = vmax.f32 %v2076_v27, %v2077_v31  ;;  %v2082_v43 = vsel %vm1940_vm1, %v7126_v40, -inf  ;;  %v2081_v7 = vmax.f32 %v2079_v20, %v2080_v5  ;;  %v2083_v19 = vsel %vm1940_vm1, %v1715_v33, -inf }
 0x105   : > { %v2273_v62 = vsel %vm2231_vm4, %v2066_v36, %v2063_v44  ;;  %v779_v42 = vcombine.high %v331_v49, %v331_v49  ;;  %v2084_v4 = vmax.f32 %v2082_v43, %v2083_v19  ;;  %v786_v21 = vrot.slane %v331_v49, %v6516_v8 }
 0x106   : > { %v2274_v54 = vsel %vm2233_vm5, %v2069_v55, %v2273_v62  ;;  %v796_v2 = vcombine.high %v332_v29, %v332_v29  ;;  %v803_v40 = vrot.slane %v332_v29, %v6516_v8  ;;  %v813_v11 = vcombine.high %v333_v45, %v333_v45 }
 0x107   : > { %v2275_v57 = vsel %vm2235_vm6, %v2072_v38, %v2274_v54  ;;  %v793_v26 = vrot.slane %v779_v42, %v6516_v8  ;;  %v794_v15 = vcombine.high %v786_v21, %v786_v21  ;;  %v7177_v22 = vrot.slane %v333_v45, %v6516_v8 }
 0x108   : > { %v2276_v16 = vsel %vm2237_vm7, %v2075_v32, %v2275_v57  ;;  %v810_v58 = vrot.slane %v796_v2, %v6516_v8  ;;  %v811_v35 = vcombine.high %v803_v40, %v803_v40  ;;  %v7181_v53 = vrot.slane %v813_v11, %v6516_v8 }
 0x109   : > { %v2277_v46 = vsel %vm2239_vm8, %v2078_v0, %v2276_v16  ;;  %v795_v51 = vcombine.high %v793_v26, %v793_v26  ;;  %v828_v23 = vcombine.high %v7177_v22, %v7177_v22  ;;  %v830_v34 = vcombine.high %v334_v25, %v334_v25 }
 0x10a   : > { %v2278_v48 = vsel %vm2241_vm9, %v2081_v7, %v2277_v46  ;;  %v812_v14 = vcombine.high %v810_v58, %v810_v58  ;;  %v829_v30 = vcombine.high %v7181_v53, %v7181_v53  ;;  %v7190_v37 = vrot.slane %v334_v25, %v6516_v8 }
 0x10b   : > { %v2279_v63 = vsel %vm2243_vm10, %v2084_v4, %v2278_v48  ;;  %v1716_v18 = vsel %vm1043_vm3, %v786_v21, -inf  ;;  %v7195_v52 = vrot.slane %v830_v34, %v6516_v8  ;;  %v1723_v39 = vsel %vm1043_vm3, %v794_v15, -inf }
 0x10c   : > { %2308 = vst.msk [vmem:[#allocation2 + $0x71] sm:$0xff] %vm1940_vm1, %v2279_v63  ;;  %v1717_v6 = vrot.slane %v1716_v18, 4  ;;  %v1730_v50 = vsel %vm1043_vm3, %v793_v26, -inf  ;;  %v845_v10 = vcombine.high %v7190_v37, %v7190_v37  ;;  %v1724_v56 = vrot.slane %v1723_v39, 4 }
 0x10d   : > { %v1731_v28 = vrot.slane %v1730_v50, 4  ;;  %v1737_v9 = vsel %vm1043_vm3, %v795_v51, -inf  ;;  %v846_v44 = vcombine.high %v7195_v52, %v7195_v52  ;;  %v1744_v24 = vsel %vm1043_vm3, %v803_v40, -inf }
 0x10e   : > { %v1718_v47 = vmax.f32 %v1716_v18, %v1717_v6  ;;  %v1738_v17 = vrot.slane %v1737_v9, 4  ;;  %v1725_v61 = vmax.f32 %v1723_v39, %v1724_v56  ;;  %v1745_v13 = vrot.slane %v1744_v24, 4 }
 0x10f   : > { %v1732_v12 = vmax.f32 %v1730_v50, %v1731_v28  ;;  %v1751_v33 = vsel %vm1043_vm3, %v811_v35, -inf  ;;  %v1758_v59 = vsel %vm1043_vm3, %v810_v58, -inf  ;;  %v1765_v0 = vsel %vm1043_vm3, %v812_v14, -inf }
 0x110   : > { %v1719_v36 = vrot.slane %v1718_v47, 2  ;;  %v1739_v55 = vmax.f32 %v1737_v9, %v1738_v17  ;;  %v1752_v60 = vrot.slane %v1751_v33, 4  ;;  %v1726_v3 = vrot.slane %v1725_v61, 2 }
 0x111   : > { %v1733_v49 = vrot.slane %v1732_v12, 2  ;;  %v1746_v38 = vmax.f32 %v1744_v24, %v1745_v13  ;;  %v1759_v32 = vrot.slane %v1758_v59, 4  ;;  %v1766_v4 = vrot.slane %v1765_v0, 4 }
 0x112   : > { %v1720_v27 = vmax.f32 %v1718_v47, %v1719_v36  ;;  %v1740_v31 = vrot.slane %v1739_v55, 2  ;;  %v1753_v29 = vmax.f32 %v1751_v33, %v1752_v60  ;;  %v1727_v5 = vmax.f32 %v1725_v61, %v1726_v3 }
 0x113   : > { %v7208_v20 = vld [vmem:[#allocation2 + $0x70] sm:$0xff]  ;;  %v1734_v43 = vmax.f32 %v1732_v12, %v1733_v49  ;;  %v1747_v45 = vrot.slane %v1746_v38, 2  ;;  %v1760_v7 = vmax.f32 %v1758_v59, %v1759_v32  ;;  %v1767_v11 = vmax.f32 %v1765_v0, %v1766_v4 }
 0x114   : > { %5895 = vmatmul.mubr.msk.f32.gmra.mrb[6].mxu0 %vm1940_vm1, %v7208_v20  ;;  %v1721_v19 = vrot.slane %v1720_v27, 1  ;;  %v1741_v62 = vmax.f32 %v1739_v55, %v1740_v31  ;;  %v1754_v42 = vrot.slane %v1753_v29, 2  ;;  %v1728_v54 = vrot.slane %v1727_v5, 1 }
 0x115   : > { %v1735_v21 = vrot.slane %v1734_v43, 1  ;;  %v1748_v2 = vmax.f32 %v1746_v38, %v1747_v45  ;;  %v1761_v57 = vrot.slane %v1760_v7, 2  ;;  %v1768_v48 = vrot.slane %v1767_v11, 2 }
 0x116   : > { %v7212_v25 = vmax.f32 %v1720_v27, %v1721_v19  ;;  %v1742_v26 = vrot.slane %v1741_v62, 1  ;;  %v1755_v40 = vmax.f32 %v1753_v29, %v1754_v42  ;;  %v7214_v16 = vmax.f32 %v1727_v5, %v1728_v54 }
 0x117   : > { %v7216_v15 = vmax.f32 %v1734_v43, %v1735_v21  ;;  %v1749_v58 = vrot.slane %v1748_v2, 1  ;;  %v1762_v46 = vmax.f32 %v1760_v7, %v1761_v57  ;;  %v1772_v14 = vsel %vm1043_vm3, %v7177_v22, -inf }
 0x118   : > { %v7218_v51 = vmax.f32 %v1741_v62, %v1742_v26  ;;  %v1756_v35 = vrot.slane %v1755_v40, 1  ;;  %v1773_v18 = vrot.slane %v1772_v14, 4  ;;  %v1779_v6 = vsel %vm1043_vm3, %v828_v23, -inf }
 0x119   : > { %v7222_v34 = vmax.f32 %v1748_v2, %v1749_v58  ;;  %v1763_v63 = vrot.slane %v1762_v46, 1  ;;  %v1769_v50 = vmax.f32 %v1767_v11, %v1768_v48  ;;  %v1780_v56 = vrot.slane %v1779_v6, 4 }
 0x11a   : > { %v7228_v39 = vmax.f32 %v1755_v40, %v1756_v35  ;;  %v1786_v28 = vsel %vm1043_vm3, %v7181_v53, -inf  ;;  %v1774_v47 = vmax.f32 %v1772_v14, %v1773_v18  ;;  %v1793_v24 = vsel %vm1043_vm3, %v829_v30, -inf }
 0x11b   : > { %v7232_v9 = vmax.f32 %v1762_v46, %v1763_v63  ;;  %v1787_v17 = vrot.slane %v1786_v28, 4  ;;  %v1770_v61 = vrot.slane %v1769_v50, 1  ;;  %v1781_v22 = vmax.f32 %v1779_v6, %v1780_v56 }
 0x11c   : > { %v1794_v12 = vrot.slane %v1793_v24, 4  ;;  %v1800_v23 = vsel %vm1043_vm3, %v7190_v37, -inf  ;;  %v1775_v13 = vrot.slane %v1774_v47, 2  ;;  %v1807_v55 = vsel %vm1043_vm3, %v845_v10, -inf }
 0x11d   : > { %v1788_v33 = vmax.f32 %v1786_v28, %v1787_v17  ;;  %v1801_v36 = vrot.slane %v1800_v23, 4  ;;  %v7244_v60 = vmax.f32 %v1769_v50, %v1770_v61  ;;  %v1782_v59 = vrot.slane %v1781_v22, 2 }
 0x11e   : > { %v1795_v53 = vmax.f32 %v1793_v24, %v1794_v12  ;;  %v1808_v3 = vrot.slane %v1807_v55, 4  ;;  %v1776_v30 = vmax.f32 %v1774_v47, %v1775_v13  ;;  %v1814_v32 = vsel %vm1043_vm3, %v7195_v52, -inf }
 0x11f   : > { %v1789_v49 = vrot.slane %v1788_v33, 2  ;;  %v1802_v38 = vmax.f32 %v1800_v23, %v1801_v36  ;;  %v1783_v27 = vmax.f32 %v1781_v22, %v1782_v59  ;;  %v1815_v0 = vrot.slane %v1814_v32, 4  ;;  %v335_v59 = vld [vmem:[%s6514_s12 + $0xe0] sm:$0xff] }
 0x120   : > { %v1796_v31 = vrot.slane %v1795_v53, 2  ;;  %v1809_v29 = vmax.f32 %v1807_v55, %v1808_v3  ;;  %v1777_v5 = vrot.slane %v1776_v30, 1  ;;  %v1821_v10 = vsel %vm1043_vm3, %v846_v44, -inf }
 0x121   : > { %v1790_v43 = vmax.f32 %v1788_v33, %v1789_v49  ;;  %v1803_v37 = vrot.slane %v1802_v38, 2  ;;  %v1784_v45 = vrot.slane %v1783_v27, 1  ;;  %v1816_v62 = vmax.f32 %v1814_v32, %v1815_v0 }
 0x122   : > { %v1797_v7 = vmax.f32 %v1795_v53, %v1796_v31  ;;  %v1810_v19 = vrot.slane %v1809_v29, 2  ;;  %v1778_v42 = vmax.f32 %v1776_v30, %v1777_v5  ;;  %v1822_v21 = vrot.slane %v1821_v10, 4  ;;  %v336_v53 = vld [vmem:[%s6514_s12 + $0xe8] sm:$0xff] }
 0x123   : > { %v1791_v4 = vrot.slane %v1790_v43, 1  ;;  %v1804_v54 = vmax.f32 %v1802_v38, %v1803_v37  ;;  %v1785_v2 = vmax.f32 %v1783_v27, %v1784_v45  ;;  %v1817_v40 = vrot.slane %v1816_v62, 2  ;;  %v337_v38 = vld [vmem:[%s6514_s12 + $0xf0] sm:$0xff] }
 0x124   : > { %v1798_v57 = vrot.slane %v1797_v7, 1  ;;  %v1811_v26 = vmax.f32 %v1809_v29, %v1810_v19  ;;  %v1823_v46 = vmax.f32 %v1821_v10, %v1822_v21  ;;  %v2085_v52 = vsel %vm1940_vm1, %v7212_v25, -inf }
 0x125   : > { %v1792_v11 = vmax.f32 %v1790_v43, %v1791_v4  ;;  %v1805_v58 = vrot.slane %v1804_v54, 1  ;;  %v1818_v48 = vmax.f32 %v1816_v62, %v1817_v40  ;;  %v2086_v14 = vsel %vm1940_vm1, %v1778_v42, -inf }
 0x126   : > { %v1799_v35 = vmax.f32 %v1797_v7, %v1798_v57  ;;  %v1812_v44 = vrot.slane %v1811_v26, 1  ;;  %v1824_v18 = vrot.slane %v1823_v46, 2  ;;  %v2087_v6 = vmax.f32 %v2085_v52, %v2086_v14 }
 0x127   : > { %v1806_v63 = vmax.f32 %v1804_v54, %v1805_v58  ;;  %v2088_v50 = vsel %vm1940_vm1, %v7214_v16, -inf  ;;  %v1819_v28 = vrot.slane %v1818_v48, 1  ;;  %v2089_v47 = vsel %vm1940_vm1, %v1785_v2, -inf }
 0x128   : > { %v1813_v56 = vmax.f32 %v1811_v26, %v1812_v44  ;;  %v2091_v25 = vsel %vm1940_vm1, %v7216_v15, -inf  ;;  %v1825_v17 = vmax.f32 %v1823_v46, %v1824_v18  ;;  %v2090_v24 = vmax.f32 %v2088_v50, %v2089_v47 }
 0x129   : > { %v2092_v61 = vsel %vm1940_vm1, %v1792_v11, -inf  ;;  %v2094_v22 = vsel %vm1940_vm1, %v7218_v51, -inf  ;;  %v1820_v12 = vmax.f32 %v1818_v48, %v1819_v28  ;;  %v2095_v16 = vsel %vm1940_vm1, %v1799_v35, -inf }
 0x12a   : > { %v2093_v23 = vmax.f32 %v2091_v25, %v2092_v61  ;;  %v2097_v13 = vsel %vm1940_vm1, %v7222_v34, -inf  ;;  %v1826_v33 = vrot.slane %v1825_v17, 1  ;;  %v2096_v36 = vmax.f32 %v2094_v22, %v2095_v16 }
 0x12b   : > { %v2098_v55 = vsel %vm1940_vm1, %v1806_v63, -inf  ;;  %v2100_v15 = vsel %vm1940_vm1, %v7228_v39, -inf  ;;  %v2101_v51 = vsel %vm1940_vm1, %v1813_v56, -inf  ;;  %v2103_v30 = vsel %vm1940_vm1, %v7232_v9, -inf  ;;  %v338_v9 = vld [vmem:[%s6514_s12 + $0xf8] sm:$0xff] }
 0x12c   : > { %v2099_v3 = vmax.f32 %v2097_v13, %v2098_v55  ;;  %v2104_v49 = vsel %vm1940_vm1, %v1820_v12, -inf  ;;  %v1827_v34 = vmax.f32 %v1825_v17, %v1826_v33  ;;  %v2102_v32 = vmax.f32 %v2100_v15, %v2101_v51 }
 0x12d   : > { %v2105_v27 = vmax.f32 %v2103_v30, %v2104_v49  ;;  %v2106_v31 = vsel %vm1940_vm1, %v7244_v60, -inf  ;;  %v2280_v39 = vsel %vm2231_vm4, %v2090_v24, %v2087_v6  ;;  %v847_v29 = vcombine.high %v335_v59, %v335_v59 }
 0x12e   : > { %v854_v0 = vrot.slane %v335_v59, %v6516_v8  ;;  %v864_v5 = vcombine.high %v336_v53, %v336_v53  ;;  %v2107_v43 = vsel %vm1940_vm1, %v1827_v34, -inf  ;;  %v2281_v37 = vsel %vm2233_vm5, %v2093_v23, %v2280_v39 }
 0x12f   : > { %v871_v10 = vrot.slane %v336_v53, %v6516_v8  ;;  %v881_v45 = vcombine.high %v337_v38, %v337_v38  ;;  %v2108_v7 = vmax.f32 %v2106_v31, %v2107_v43  ;;  %v2282_v19 = vsel %vm2235_vm6, %v2096_v36, %v2281_v37 }
 0x130   : > { %v861_v62 = vrot.slane %v847_v29, %v6516_v8  ;;  %v862_v60 = vcombine.high %v854_v0, %v854_v0  ;;  %v2283_v42 = vsel %vm2237_vm7, %v2099_v3, %v2282_v19  ;;  %v878_v4 = vrot.slane %v864_v5, %v6516_v8 }
 0x131   : > { %v879_v54 = vcombine.high %v871_v10, %v871_v10  ;;  %v7289_v21 = vrot.slane %v337_v38, %v6516_v8  ;;  %v2284_v2 = vsel %vm2239_vm8, %v2102_v32, %v2283_v42  ;;  %v7293_v26 = vrot.slane %v881_v45, %v6516_v8 }
 0x132   : > { %v863_v57 = vcombine.high %v861_v62, %v861_v62  ;;  %v898_v40 = vcombine.high %v338_v9, %v338_v9  ;;  %v2285_v11 = vsel %vm2241_vm9, %v2105_v27, %v2284_v2  ;;  %v880_v58 = vcombine.high %v878_v4, %v878_v4 }
 0x133   : > { %v896_v46 = vcombine.high %v7289_v21, %v7289_v21  ;;  %v7299_v52 = vrot.slane %v338_v9, %v6516_v8  ;;  %v2286_v35 = vsel %vm2243_vm10, %v2108_v7, %v2285_v11  ;;  %v897_v44 = vcombine.high %v7293_v26, %v7293_v26 }
 0x134   : > { %v7305_v48 = vrot.slane %v898_v40, %v6516_v8  ;;  %v1828_v14 = vsel %vm1043_vm3, %v854_v0, -inf  ;;  %2309 = vst.msk [vmem:[#allocation2 + $0x81] sm:$0xff] %vm1940_vm1, %v2286_v35  ;;  %v1835_v6 = vsel %vm1043_vm3, %v862_v60, -inf  ;;  %v1842_v50 = vsel %vm1043_vm3, %v861_v62, -inf }
 0x135   : > { %v913_v63 = vcombine.high %v7299_v52, %v7299_v52  ;;  %v1829_v18 = vrot.slane %v1828_v14, 4  ;;  %v1836_v28 = vrot.slane %v1835_v6, 4  ;;  %v1843_v47 = vrot.slane %v1842_v50, 4 }
 0x136   : > { %v914_v56 = vcombine.high %v7305_v48, %v7305_v48  ;;  %v1849_v8 = vsel %vm1043_vm3, %v863_v57, -inf  ;;  %v1856_v24 = vsel %vm1043_vm3, %v871_v10, -inf  ;;  %v1863_v61 = vsel %vm1043_vm3, %v879_v54, -inf }
 0x137   : > { %v1830_v25 = vmax.f32 %v1828_v14, %v1829_v18  ;;  %v1850_v17 = vrot.slane %v1849_v8, 4  ;;  %v1837_v22 = vmax.f32 %v1835_v6, %v1836_v28  ;;  %v1844_v12 = vmax.f32 %v1842_v50, %v1843_v47 }
 0x138   : > { %v1857_v23 = vrot.slane %v1856_v24, 4  ;;  %v1864_v16 = vrot.slane %v1863_v61, 4  ;;  %v1870_v36 = vsel %vm1043_vm3, %v878_v4, -inf  ;;  %v1877_v55 = vsel %vm1043_vm3, %v880_v58, -inf }
 0x139   : > { %v1831_v13 = vrot.slane %v1830_v25, 2  ;;  %v1851_v33 = vmax.f32 %v1849_v8, %v1850_v17  ;;  %v1838_v15 = vrot.slane %v1837_v22, 2  ;;  %v1845_v59 = vrot.slane %v1844_v12, 2 }
 0x13a   : > { %v1858_v53 = vmax.f32 %v1856_v24, %v1857_v23  ;;  %v1865_v3 = vmax.f32 %v1863_v61, %v1864_v16  ;;  %v1871_v49 = vrot.slane %v1870_v36, 4  ;;  %v1878_v38 = vrot.slane %v1877_v55, 4 }
 0x13b   : > { %v1832_v51 = vmax.f32 %v1830_v25, %v1831_v13  ;;  %v1852_v30 = vrot.slane %v1851_v33, 2  ;;  %v7320_v34 = vld [vmem:[#allocation2 + $0x80] sm:$0xff]  ;;  %v1839_v32 = vmax.f32 %v1837_v22, %v1838_v15  ;;  %v1846_v27 = vmax.f32 %v1844_v12, %v1845_v59 }
 0x13c   : > { %v1859_v31 = vrot.slane %v1858_v53, 2  ;;  %v1866_v39 = vrot.slane %v1865_v3, 2  ;;  %5897 = vmatprep.mubr.msk.f32.mxu0 %vm1940_vm1, %v7320_v34  ;;  %v1872_v5 = vmax.f32 %v1870_v36, %v1871_v49  ;;  %v1879_v43 = vmax.f32 %v1877_v55, %v1878_v38 }
 0x13d   : > { %v1833_v29 = vrot.slane %v1832_v51, 1  ;;  %v1853_v0 = vmax.f32 %v1851_v33, %v1852_v30  ;;  %v1840_v37 = vrot.slane %v1839_v32, 1  ;;  %v1847_v9 = vrot.slane %v1846_v27, 1 }
 0x13e   : > { %v1860_v10 = vmax.f32 %v1858_v53, %v1859_v31  ;;  %v1867_v45 = vmax.f32 %v1865_v3, %v1866_v39  ;;  %v1873_v62 = vrot.slane %v1872_v5, 2  ;;  %v1880_v60 = vrot.slane %v1879_v43, 2 }
 0x13f   : > { %v7324_v7 = vmax.f32 %v1832_v51, %v1833_v29  ;;  %v1854_v19 = vrot.slane %v1853_v0, 1  ;;  %v7326_v42 = vmax.f32 %v1839_v32, %v1840_v37  ;;  %v7328_v4 = vmax.f32 %v1846_v27, %v1847_v9 }
 0x140   : > { %v1861_v54 = vrot.slane %v1860_v10, 1  ;;  %v1868_v2 = vrot.slane %v1867_v45, 1  ;;  %v1874_v40 = vmax.f32 %v1872_v5, %v1873_v62  ;;  %v1881_v11 = vmax.f32 %v1879_v43, %v1880_v60 }
 0x141   : > { %v7330_v57 = vmax.f32 %v1853_v0, %v1854_v19  ;;  %v1884_v58 = vsel %vm1043_vm3, %v7289_v21, -inf  ;;  %v1891_v6 = vsel %vm1043_vm3, %v896_v46, -inf  ;;  %v1898_v8 = vsel %vm1043_vm3, %v7293_v26, -inf }
 0x142   : > { %v7334_v35 = vmax.f32 %v1860_v10, %v1861_v54  ;;  %v7336_v14 = vmax.f32 %v1867_v45, %v1868_v2  ;;  %v1885_v18 = vrot.slane %v1884_v58, 4  ;;  %v1875_v50 = vrot.slane %v1874_v40, 1 }
 0x143   : > { %v1882_v28 = vrot.slane %v1881_v11, 1  ;;  %v1892_v47 = vrot.slane %v1891_v6, 4  ;;  %v1899_v17 = vrot.slane %v1898_v8, 4  ;;  %v1905_v24 = vsel %vm1043_vm3, %v897_v44, -inf }
 0x144   : > { %v1886_v25 = vmax.f32 %v1884_v58, %v1885_v18  ;;  %v1912_v61 = vsel %vm1043_vm3, %v7299_v52, -inf  ;;  %v7350_v22 = vmax.f32 %v1874_v40, %v1875_v50  ;;  %v1906_v12 = vrot.slane %v1905_v24, 4 }
 0x145   : > { %v7352_v21 = vmax.f32 %v1881_v11, %v1882_v28  ;;  %v1893_v46 = vmax.f32 %v1891_v6, %v1892_v47  ;;  %v1900_v16 = vmax.f32 %v1898_v8, %v1899_v17  ;;  %v1913_v13 = vrot.slane %v1912_v61, 4 }
 0x146   : > { %v1887_v23 = vrot.slane %v1886_v25, 2  ;;  %v1919_v33 = vsel %vm1043_vm3, %v913_v63, -inf  ;;  %v1907_v36 = vmax.f32 %v1905_v24, %v1906_v12  ;;  %v1926_v55 = vsel %vm1043_vm3, %v7305_v48, -inf }
 0x147   : > { %v1894_v26 = vrot.slane %v1893_v46, 2  ;;  %v1920_v44 = vrot.slane %v1919_v33, 4  ;;  %v1901_v59 = vrot.slane %v1900_v16, 2  ;;  %v1914_v53 = vmax.f32 %v1912_v61, %v1913_v13 }
 0x148   : > { %v1888_v15 = vmax.f32 %v1886_v25, %v1887_v23  ;;  %v1927_v3 = vrot.slane %v1926_v55, 4  ;;  %v1908_v30 = vrot.slane %v1907_v36, 2  ;;  %v1933_v52 = vsel %vm1043_vm3, %v914_v56, -inf }
 0x149   : > { %v1895_v51 = vmax.f32 %v1893_v46, %v1894_v26  ;;  %v1921_v49 = vmax.f32 %v1919_v33, %v1920_v44  ;;  %v1902_v63 = vmax.f32 %v1900_v16, %v1901_v59  ;;  %v1915_v32 = vrot.slane %v1914_v53, 2 }
 0x14a   : > { %v1889_v38 = vrot.slane %v1888_v15, 1  ;;  %v1928_v27 = vmax.f32 %v1926_v55, %v1927_v3  ;;  %v1909_v39 = vmax.f32 %v1907_v36, %v1908_v30  ;;  %v1934_v0 = vrot.slane %v1933_v52, 4 }
 0x14b   : > { %v1896_v31 = vrot.slane %v1895_v51, 1  ;;  %v1922_v29 = vrot.slane %v1921_v49, 2  ;;  %v1903_v43 = vrot.slane %v1902_v63, 1  ;;  %v1916_v37 = vmax.f32 %v1914_v53, %v1915_v32  ;;  %v7401_v32 = vld [vmem:[#allocation2 + $0x11] sm:$0xff] }
 0x14c   : > { %v1890_v5 = vmax.f32 %v1888_v15, %v1889_v38  ;;  %v1929_v9 = vrot.slane %v1928_v27, 2  ;;  %v1910_v45 = vrot.slane %v1909_v39, 1  ;;  %v1935_v62 = vmax.f32 %v1933_v52, %v1934_v0  ;;  %v7414_v0 = vld [vmem:[#allocation2 + $0x41] sm:$0xff] }
 0x14d   : > { %v1897_v10 = vmax.f32 %v1895_v51, %v1896_v31  ;;  %v1923_v19 = vmax.f32 %v1921_v49, %v1922_v29  ;;  %v1904_v60 = vmax.f32 %v1902_v63, %v1903_v43  ;;  %v1917_v48 = vrot.slane %v1916_v37, 1  ;;  %v2324_v63 = vld [vmem:[#allocation2 + $0x1] sm:$0xff] }
 0x14e   : > { %v1930_v54 = vmax.f32 %v1928_v27, %v1929_v9  ;;  %v2109_v56 = vsel %vm1940_vm1, %v7324_v7, -inf  ;;  %v1911_v2 = vmax.f32 %v1909_v39, %v1910_v45  ;;  %v1936_v11 = vrot.slane %v1935_v62, 2  ;;  %5868 = vmatprep.mubr.msk.f32.mxu1 %vm1940_vm1, %v2324_v63  ;;  %v7404_v27 = vld [vmem:[#allocation2 + $0x21] sm:$0xff]  ;;  %v7410_v39 = vld [vmem:[#allocation2 + $0x31] sm:$0xff] }
 0x14f   : > { %v1924_v40 = vrot.slane %v1923_v19, 1  ;;  %v2110_v58 = vsel %vm1940_vm1, %v1890_v5, -inf  ;;  %v1918_v18 = vmax.f32 %v1916_v37, %v1917_v48  ;;  %v2112_v28 = vsel %vm1940_vm1, %v7326_v42, -inf  ;;  %v2634_v31 = vld [vmem:[#allocation2 + $0x2] sm:$0xff]  ;;  %v7423_v5 = vld [vmem:[#allocation2 + $0x12] sm:$0xff] }
 0x150   : > { %v1931_v6 = vrot.slane %v1930_v54, 1  ;;  %v2111_v50 = vmax.f32 %v2109_v56, %v2110_v58  ;;  %v1937_v8 = vmax.f32 %v1935_v62, %v1936_v11  ;;  %v2113_v25 = vsel %vm1940_vm1, %v1897_v10, -inf  ;;  %v7425_v43 = vld [vmem:[#allocation2 + $0x22] sm:$0xff]  ;;  %v7427_v37 = vld [vmem:[#allocation2 + $0x51] sm:$0xff] }
 0x151   : > { %v1925_v47 = vmax.f32 %v1923_v19, %v1924_v40  ;;  %v2115_v17 = vsel %vm1940_vm1, %v7328_v4, -inf  ;;  %v2114_v7 = vmax.f32 %v2112_v28, %v2113_v25  ;;  %v2116_v61 = vsel %vm1940_vm1, %v1904_v60, -inf  ;;  %v5498_v9 = vld [vmem:[%s7895_s1 + $0x10] sm:$0xf]  ;;  %v7432_v10 = vld [vmem:[#allocation2 + $0x61] sm:$0xff] }
 0x152   : > { %v1932_v24 = vmax.f32 %v1930_v54, %v1931_v6  ;;  %v2118_v46 = vsel %vm1940_vm1, %v7330_v57, -inf  ;;  %v1938_v12 = vrot.slane %v1937_v8, 1  ;;  %v2117_v23 = vmax.f32 %v2115_v17, %v2116_v61  ;;  %v7444_v45 = vld [vmem:[#allocation2 + $0x32] sm:$0xff]  ;;  %v7446_v19 = vld [vmem:[#allocation2 + $0x42] sm:$0xff] }
 0x153   : > { %v2119_v16 = vsel %vm1940_vm1, %v1911_v2, -inf  ;;  %v2121_v42 = vsel %vm1940_vm1, %v7334_v35, -inf  ;;  %v2122_v33 = vsel %vm1940_vm1, %v1918_v18, -inf  ;;  %v2124_v4 = vsel %vm1940_vm1, %v7336_v14, -inf  ;;  %v7449_v62 = vld [vmem:[#allocation2 + $0x71] sm:$0xff]  ;;  %v7451_v60 = vld [vmem:[#allocation2 + $0x81] sm:$0xff] }
 0x154   : > { %v2120_v13 = vmax.f32 %v2118_v46, %v2119_v16  ;;  %v2125_v26 = vsel %vm1940_vm1, %v1925_v47, -inf  ;;  %v1939_v36 = vmax.f32 %v1937_v8, %v1938_v12  ;;  %v2123_v44 = vmax.f32 %v2121_v42, %v2122_v33  ;;  %v7463_v48 = vld [vmem:[#allocation2 + $0x62] sm:$0xff]  ;;  %v7476_v2 = vld [vmem:[#allocation2 + $0x72] sm:$0xff] }
 0x155   : > { %v2127_v57 = vsel %vm1940_vm1, %v7350_v22, -inf  ;;  %v2126_v55 = vmax.f32 %v2124_v4, %v2125_v26  ;;  %v2128_v15 = vsel %vm1940_vm1, %v1932_v24, -inf  ;;  %v2130_v59 = vsel %vm1940_vm1, %v7352_v21, -inf  ;;  %v5431_v21 = vld [vmem:[%s7895_s1 + $0x4] sm:$0xf]  ;;  %v5600_v56 = vld [vmem:[%s7898_s4 + $0x8] sm:$0xff] }
 0x156   : > { %v2287_v35 = vsel %vm2231_vm4, %v2114_v7, %v2111_v50  ;;  %v2129_v53 = vmax.f32 %v2127_v57, %v2128_v15  ;;  %v2131_v3 = vsel %vm1940_vm1, %v1939_v36, -inf  ;;  %5866 = vmatprep.subr.msk.mxu1 %vm2367_vm0, %v5431_v21  ;;  %v7478_v40 = vld [vmem:[#allocation2 + $0x82] sm:$0xff]  ;;  %v5466_v58 = vld [vmem:[#allocation2 + $0x10] sm:$0xff]  ;;  %v5542_v17 = vld [vmem:[%s7895_s1 + $0x18] sm:$0xf] }
 0x157   : > { %v2288_v14 = vsel %vm2233_vm5, %v2117_v23, %v2287_v35  ;;  %v2132_v51 = vmax.f32 %v2130_v59, %v2131_v3  ;;  %5867 = vmatpush3.msk.msra.mxu1 %vm2367_vm0, %v5431_v21  ;;  %v5467_v18 = vld [vmem:[#allocation2 + $0x20] sm:$0xff]  ;;  %v5468_v6 = vld [vmem:[#allocation2 + $0x30] sm:$0xff]  ;;  %v5564_v7 = vld [vmem:[%s7895_s1 + $0x1c] sm:$0xf] }
 0x158   : > { %v2289_v30 = vsel %vm2235_vm6, %v2120_v13, %v2288_v14  ;;  %5869 = vmatmul.mubr.msk.f32.vlgmr.msra.gmra.mrb[0].mxu1 %vm1940_vm1, %v7401_v32  ;;  %6019 = vmatprep.subr.mxu1 %v5600_v56  ;;  %v5520_v50 = vld [vmem:[%s7895_s1 + $0x14] sm:$0xf]  ;;  %v5469_v28 = vld [vmem:[#allocation2 + $0x40] sm:$0xff] }
 0x159   : > { %v2290_v49 = vsel %vm2237_vm7, %v2123_v44, %v2289_v30  ;;  %5871 = vmatprep.mubr.msk.f32.mxu1 %vm1940_vm1, %v7404_v27  ;;  %6020 = vmatpush3.msra.mxu1 %v5600_v56  ;;  %v5470_v47 = vld [vmem:[#allocation2 + $0x50] sm:$0xff]  ;;  %v5471_v8 = vld [vmem:[#allocation2 + $0x60] sm:$0xff] }
 0x15a   : > { %v2291_v22 = vsel %vm2239_vm8, %v2126_v55, %v2290_v49  ;;  %v5475_v25 = vld [vmem:[#allocation2 + $0xa0] sm:$0xff]  ;;  %v5541_v12 = vld [vmem:[#allocation2 + $0xb0] sm:$0xff] }
 0x15b   : > { %v2292_v52 = vsel %vm2241_vm9, %v2129_v53, %v2291_v22  ;;  %v5497_v24 = vld [vmem:[#allocation2 + $0xa1] sm:$0xff]  ;;  %v5598_v35 = vld [vmem:[%s7896_s2] ss:$0 sm:$0xff] }
 0x15c   : > { %v2293_v38 = vsel %vm2243_vm10, %v2132_v51, %v2292_v52  ;;  %5872 = vmatmul.mubr.msk.f32.gmra.mrb[2].mxu1 %vm1940_vm1, %v7410_v39  ;;  %v5519_v61 = vld [vmem:[#allocation2 + $0xa2] sm:$0xff] }
 0x15d   : > { %2310 = vst.msk [vmem:[#allocation2 + $0x91] sm:$0xff] %vm1940_vm1, %v2293_v38  ;;  %5874 = vmatprep.mubr.msk.f32.mxu1 %vm1940_vm1, %v7414_v0  ;;  %v5586_v46 = vld [vmem:[%s7895_s1 + $0x20] sm:$0xf] }
 0x15e   : > { %v3986_v57 = vld [vmem:[#allocation3 + $0x1] sm:$0xff] }
 0x15f   : > { %v3985_v15 = vld [vmem:[%s7898_s4] sm:$0xff] }
 0x160   : > { %5875 = vmatmul.mubr.msk.f32.gmra.mrb[4].mxu1 %vm1940_vm1, %v7427_v37  ;;  %6033 = vmatprep.subr.mxu1 %v3985_v15 }
 0x161   : > { %5877 = vmatprep.mubr.msk.f32.mxu1 %vm1940_vm1, %v7432_v10 }
 0x164   : > { %v7412_v29 = vld [vmem:[#allocation2 + $0x90] sm:$0xff]  ;;  %5878 = vmatmul.mubr.msk.f32.gmra.mrb[6].mxu1 %vm1940_vm1, %v7449_v62 }
 0x165   : > { %5898 = vmatmul.mubr.msk.f32.gmra.mrb[8].mxu0 %vm1940_vm1, %v7412_v29  ;;  %5880 = vmatprep.mubr.msk.f32.mxu1 %vm1940_vm1, %v7451_v60  ;;  %v7465_v54 = vld [vmem:[#allocation2 + $0x91] sm:$0xff] }
 0x166   : > { %5902 = vmatprep.mubr.msk.f32.mxu0 %vm1940_vm1, %v2634_v31  ;;  %v7484_v11 = vld [vmem:[#allocation2 + $0x92] sm:$0xff] }
 0x168   : > { %5881 = vmatmul.mubr.msk.f32.gmra.mrb[8].mxu1 %vm1940_vm1, %v7465_v54 }
 0x169   : > { %5903 = vmatmul.mubr.msk.f32.vlgmr.msra.gmra.mrb[0].mxu0 %vm1940_vm1, %v7423_v5  ;;  %6021 = vmatprep.mubr.msk.f32.mxu1 %vm3966_vm11, %v3986_v57 }
 0x16a   : > { %5918 = vmatpush3.msk.msra.mxu0 %vm2367_vm0, %v7093_v41  ;;  %5905 = vmatprep.mubr.msk.f32.mxu0 %vm1940_vm1, %v7425_v43  ;;  %v7461_v41 = vld [vmem:[#allocation2 + $0x52] sm:$0xff] }
 0x16b   : > { %5934 = vmatprep.subr.msk.mxu0 %vm2367_vm0, %v5498_v9 }
 0x16d   : > { %5906 = vmatmul.mubr.msk.f32.gmra.mrb[2].mxu0 %vm1940_vm1, %v7444_v45 }
 0x16e   : > { %5908 = vmatprep.mubr.msk.f32.mxu0 %vm1940_vm1, %v7446_v19 }
 0x171   : > { %5909 = vmatmul.mubr.msk.f32.gmra.mrb[4].mxu0 %vm1940_vm1, %v7461_v41 }
 0x172   : > { %5911 = vmatprep.mubr.msk.f32.mxu0 %vm1940_vm1, %v7463_v48 }
 0x175   : > { %5912 = vmatmul.mubr.msk.f32.gmra.mrb[6].mxu0 %vm1940_vm1, %v7476_v2 }
 0x176   : > { %5914 = vmatprep.mubr.msk.f32.mxu0 %vm1940_vm1, %v7478_v40 }
 0x179   : > { %5915 = vmatmul.mubr.msk.f32.gmra.mrb[8].mxu0 %vm1940_vm1, %v7484_v11 }
 0x17a   : > { %5919 = vmatprep.mubr.msk.f32.mxu0 %vm1940_vm1, %v5466_v58  ;;  %v5617_v58 = vld [vmem:[%s7898_s4 + $0x10] sm:$0xff] }
 0x17d   : > { %5920 = vmatmul.mubr.msk.f32.vlgmr.msra.gmra.mrb[0].mxu0 %vm1940_vm1, %v5467_v18 }
 0x17e   : > { %5935 = vmatpush3.msk.msra.mxu0 %vm2367_vm0, %v5498_v9  ;;  %5922 = vmatprep.mubr.msk.f32.mxu0 %vm1940_vm1, %v5468_v6 }
 0x17f   : > { %5951 = vmatprep.subr.msk.mxu0 %vm2367_vm0, %v5520_v50 }
 0x181   : > { %5923 = vmatmul.mubr.msk.f32.gmra.mrb[2].mxu0 %vm1940_vm1, %v5469_v28 }
 0x182   : > { %5925 = vmatprep.mubr.msk.f32.mxu0 %vm1940_vm1, %v5470_v47 }
 0x185   : > { %5926 = vmatmul.mubr.msk.f32.gmra.mrb[4].mxu0 %vm1940_vm1, %v5471_v8 }
 0x186   : > { %5928 = vmatprep.mubr.msk.f32.mxu0 %vm1940_vm1, %v7208_v20 }
 0x189   : > { %5929 = vmatmul.mubr.msk.f32.gmra.mrb[6].mxu0 %vm1940_vm1, %v7320_v34 }
 0x18a   : > { %5931 = vmatprep.mubr.msk.f32.mxu0 %vm1940_vm1, %v7412_v29 }
 0x18d   : > { %5932 = vmatmul.mubr.msk.f32.gmra.mrb[8].mxu0 %vm1940_vm1, %v5475_v25 }
 0x18e   : > { %5936 = vmatprep.mubr.msk.f32.mxu0 %vm1940_vm1, %v7401_v32 }
 0x191   : > { %5937 = vmatmul.mubr.msk.f32.vlgmr.msra.gmra.mrb[0].mxu0 %vm1940_vm1, %v7404_v27 }
 0x192   : > { %5952 = vmatpush3.msk.msra.mxu0 %vm2367_vm0, %v5520_v50  ;;  %5939 = vmatprep.mubr.msk.f32.mxu0 %vm1940_vm1, %v7410_v39 }
 0x193   : > { %5968 = vmatprep.subr.msk.mxu0 %vm2367_vm0, %v5542_v17 }
 0x195   : > { %5940 = vmatmul.mubr.msk.f32.gmra.mrb[2].mxu0 %vm1940_vm1, %v7414_v0 }
 0x196   : > { %5942 = vmatprep.mubr.msk.f32.mxu0 %vm1940_vm1, %v7427_v37 }
 0x199   : > { %5943 = vmatmul.mubr.msk.f32.gmra.mrb[4].mxu0 %vm1940_vm1, %v7432_v10 }
 0x19a   : > { %5945 = vmatprep.mubr.msk.f32.mxu0 %vm1940_vm1, %v7449_v62 }
 0x19d   : > { %5946 = vmatmul.mubr.msk.f32.gmra.mrb[6].mxu0 %vm1940_vm1, %v7451_v60 }
 0x19e   : > { %5948 = vmatprep.mubr.msk.f32.mxu0 %vm1940_vm1, %v7465_v54 }
 0x1a1   : > { %5949 = vmatmul.mubr.msk.f32.gmra.mrb[8].mxu0 %vm1940_vm1, %v5497_v24 }
 0x1a2   : > { %5953 = vmatprep.mubr.msk.f32.mxu0 %vm1940_vm1, %v7423_v5 }
 0x1a5   : > { %5954 = vmatmul.mubr.msk.f32.vlgmr.msra.gmra.mrb[0].mxu0 %vm1940_vm1, %v7425_v43 }
 0x1a6   : > { %5969 = vmatpush3.msk.msra.mxu0 %vm2367_vm0, %v5542_v17  ;;  %5956 = vmatprep.mubr.msk.f32.mxu0 %vm1940_vm1, %v7444_v45 }
 0x1a7   : > { %5985 = vmatprep.subr.msk.mxu0 %vm2367_vm0, %v5564_v7 }
 0x1a9   : > { %5957 = vmatmul.mubr.msk.f32.gmra.mrb[2].mxu0 %vm1940_vm1, %v7446_v19 }
 0x1aa   : > { %5959 = vmatprep.mubr.msk.f32.mxu0 %vm1940_vm1, %v7461_v41 }
 0x1ad   : > { %5960 = vmatmul.mubr.msk.f32.gmra.mrb[4].mxu0 %vm1940_vm1, %v7463_v48 }
 0x1ae   : > { %5962 = vmatprep.mubr.msk.f32.mxu0 %vm1940_vm1, %v7476_v2 }
 0x1b1   : > { %5963 = vmatmul.mubr.msk.f32.gmra.mrb[6].mxu0 %vm1940_vm1, %v7478_v40 }
 0x1b2   : > { %5965 = vmatprep.mubr.msk.f32.mxu0 %vm1940_vm1, %v7484_v11 }
 0x1b5   : > { %5966 = vmatmul.mubr.msk.f32.gmra.mrb[8].mxu0 %vm1940_vm1, %v5519_v61 }
 0x1b6   : > { %5970 = vmatprep.mubr.msk.f32.mxu0 %vm1940_vm1, %v5467_v18 }
 0x1b9   : > { %5971 = vmatmul.mubr.msk.f32.vlgmr.msra.gmra.mrb[0].mxu0 %vm1940_vm1, %v5468_v6 }
 0x1ba   : > { %5986 = vmatpush3.msk.msra.mxu0 %vm2367_vm0, %v5564_v7  ;;  %5973 = vmatprep.mubr.msk.f32.mxu0 %vm1940_vm1, %v5469_v28 }
 0x1bb   : > { %6002 = vmatprep.subr.msk.mxu0 %vm2367_vm0, %v5586_v46 }
 0x1bd   : > { %5974 = vmatmul.mubr.msk.f32.gmra.mrb[2].mxu0 %vm1940_vm1, %v5470_v47 }
 0x1be   : > { %5976 = vmatprep.mubr.msk.f32.mxu0 %vm1940_vm1, %v5471_v8 }
 0x1c1   : > { %5977 = vmatmul.mubr.msk.f32.gmra.mrb[4].mxu0 %vm1940_vm1, %v7208_v20  ;;  %v5563_v20 = vld [vmem:[#allocation2 + $0xb1] sm:$0xff] }
 0x1c2   : > { %5979 = vmatprep.mubr.msk.f32.mxu0 %vm1940_vm1, %v7320_v34  ;;  %v5585_v34 = vld [vmem:[#allocation2 + $0xb2] sm:$0xff] }
 0x1c5   : > { %5980 = vmatmul.mubr.msk.f32.gmra.mrb[6].mxu0 %vm1940_vm1, %v7412_v29 }
 0x1c6   : > { %5982 = vmatprep.mubr.msk.f32.mxu0 %vm1940_vm1, %v5475_v25 }
 0x1c9   : > { %5983 = vmatmul.mubr.msk.f32.gmra.mrb[8].mxu0 %vm1940_vm1, %v5541_v12 }
 0x1ca   : > { %5987 = vmatprep.mubr.msk.f32.mxu0 %vm1940_vm1, %v7404_v27 }
 0x1cd   : > { %5988 = vmatmul.mubr.msk.f32.vlgmr.msra.gmra.mrb[0].mxu0 %vm1940_vm1, %v7410_v39 }
 0x1ce   : > { %6003 = vmatpush3.msk.msra.mxu0 %vm2367_vm0, %v5586_v46  ;;  %5990 = vmatprep.mubr.msk.f32.mxu0 %vm1940_vm1, %v7414_v0 }
 0x1d1   : > { %5991 = vmatmul.mubr.msk.f32.gmra.mrb[2].mxu0 %vm1940_vm1, %v7427_v37 }
 0x1d2   : > { %5993 = vmatprep.mubr.msk.f32.mxu0 %vm1940_vm1, %v7432_v10 }
 0x1d5   : > { %5994 = vmatmul.mubr.msk.f32.gmra.mrb[4].mxu0 %vm1940_vm1, %v7449_v62 }
 0x1d6   : > { %5996 = vmatprep.mubr.msk.f32.mxu0 %vm1940_vm1, %v7451_v60 }
 0x1d9   : > { %5997 = vmatmul.mubr.msk.f32.gmra.mrb[6].mxu0 %vm1940_vm1, %v7465_v54 }
 0x1da   : > { %5999 = vmatprep.mubr.msk.f32.mxu0 %vm1940_vm1, %v5497_v24 }
 0x1dd   : > { %6000 = vmatmul.mubr.msk.f32.gmra.mrb[8].mxu0 %vm1940_vm1, %v5563_v20 }
 0x1de   : > { %6004 = vmatprep.mubr.msk.f32.mxu0 %vm1940_vm1, %v7425_v43 }
 0x1e1   : > { %6005 = vmatmul.mubr.msk.f32.vlgmr.msra.gmra.mrb[0].mxu0 %vm1940_vm1, %v7444_v45 }
 0x1e2   : > { %6007 = vmatprep.mubr.msk.f32.mxu0 %vm1940_vm1, %v7446_v19 }
 0x1e5   : > { %6008 = vmatmul.mubr.msk.f32.gmra.mrb[2].mxu0 %vm1940_vm1, %v7461_v41 }
 0x1e6   : > { %6010 = vmatprep.mubr.msk.f32.mxu0 %vm1940_vm1, %v7463_v48 }
 0x1e9   : > { %6011 = vmatmul.mubr.msk.f32.gmra.mrb[4].mxu0 %vm1940_vm1, %v7476_v2 }
 0x1ea   : > { %6013 = vmatprep.mubr.msk.f32.mxu0 %vm1940_vm1, %v7478_v40 }
 0x1ed   : > { %6014 = vmatmul.mubr.msk.f32.gmra.mrb[6].mxu0 %vm1940_vm1, %v7484_v11 }
 0x1ee   : > { %6016 = vmatprep.mubr.msk.f32.mxu0 %vm1940_vm1, %v5519_v61 }
 0x1f1   : > { %6017 = vmatmul.mubr.msk.f32.gmra.mrb[8].mxu0 %vm1940_vm1, %v5585_v34  ;;  %v3977_v34 = vld [vmem:[#allocation3] sm:$0xff] }
 0x22b   : > { %v5870_v23 = vpop.f32.mrb[0].mxu1 }
 0x22c   : > { %v2437_v16 = vpop.f32.mrb[1].mxu1 }
 0x22f   : > { %v5873_v42 = vpop.f32.mrb[2].mxu1 }
 0x230   : > { %v2447_v13 = vpop.f32.mrb[3].mxu1 }
 0x233   : > { %v5876_v33 = vpop.f32.mrb[4].mxu1 }
 0x234   : > { %v2457_v4 = vpop.f32.mrb[5].mxu1 }
 0x237   : > { %v5879_v26 = vpop.f32.mrb[6].mxu1 }
 0x238   : > { %v2467_v36 = vpop.f32.mrb[7].mxu1 }
 0x23b   : > { %v5882_v44 = vpop.f32.mrb[8].mxu1 }
 0x23c   : > { %v2477_v55 = vpop.f32.mrb[9].mxu1  ;;  %v4254_v44 = vld [vmem:[#allocation3 + $0x2] sm:$0xff] }
 0x2b4   : > { %v6006_v59 = vpop.f32.mrb[0].mxu0 }
 0x2b5   : > { %v6145_v53 = vadd.f32 %v6006_v59, %v5870_v23  ;;  %v3771_v3 = vpop.f32.mrb[1].mxu0 }
 0x2b7   : > { %v3838_v14 = vmul.f32 %v6145_v53, %v5598_v35 }
 0x2b8   : > { %v6009_v51 = vpop.f32.mrb[2].mxu0 }
 0x2b9   : > { %v3855_v30 = vadd.f32 %v5599_v1, %v3838_v14  ;;  %v6146_v49 = vadd.f32 %v6009_v51, %v5873_v42  ;;  %v3781_v22 = vpop.f32.mrb[3].mxu0  ;;  %v5626_v42 = vld [vmem:[%s7898_s4 + $0x18] sm:$0xff]  ;;  %v5644_v51 = vld [vmem:[%s7898_s4 + $0x28] sm:$0xff] }
 0x2ba   : > { %v6147_v52 = vadd.f32 %v3781_v22, %v2447_v13 }
 0x2bb   : > { %v3865_v38 = vmax.f32 %v3855_v30, 0.0  ;;  %v3840_v21 = vmul.f32 %v6146_v49, %v5598_v35  ;;  %v5653_v49 = vld [vmem:[%s7898_s4 + $0x30] sm:$0xff] }
 0x2bc   : > { %v3839_v63 = vmul.f32 %v6147_v52, %v5598_v35  ;;  %v6012_v32 = vpop.f32.mrb[4].mxu0  ;;  %v5662_v52 = vld [vmem:[%s7898_s4 + $0x38] sm:$0xff] }
 0x2bd   : > { %3968 = vst.msk [vmem:[#allocation3 + $0x11] sm:$0xff] %vm3966_vm11, %v3865_v38  ;;  %v3857_v27 = vadd.f32 %v5599_v1, %v3840_v21  ;;  %v6148_v31 = vadd.f32 %v6012_v32, %v5876_v33  ;;  %v3791_v39 = vpop.f32.mrb[5].mxu0  ;;  %v5671_v21 = vld [vmem:[%s7898_s4 + $0x40] sm:$0xff]  ;;  %v4998_v32 = vld [vmem:[#allocation3 + $0x91] sm:$0xff] }
 0x2be   : > { %v3856_v29 = vadd.f32 %v5599_v1, %v3839_v63  ;;  %v6149_v0 = vadd.f32 %v3791_v39, %v2457_v4  ;;  %v4851_v63 = vld [vmem:[#allocation3 + $0x90] sm:$0xff] }
 0x2bf   : > { %v3867_v5 = vmax.f32 %v3857_v27, 0.0  ;;  %v3842_v43 = vmul.f32 %v6148_v31, %v5598_v35  ;;  %v5145_v27 = vld [vmem:[#allocation3 + $0x92] sm:$0xff]  ;;  %v5680_v31 = vld [vmem:[%s7899_s5] ss:$0 sm:$0xff] }
 0x2c0   : > { %v3866_v37 = vmax.f32 %v3856_v29, 0.0  ;;  %v3841_v9 = vmul.f32 %v6149_v0, %v5598_v35  ;;  %v6015_v10 = vpop.f32.mrb[6].mxu0  ;;  %v5681_v29 = vld [vmem:[%s7900_s6] ss:$0 sm:$0xff] }
 0x2c1   : > { %3970 = vst.msk [vmem:[#allocation3 + $0x31] sm:$0xff] %vm3966_vm11, %v3867_v5  ;;  %v3859_v45 = vadd.f32 %v5599_v1, %v3842_v43  ;;  %v6150_v19 = vadd.f32 %v6015_v10, %v5879_v26  ;;  %v3801_v62 = vpop.f32.mrb[7].mxu0 }
 0x2c2   : > { %3969 = vst.msk [vmem:[#allocation3 + $0x21] sm:$0xff] %vm3966_vm11, %v3866_v37  ;;  %v3858_v60 = vadd.f32 %v5599_v1, %v3841_v9  ;;  %v6151_v41 = vadd.f32 %v3801_v62, %v2467_v36 }
 0x2c3   : > { %v3869_v48 = vmax.f32 %v3859_v45, 0.0  ;;  %v3844_v54 = vmul.f32 %v6150_v19, %v5598_v35 }
 0x2c4   : > { %v3868_v56 = vmax.f32 %v3858_v60, 0.0  ;;  %v3843_v2 = vmul.f32 %v6151_v41, %v5598_v35  ;;  %v6018_v40 = vpop.f32.mrb[8].mxu0  ;;  %v7666_v11 = vld [vmem:[#allocation3 + $0x11] sm:$0xff] }
 0x2c5   : > { %3972 = vst.msk [vmem:[#allocation3 + $0x51] sm:$0xff] %vm3966_vm11, %v3869_v48  ;;  %v3861_v18 = vadd.f32 %v5599_v1, %v3844_v54  ;;  %v3811_v6 = vpop.f32.mrb[9].mxu0  ;;  %6022 = vmatmul.mubr.msk.f32.vlgmr.msra.gmra.mrb[10].mxu1 %vm3966_vm11, %v7666_v11  ;;  %v3978_v16 = vld [vmem:[#allocation3 + $0x10] sm:$0xff] }
 0x2c6   : > { %3971 = vst.msk [vmem:[#allocation3 + $0x41] sm:$0xff] %vm3966_vm11, %v3868_v56  ;;  %v3860_v50 = vadd.f32 %v5599_v1, %v3843_v2  ;;  %v6152_v28 = vadd.f32 %v3811_v6, %v2477_v55  ;;  %6034 = vmatpush3.msra.mxu1 %v3985_v15  ;;  %v4255_v55 = vld [vmem:[#allocation3 + $0x12] sm:$0xff]  ;;  %v5635_v15 = vld [vmem:[%s7898_s4 + $0x20] sm:$0xff] }
 0x2c7   : > { %v3871_v47 = vmax.f32 %v3861_v18, 0.0  ;;  %6047 = vmatprep.subr.mxu1 %v5617_v58 }
 0x2c8   : > { %v3870_v8 = vmax.f32 %v3860_v50, 0.0  ;;  %v3845_v25 = vmul.f32 %v6152_v28, %v5598_v35  ;;  %v7681_v7 = vld [vmem:[#allocation3 + $0x31] sm:$0xff] }
 0x2c9   : > { %3974 = vst.msk [vmem:[#allocation3 + $0x71] sm:$0xff] %vm3966_vm11, %v3871_v47  ;;  %v7676_v17 = vld [vmem:[#allocation3 + $0x21] sm:$0xff]  ;;  %v7711_v33 = vld [vmem:[#allocation3 + $0x30] sm:$0xff] }
 0x2ca   : > { %3973 = vst.msk [vmem:[#allocation3 + $0x61] sm:$0xff] %vm3966_vm11, %v3870_v8  ;;  %v3862_v24 = vadd.f32 %v5599_v1, %v3845_v25  ;;  %6024 = vmatprep.mubr.msk.f32.mxu1 %vm3966_vm11, %v7676_v17  ;;  %v7707_v13 = vld [vmem:[#allocation3 + $0x20] sm:$0xff]  ;;  %v7740_v35 = vld [vmem:[#allocation3 + $0x32] sm:$0xff] }
 0x2cb   : > { %6025 = vmatmul.mubr.msk.f32.gmra.mrb[12].mxu1 %vm3966_vm11, %v7681_v7  ;;  %v7736_v59 = vld [vmem:[#allocation3 + $0x22] sm:$0xff] }
 0x2cc   : > { %v3872_v61 = vmax.f32 %v3862_v24, 0.0  ;;  %v7690_v12 = vld [vmem:[#allocation3 + $0x51] sm:$0xff] }
 0x2cd   : > { %v7685_v46 = vld [vmem:[#allocation3 + $0x41] sm:$0xff]  ;;  %v7719_v26 = vld [vmem:[#allocation3 + $0x50] sm:$0xff] }
 0x2ce   : > { %3975 = vst.msk [vmem:[#allocation3 + $0x81] sm:$0xff] %vm3966_vm11, %v3872_v61  ;;  %6027 = vmatprep.mubr.msk.f32.mxu1 %vm3966_vm11, %v7685_v46  ;;  %v7715_v4 = vld [vmem:[#allocation3 + $0x40] sm:$0xff]  ;;  %v7748_v3 = vld [vmem:[#allocation3 + $0x52] sm:$0xff] }
 0x2cf   : > { %6028 = vmatmul.mubr.msk.f32.gmra.mrb[14].mxu1 %vm3966_vm11, %v7690_v12  ;;  %v7744_v53 = vld [vmem:[#allocation3 + $0x42] sm:$0xff] }
 0x2d0   : > { %v7698_v23 = vld [vmem:[#allocation3 + $0x71] sm:$0xff] }
 0x2d1   : > { %v7694_v20 = vld [vmem:[#allocation3 + $0x61] sm:$0xff]  ;;  %v7727_v57 = vld [vmem:[#allocation3 + $0x70] sm:$0xff] }
 0x2d2   : > { %6030 = vmatprep.mubr.msk.f32.mxu1 %vm3966_vm11, %v7694_v20  ;;  %v7723_v36 = vld [vmem:[#allocation3 + $0x60] sm:$0xff]  ;;  %v7756_v14 = vld [vmem:[#allocation3 + $0x72] sm:$0xff] }
 0x2d3   : > { %6031 = vmatmul.mubr.msk.f32.gmra.mrb[16].mxu1 %vm3966_vm11, %v7698_v23  ;;  %v7752_v1 = vld [vmem:[#allocation3 + $0x62] sm:$0xff] }
 0x2d4   : > { %6035 = vmatprep.mubr.msk.f32.mxu1 %vm3966_vm11, %v3977_v34 }
 0x2d5   : > { %v4409_v30 = vld [vmem:[#allocation3 + $0x80] sm:$0xff] }
 0x2d6   : > { %v4556_v22 = vld [vmem:[#allocation3 + $0x81] sm:$0xff] }
 0x2d7   : > { %6036 = vmatmul.mubr.msk.f32.vlgmr.msra.gmra.mrb[10].mxu1 %vm3966_vm11, %v3978_v16  ;;  %v4703_v38 = vld [vmem:[#allocation3 + $0x82] sm:$0xff] }
 0x2d8   : > { %6048 = vmatpush3.msra.mxu1 %v5617_v58  ;;  %6038 = vmatprep.mubr.msk.f32.mxu1 %vm3966_vm11, %v7707_v13 }
 0x2d9   : > { %6061 = vmatprep.subr.mxu1 %v5626_v42 }
 0x2db   : > { %6039 = vmatmul.mubr.msk.f32.gmra.mrb[12].mxu1 %vm3966_vm11, %v7711_v33 }
 0x2dc   : > { %6041 = vmatprep.mubr.msk.f32.mxu1 %vm3966_vm11, %v7715_v4 }
 0x2df   : > { %6042 = vmatmul.mubr.msk.f32.gmra.mrb[14].mxu1 %vm3966_vm11, %v7719_v26 }
 0x2e0   : > { %6044 = vmatprep.mubr.msk.f32.mxu1 %vm3966_vm11, %v7723_v36 }
 0x2e3   : > { %6045 = vmatmul.mubr.msk.f32.gmra.mrb[16].mxu1 %vm3966_vm11, %v7727_v57 }
 0x2e4   : > { %6049 = vmatprep.mubr.msk.f32.mxu1 %vm3966_vm11, %v4254_v44 }
 0x2e7   : > { %6050 = vmatmul.mubr.msk.f32.vlgmr.msra.gmra.mrb[10].mxu1 %vm3966_vm11, %v4255_v55 }
 0x2e8   : > { %6062 = vmatpush3.msra.mxu1 %v5626_v42  ;;  %6052 = vmatprep.mubr.msk.f32.mxu1 %vm3966_vm11, %v7736_v59 }
 0x2e9   : > { %6075 = vmatprep.subr.mxu1 %v5635_v15 }
 0x2eb   : > { %6053 = vmatmul.mubr.msk.f32.gmra.mrb[12].mxu1 %vm3966_vm11, %v7740_v35 }
 0x2ec   : > { %6055 = vmatprep.mubr.msk.f32.mxu1 %vm3966_vm11, %v7744_v53 }
 0x2ef   : > { %6056 = vmatmul.mubr.msk.f32.gmra.mrb[14].mxu1 %vm3966_vm11, %v7748_v3 }
 0x2f0   : > { %6058 = vmatprep.mubr.msk.f32.mxu1 %vm3966_vm11, %v7752_v1 }
 0x2f3   : > { %6059 = vmatmul.mubr.msk.f32.gmra.mrb[16].mxu1 %vm3966_vm11, %v7756_v14 }
 0x2f4   : > { %6063 = vmatprep.mubr.msk.f32.mxu1 %vm3966_vm11, %v3978_v16 }
 0x2f7   : > { %6064 = vmatmul.mubr.msk.f32.vlgmr.msra.gmra.mrb[10].mxu1 %vm3966_vm11, %v7707_v13 }
 0x2f8   : > { %6076 = vmatpush3.msra.mxu1 %v5635_v15  ;;  %6066 = vmatprep.mubr.msk.f32.mxu1 %vm3966_vm11, %v7711_v33 }
 0x2f9   : > { %6089 = vmatprep.subr.mxu1 %v5644_v51 }
 0x2fb   : > { %6067 = vmatmul.mubr.msk.f32.gmra.mrb[12].mxu1 %vm3966_vm11, %v7715_v4 }
 0x2fc   : > { %6069 = vmatprep.mubr.msk.f32.mxu1 %vm3966_vm11, %v7719_v26 }
 0x2ff   : > { %6070 = vmatmul.mubr.msk.f32.gmra.mrb[14].mxu1 %vm3966_vm11, %v7723_v36 }
 0x300   : > { %6072 = vmatprep.mubr.msk.f32.mxu1 %vm3966_vm11, %v7727_v57 }
 0x303   : > { %6073 = vmatmul.mubr.msk.f32.gmra.mrb[16].mxu1 %vm3966_vm11, %v4409_v30 }
 0x304   : > { %6077 = vmatprep.mubr.msk.f32.mxu1 %vm3966_vm11, %v7666_v11 }
 0x307   : > { %6078 = vmatmul.mubr.msk.f32.vlgmr.msra.gmra.mrb[10].mxu1 %vm3966_vm11, %v7676_v17 }
 0x308   : > { %6090 = vmatpush3.msra.mxu1 %v5644_v51  ;;  %6080 = vmatprep.mubr.msk.f32.mxu1 %vm3966_vm11, %v7681_v7 }
 0x309   : > { %6103 = vmatprep.subr.mxu1 %v5653_v49 }
 0x30b   : > { %6081 = vmatmul.mubr.msk.f32.gmra.mrb[12].mxu1 %vm3966_vm11, %v7685_v46 }
 0x30c   : > { %6083 = vmatprep.mubr.msk.f32.mxu1 %vm3966_vm11, %v7690_v12 }
 0x30f   : > { %6084 = vmatmul.mubr.msk.f32.gmra.mrb[14].mxu1 %vm3966_vm11, %v7694_v20 }
 0x310   : > { %6086 = vmatprep.mubr.msk.f32.mxu1 %vm3966_vm11, %v7698_v23 }
 0x313   : > { %6087 = vmatmul.mubr.msk.f32.gmra.mrb[16].mxu1 %vm3966_vm11, %v4556_v22 }
 0x314   : > { %6091 = vmatprep.mubr.msk.f32.mxu1 %vm3966_vm11, %v4255_v55 }
 0x317   : > { %6092 = vmatmul.mubr.msk.f32.vlgmr.msra.gmra.mrb[10].mxu1 %vm3966_vm11, %v7736_v59 }
 0x318   : > { %6104 = vmatpush3.msra.mxu1 %v5653_v49  ;;  %6094 = vmatprep.mubr.msk.f32.mxu1 %vm3966_vm11, %v7740_v35 }
 0x319   : > { %6117 = vmatprep.subr.mxu1 %v5662_v52 }
 0x31b   : > { %6095 = vmatmul.mubr.msk.f32.gmra.mrb[12].mxu1 %vm3966_vm11, %v7744_v53 }
 0x31c   : > { %6097 = vmatprep.mubr.msk.f32.mxu1 %vm3966_vm11, %v7748_v3 }
 0x31f   : > { %6098 = vmatmul.mubr.msk.f32.gmra.mrb[14].mxu1 %vm3966_vm11, %v7752_v1 }
 0x320   : > { %6100 = vmatprep.mubr.msk.f32.mxu1 %vm3966_vm11, %v7756_v14 }
 0x323   : > { %6101 = vmatmul.mubr.msk.f32.gmra.mrb[16].mxu1 %vm3966_vm11, %v4703_v38 }
 0x324   : > { %6105 = vmatprep.mubr.msk.f32.mxu1 %vm3966_vm11, %v7707_v13 }
 0x327   : > { %6106 = vmatmul.mubr.msk.f32.vlgmr.msra.gmra.mrb[10].mxu1 %vm3966_vm11, %v7711_v33 }
 0x328   : > { %6118 = vmatpush3.msra.mxu1 %v5662_v52  ;;  %6108 = vmatprep.mubr.msk.f32.mxu1 %vm3966_vm11, %v7715_v4 }
 0x329   : > { %6131 = vmatprep.subr.mxu1 %v5671_v21 }
 0x32b   : > { %6109 = vmatmul.mubr.msk.f32.gmra.mrb[12].mxu1 %vm3966_vm11, %v7719_v26 }
 0x32c   : > { %6111 = vmatprep.mubr.msk.f32.mxu1 %vm3966_vm11, %v7723_v36 }
 0x32f   : > { %6112 = vmatmul.mubr.msk.f32.gmra.mrb[14].mxu1 %vm3966_vm11, %v7727_v57 }
 0x330   : > { %6114 = vmatprep.mubr.msk.f32.mxu1 %vm3966_vm11, %v4409_v30 }
 0x333   : > { %6115 = vmatmul.mubr.msk.f32.gmra.mrb[16].mxu1 %vm3966_vm11, %v4851_v63 }
 0x334   : > { %6119 = vmatprep.mubr.msk.f32.mxu1 %vm3966_vm11, %v7676_v17 }
 0x337   : > { %6120 = vmatmul.mubr.msk.f32.vlgmr.msra.gmra.mrb[10].mxu1 %vm3966_vm11, %v7681_v7 }
 0x338   : > { %6132 = vmatpush3.msra.mxu1 %v5671_v21  ;;  %6122 = vmatprep.mubr.msk.f32.mxu1 %vm3966_vm11, %v7685_v46 }
 0x33b   : > { %6123 = vmatmul.mubr.msk.f32.gmra.mrb[12].mxu1 %vm3966_vm11, %v7690_v12 }
 0x33c   : > { %6125 = vmatprep.mubr.msk.f32.mxu1 %vm3966_vm11, %v7694_v20 }
 0x33f   : > { %6126 = vmatmul.mubr.msk.f32.gmra.mrb[14].mxu1 %vm3966_vm11, %v7698_v23 }
 0x340   : > { %6128 = vmatprep.mubr.msk.f32.mxu1 %vm3966_vm11, %v4556_v22 }
 0x343   : > { %6129 = vmatmul.mubr.msk.f32.gmra.mrb[16].mxu1 %vm3966_vm11, %v4998_v32 }
 0x344   : > { %6133 = vmatprep.mubr.msk.f32.mxu1 %vm3966_vm11, %v7736_v59 }
 0x347   : > { %6134 = vmatmul.mubr.msk.f32.vlgmr.msra.gmra.mrb[10].mxu1 %vm3966_vm11, %v7740_v35 }
 0x348   : > { %6136 = vmatprep.mubr.msk.f32.mxu1 %vm3966_vm11, %v7744_v53 }
 0x34b   : > { %6137 = vmatmul.mubr.msk.f32.gmra.mrb[12].mxu1 %vm3966_vm11, %v7748_v3 }
 0x34c   : > { %6139 = vmatprep.mubr.msk.f32.mxu1 %vm3966_vm11, %v7752_v1 }
 0x34f   : > { %6140 = vmatmul.mubr.msk.f32.gmra.mrb[14].mxu1 %vm3966_vm11, %v7756_v14 }
 0x350   : > { %6142 = vmatprep.mubr.msk.f32.mxu1 %vm3966_vm11, %v4703_v38 }
 0x353   : > { %6143 = vmatmul.mubr.msk.f32.gmra.mrb[16].mxu1 %vm3966_vm11, %v5145_v27 }
 0x41a   : > { %v6135_v39 = vpop.f32.mrb[10].mxu1 }
 0x41b   : > { %v5293_v0 = vmul.f32 %v6135_v39, %v5680_v31  ;;  %v5238_v5 = vpop.f32.mrb[11].mxu1 }
 0x41c   : > { %v5292_v43 = vmul.f32 %v5680_v31, %v5238_v5 }
 0x41d   : > { %v5308_v37 = vadd.f32 %v5681_v29, %v5293_v0 }
 0x41e   : > { %v5307_v9 = vadd.f32 %v5681_v29, %v5292_v43  ;;  %v6138_v10 = vpop.f32.mrb[12].mxu1 }
 0x41f   : > { %v5316_v45 = vmax.f32 %v5308_v37, 0.0  ;;  %v5295_v19 = vmul.f32 %v6138_v10, %v5680_v31  ;;  %v5248_v62 = vpop.f32.mrb[13].mxu1 }
 0x420   : > { %v5315_v60 = vmax.f32 %v5307_v9, 0.0  ;;  %v5294_v41 = vmul.f32 %v5680_v31, %v5248_v62 }
 0x421   : > { %5324 = vst.msk [vmem:[%s7867_s18 + $0x8] sm:$0xff] %vm3966_vm11, %v5316_v45  ;;  %v5310_v48 = vadd.f32 %v5681_v29, %v5295_v19 }
 0x422   : > { %5323 = vst.msk [vmem:[%s7867_s18] sm:$0xff] %vm3966_vm11, %v5315_v60  ;;  %v5309_v54 = vadd.f32 %v5681_v29, %v5294_v41  ;;  %v6141_v56 = vpop.f32.mrb[14].mxu1 }
 0x423   : > { %v5318_v2 = vmax.f32 %v5310_v48, 0.0  ;;  %v5297_v40 = vmul.f32 %v6141_v56, %v5680_v31  ;;  %v5258_v11 = vpop.f32.mrb[15].mxu1 }
 0x424   : > { %v5317_v58 = vmax.f32 %v5309_v54, 0.0  ;;  %v5296_v18 = vmul.f32 %v5680_v31, %v5258_v11 }
 0x425   : > { %5326 = vst.msk [vmem:[%s7867_s18 + $0x18] sm:$0xff] %vm3966_vm11, %v5318_v2  ;;  %v5312_v6 = vadd.f32 %v5681_v29, %v5297_v40 }
 0x426   : > { %5325 = vst.msk [vmem:[%s7867_s18 + $0x10] sm:$0xff] %vm3966_vm11, %v5317_v58  ;;  %v5311_v50 = vadd.f32 %v5681_v29, %v5296_v18  ;;  %v6144_v28 = vpop.f32.mrb[16].mxu1 }
 0x427   : > { %v5320_v47 = vmax.f32 %v5312_v6, 0.0  ;;  %v5299_v8 = vmul.f32 %v6144_v28, %v5680_v31  ;;  %v5268_v25 = vpop.f32.mrb[17].mxu1 }
 0x428   : > { %v5319_v17 = vmax.f32 %v5311_v50, 0.0  ;;  %v5298_v24 = vmul.f32 %v5680_v31, %v5268_v25 }
 0x429   : > { %5328 = vst.msk [vmem:[%s7867_s18 + $0x28] sm:$0xff] %vm3966_vm11, %v5320_v47  ;;  %v5314_v7 = vadd.f32 %v5681_v29, %v5299_v8 }
 0x42a   : > { %5327 = vst.msk [vmem:[%s7867_s18 + $0x20] sm:$0xff] %vm3966_vm11, %v5319_v17  ;;  %v5313_v61 = vadd.f32 %v5681_v29, %v5298_v24 }
 0x42b   : > { %v5322_v46 = vmax.f32 %v5314_v7, 0.0 }
 0x42c   : > { %v5321_v12 = vmax.f32 %v5313_v61, 0.0 }
 0x42d   : > { %5330 = vst.msk [vmem:[%s7867_s18 + $0x38] sm:$0xff] %vm3966_vm11, %v5322_v46 }
 0x42e   : > { %5329 = vst.msk [vmem:[%s7867_s18 + $0x30] sm:$0xff] %vm3966_vm11, %v5321_v12 }
 0x42f PF: > { %s17_s26 = sadd.s32 1, %s6367_s26   ;;  %s7902_s24 = smov %s6363_s25 }
 0x430   : > { %p14_p5 = scmp.ge.s32.totalorder %s17_s26, 4   ;;  %s7903_s25 = smov %s7905_s27 }
 0x432   :  { %16 = sbr.rel (!%p14_p5) target bundleno = 2 (0x2), region = 105 }

</bundles_post_ra>
